<compile_context>
chip_gen: v6e
topology: v6e:2x2x1
jax: 0.10.0
libtpu: 0.0.40
codegen_flags: <defaults>
</compile_context>

<pallas_src>
import math
import functools

import jax
import jax.numpy as jnp
from jax import lax
from jax.experimental import pallas as pl
from jax.experimental.pallas import tpu as pltpu

EPS = 1e-5                      # nn.LayerNorm default eps
NEG_INF = -1e30                 # additive mask value for key_padding_mask
VMEM_LIMIT = 32 * 1024 * 1024   # safe on every generation (>= v5e's 16 MiB scoped default)
SEQ_TILE_CAP = 512              # good for v5e/v6e (128 MiB VMEM); use ~256 on v7x (64 MiB)


# ----------------------------------------------------------------------------
# helpers
# ----------------------------------------------------------------------------

def _round_up(x, m):
    return (x + m - 1) // m * m


def _seq_tile(s, cap=SEQ_TILE_CAP):
    """Sequence tile: multiple of 8 (or the full extent), <= cap, and >= 2 grid
    steps whenever s allows so both v7x TensorCores get work."""
    if s <= 8:
        return s
    return min(cap, _round_up((s + 1) // 2, 8))


def _params(ndim):
    return pltpu.CompilerParams(
        dimension_semantics=("parallel",) * ndim,
        vmem_limit_bytes=VMEM_LIMIT)


def _ln(x, g, b):
    """LayerNorm over last dim; x f32 (R, D), g/b (1, D)."""
    mu = jnp.mean(x, axis=-1, keepdims=True)
    var = jnp.mean(jnp.square(x - mu), axis=-1, keepdims=True)
    return (x - mu) * lax.rsqrt(var + EPS) * g + b


def _dot(a_f32, w_bf16):
    """Activation cast to bf16 at the MXU; weights are pre-cast bf16; f32 accumulation."""
    return jnp.dot(a_f32.astype(jnp.bfloat16), w_bf16,
                   preferred_element_type=jnp.float32)


# ----------------------------------------------------------------------------
# Pallas kernels
# ----------------------------------------------------------------------------

def _self_prep_kernel(x_ref, pq_ref, pk_ref, g_ref, b_ref, wqkv_ref, bv_ref,
                      q_ref, k_ref, v_ref):
    """Self-attn prep: xn = LN(x); one (tm, d) @ (d, 3d) matmul; q/k get the
    per-layer precomputed positional projections (pos @ Wq + bq etc.)."""
    d = q_ref.shape[-1]
    xn = _ln(x_ref[...].astype(jnp.float32), g_ref[...], b_ref[...])
    qkv = _dot(xn, wqkv_ref[...])                                  # (tm, 3d)
    q_ref[...] = (qkv[:, :d] + pq_ref[...]).astype(q_ref.dtype)
    k_ref[...] = (qkv[:, d:2 * d] + pk_ref[...]).astype(k_ref.dtype)
    v_ref[...] = (qkv[:, 2 * d:] + bv_ref[...]).astype(v_ref.dtype)


def self_attn_prep(x, pos_q, pos_k, g, b, w_qkv, b_v, *, tm):
    B, S, d = x.shape
    row3 = lambda bb, i: (bb, i, 0)
    rowp = lambda bb, i: (i, 0)
    full = lambda bb, i: (0, 0)
    out = jax.ShapeDtypeStruct((B, S, d), x.dtype)
    return pl.pallas_call(
        _self_prep_kernel,
        grid=(B, pl.cdiv(S, tm)),
        in_specs=[
            pl.BlockSpec((None, tm, d), row3),     # x
            pl.BlockSpec((tm, d), rowp),           # pos@Wq + bq  (shared across batch)
            pl.BlockSpec((tm, d), rowp),           # pos@Wk + bk
            pl.BlockSpec((1, d), full),            # norm1 gamma
            pl.BlockSpec((1, d), full),            # norm1 beta
            pl.BlockSpec((d, 3 * d), full),        # fused [Wq*scale | Wk | Wv] bf16
            pl.BlockSpec((1, d), full),            # b_v
        ],
        out_specs=(pl.BlockSpec((None, tm, d), row3),) * 3,
        out_shape=(out, out, out),
        compiler_params=_params(2),
    )(x, pos_q, pos_k, g, b, w_qkv, b_v)


def _ln_linear_pos_kernel(x_ref, pos_ref, g_ref, b_ref, w_ref, o_ref):
    """Cross-attn Q prep: LN(x) @ Wq + (pos @ Wq + bq)."""
    xn = _ln(x_ref[...].astype(jnp.float32), g_ref[...], b_ref[...])
    o_ref[...] = (_dot(xn, w_ref[...]) + pos_ref[...]).astype(o_ref.dtype)


def cross_q_prep(x, pos_q, g, b, w_q, *, tm):
    B, S, d = x.shape
    row3 = lambda bb, i: (bb, i, 0)
    rowp = lambda bb, i: (i, 0)
    full = lambda bb, i: (0, 0)
    return pl.pallas_call(
        _ln_linear_pos_kernel,
        grid=(B, pl.cdiv(S, tm)),
        in_specs=[
            pl.BlockSpec((None, tm, d), row3),
            pl.BlockSpec((tm, d), rowp),
            pl.BlockSpec((1, d), full),
            pl.BlockSpec((1, d), full),
            pl.BlockSpec((d, d), full),
        ],
        out_specs=pl.BlockSpec((None, tm, d), row3),
        out_shape=jax.ShapeDtypeStruct((B, S, d), x.dtype),
        compiler_params=_params(2),
    )(x, pos_q, g, b, w_q)


def _txt_kv_kernel(t_ref, pk_ref, wkv_ref, bv_ref, k_ref, v_ref):
    """Cross-attn K/V prep: one txt @ [Wk | Wv] matmul; K gets (txt_pos @ Wk + bk)."""
    d = k_ref.shape[-1]
    kv = _dot(t_ref[...].astype(jnp.float32), wkv_ref[...])
    k_ref[...] = (kv[:, :d] + pk_ref[...]).astype(k_ref.dtype)
    v_ref[...] = (kv[:, d:] + bv_ref[...]).astype(v_ref.dtype)


def txt_kv_prep(t, pos_k, w_kv, b_v, *, tt):
    B, S, d = t.shape
    row3 = lambda bb, i: (bb, i, 0)
    rowp = lambda bb, i: (i, 0)
    full = lambda bb, i: (0, 0)
    out = jax.ShapeDtypeStruct((B, S, d), t.dtype)
    return pl.pallas_call(
        _txt_kv_kernel,
        grid=(B, pl.cdiv(S, tt)),
        in_specs=[
            pl.BlockSpec((None, tt, d), row3),
            pl.BlockSpec((tt, d), rowp),
            pl.BlockSpec((d, 2 * d), full),
            pl.BlockSpec((1, d), full),
        ],
        out_specs=(pl.BlockSpec((None, tt, d), row3),) * 2,
        out_shape=(out, out),
        compiler_params=_params(2),
    )(t, pos_k, w_kv, b_v)


def _attn_kernel(*refs, nhead, has_bias):
    """Fused multi-head attention + out-projection + LayerNorm + residual.
    One (batch, q-tile) grid step; all heads processed with batched MXU ops."""
    if has_bias:
        (q_ref, k_ref, v_ref, bias_ref, res_ref,
         wo_ref, bo_ref, g_ref, gb_ref, o_ref) = refs
    else:
        (q_ref, k_ref, v_ref, res_ref,
         wo_ref, bo_ref, g_ref, gb_ref, o_ref) = refs
        bias_ref = None

    tq, d = q_ref.shape
    hd = d // nhead

    def split_heads(ref):
        # (s, d) -> (nhead, s, hd) head-major via static lane slices stacked on a new
        # leading batch axis (no minor-dim reshape, no axis=-1 concatenate).
        x = ref[...].astype(jnp.bfloat16)
        return jnp.stack([x[:, h * hd:(h + 1) * hd] for h in range(nhead)], axis=0)

    qh = split_heads(q_ref)          # 1/sqrt(hd) already folded into W_q
    kh = split_heads(k_ref)
    vh = split_heads(v_ref)

    # batched-head score / value matmuls: one MXU op each instead of nhead tiny ones
    s = jnp.einsum('hqd,hkd->hqk', qh, kh,
                   preferred_element_type=jnp.float32)             # (nhead, tq, sk)
    if bias_ref is not None:
        s = s + bias_ref[...]                                      # (1, sk) pad-mask bias
    s = s - jnp.max(s, axis=-1, keepdims=True)
    p = jnp.exp(s)
    p = p * pl.reciprocal(jnp.sum(p, axis=-1, keepdims=True), approx=True)
    o = jnp.einsum('hqk,hkd->hqd', p.astype(jnp.bfloat16), vh,
                   preferred_element_type=jnp.float32)             # (nhead, tq, hd)

    # fused out-projection:  concat_h(o_h) @ W_o == sum_h o_h @ W_o[h*hd:(h+1)*hd]
    # (removes the cross-lane concatenate; the only store is one dense (tq, d) tile)
    wo = wo_ref[...]                                               # (d, d) bf16
    y = jnp.zeros((tq, d), jnp.float32)
    for h in range(nhead):
        y = y + jnp.dot(o[h].astype(jnp.bfloat16), wo[h * hd:(h + 1) * hd, :],
                        preferred_element_type=jnp.float32)
    y = y + bo_ref[...]
    y = _ln(y, g_ref[...], gb_ref[...])                            # self/cross_attn_norm
    o_ref[...] = (res_ref[...].astype(jnp.float32) + y).astype(o_ref.dtype)


def attention_block(q, k, v, res, w_o, b_o, g, gb, *, nhead, bias=None, tq):
    B, Sq, d = q.shape
    Sk = k.shape[1]
    row = lambda bb, i: (bb, i, 0)
    kv_map = lambda bb, i: (bb, 0, 0)
    full = lambda bb, i: (0, 0)

    in_specs = [
        pl.BlockSpec((None, tq, d), row),        # q tile
        pl.BlockSpec((None, Sk, d), kv_map),     # full k for batch b
        pl.BlockSpec((None, Sk, d), kv_map),     # full v for batch b
    ]
    args = [q, k, v]
    if bias is not None:                          # zero self-attention bias is dropped
        in_specs.append(pl.BlockSpec((None, 1, Sk), lambda bb, i: (bb, 0, 0)))
        args.append(bias)
    in_specs += [
        pl.BlockSpec((None, tq, d), row),        # residual
        pl.BlockSpec((d, d), full),              # W_o (bf16)
        pl.BlockSpec((1, d), full),              # b_o
        pl.BlockSpec((1, d), full),              # post-attn LN gamma
        pl.BlockSpec((1, d), full),              # post-attn LN beta
    ]
    args += [res, w_o, b_o, g, gb]

    return pl.pallas_call(
        functools.partial(_attn_kernel, nhead=nhead, has_bias=bias is not None),
        grid=(B, pl.cdiv(Sq, tq)),
        in_specs=in_specs,
        out_specs=pl.BlockSpec((None, tq, d), row),
        out_shape=jax.ShapeDtypeStruct((B, Sq, d), q.dtype),
        compiler_params=_params(2),
    )(*args)


def _ffn_kernel(x_ref, g3_ref, b3_ref, w1_ref, b1_ref, gf_ref, bf_ref,
                w2_ref, b2_ref, o_ref):
    """Fused FFN: LN -> Linear -> ReLU -> LayerNorm -> Linear -> +residual.
    The (tm, dim_ffn) hidden activation never leaves VMEM."""
    x = x_ref[...].astype(jnp.float32)
    xn = _ln(x, g3_ref[...], b3_ref[...])
    h = _dot(xn, w1_ref[...]) + b1_ref[...]
    h = jnp.maximum(h, 0.0)
    h = _ln(h, gf_ref[...], bf_ref[...])
    y = _dot(h, w2_ref[...]) + b2_ref[...]
    o_ref[...] = (x + y).astype(o_ref.dtype)


def ffn(x, g3, b3, w1, b1, gf, bf_, w2, b2, *, tm):
    B, S, d = x.shape
    f = w1.shape[1]
    row3 = lambda bb, i: (bb, i, 0)
    full = lambda bb, i: (0, 0)
    return pl.pallas_call(
        _ffn_kernel,
        grid=(B, pl.cdiv(S, tm)),
        in_specs=[
            pl.BlockSpec((None, tm, d), row3),
            pl.BlockSpec((1, d), full),
            pl.BlockSpec((1, d), full),
            pl.BlockSpec((d, f), full),
            pl.BlockSpec((1, f), full),
            pl.BlockSpec((1, f), full),
            pl.BlockSpec((1, f), full),
            pl.BlockSpec((f, d), full),
            pl.BlockSpec((1, d), full),
        ],
        out_specs=pl.BlockSpec((None, tm, d), row3),
        out_shape=jax.ShapeDtypeStruct((B, S, d), x.dtype),
        compiler_params=_params(2),
    )(x, g3, b3, w1, b1, gf, bf_, w2, b2)


def _ln_kernel(x_ref, g_ref, b_ref, o_ref):
    o_ref[...] = _ln(x_ref[...].astype(jnp.float32),
                     g_ref[...], b_ref[...]).astype(o_ref.dtype)


def layernorm(x, g, b, *, tm):
    B, S, d = x.shape
    row3 = lambda bb, i: (bb, i, 0)
    full = lambda bb, i: (0, 0)
    return pl.pallas_call(
        _ln_kernel,
        grid=(B, pl.cdiv(S, tm)),
        in_specs=[pl.BlockSpec((None, tm, d), row3),
                  pl.BlockSpec((1, d), full),
                  pl.BlockSpec((1, d), full)],
        out_specs=pl.BlockSpec((None, tm, d), row3),
        out_shape=jax.ShapeDtypeStruct((B, S, d), x.dtype),
        compiler_params=_params(2),
    )(x, g.reshape(1, d), b.reshape(1, d))


# ----------------------------------------------------------------------------
# positional encodings (pure JAX, trace-time constants)
# ----------------------------------------------------------------------------

def pos1d(d_model, length):
    position = jnp.arange(length, dtype=jnp.float32)[:, None]
    div_term = jnp.exp(jnp.arange(0, d_model, 2, dtype=jnp.float32)
                       * -(math.log(10000.0) / d_model))
    pe = jnp.zeros((length, d_model), jnp.float32)
    pe = pe.at[:, 0::2].set(jnp.sin(position * div_term))
    pe = pe.at[:, 1::2].set(jnp.cos(position * div_term))
    return pe                                                       # (L, D)


def pos2d(d_model, height, width):
    assert d_model % 4 == 0
    half = d_model // 2
    div_term = jnp.exp(jnp.arange(0.0, half, 2, dtype=jnp.float32)
                       * -(math.log(10000.0) / half))
    pos_w = jnp.arange(0.0, width, dtype=jnp.float32)[:, None]
    pos_h = jnp.arange(0.0, height, dtype=jnp.float32)[:, None]
    sin_w = jnp.sin(pos_w * div_term).T
    cos_w = jnp.cos(pos_w * div_term).T
    sin_h = jnp.sin(pos_h * div_term).T
    cos_h = jnp.cos(pos_h * div_term).T
    n = half // 2
    pe = jnp.zeros((d_model, height, width), jnp.float32)
    pe = pe.at[0:half:2].set(jnp.broadcast_to(sin_w[:, None, :], (n, height, width)))
    pe = pe.at[1:half:2].set(jnp.broadcast_to(cos_w[:, None, :], (n, height, width)))
    pe = pe.at[half::2].set(jnp.broadcast_to(sin_h[:, :, None], (n, height, width)))
    pe = pe.at[half + 1::2].set(jnp.broadcast_to(cos_h[:, :, None], (n, height, width)))
    return pe.reshape(d_model, height * width).T                    # (HW, D)


# ----------------------------------------------------------------------------
# parameter prep + model glue
# ----------------------------------------------------------------------------

def _prepare_layer(p, vis_pos, txt_pos, nhead):
    """Fold the attention scale into W_q, precompute per-layer positional projections
    (shared across batch), fuse QKV / KV weights and cast all weight matrices to bf16."""
    d = p['norm1_g'].shape[0]
    scale = 1.0 / math.sqrt(d // nhead)
    sa, ca = p['self_attn'], p['cross_attn']
    bf16 = lambda w: w.astype(jnp.bfloat16)
    r1 = lambda v: v.reshape(1, -1)

    sa_wq, sa_bq = sa['w_q'] * scale, sa['b_q'] * scale
    ca_wq, ca_bq = ca['w_q'] * scale, ca['b_q'] * scale

    return {
        'norm1_g': r1(p['norm1_g']), 'norm1_b': r1(p['norm1_b']),
        'norm2_g': r1(p['norm2_g']), 'norm2_b': r1(p['norm2_b']),
        'norm3_g': r1(p['norm3_g']), 'norm3_b': r1(p['norm3_b']),
        'sa_norm_g': r1(p['sa_norm_g']), 'sa_norm_b': r1(p['sa_norm_b']),
        'ca_norm_g': r1(p['ca_norm_g']), 'ca_norm_b': r1(p['ca_norm_b']),
        # self attention
        'sa_w_qkv': bf16(jnp.concatenate([sa_wq, sa['w_k'], sa['w_v']], axis=1)),
        'sa_b_v': r1(sa['b_v']),
        'sa_pos_q': vis_pos @ sa_wq + sa_bq,          # (HW, d), f32
        'sa_pos_k': vis_pos @ sa['w_k'] + sa['b_k'],
        'sa_w_o': bf16(sa['w_o']), 'sa_b_o': r1(sa['b_o']),
        # cross attention
        'ca_w_q': bf16(ca_wq),
        'ca_pos_q': vis_pos @ ca_wq + ca_bq,
        'ca_w_kv': bf16(jnp.concatenate([ca['w_k'], ca['w_v']], axis=1)),
        'ca_pos_k': txt_pos @ ca['w_k'] + ca['b_k'],  # (L, d)
        'ca_b_v': r1(ca['b_v']),
        'ca_w_o': bf16(ca['w_o']), 'ca_b_o': r1(ca['b_o']),
        # ffn
        'ffn_w1': bf16(p['ffn_w1']), 'ffn_b1': r1(p['ffn_b1']),
        'ffn_ln_g': r1(p['ffn_ln_g']), 'ffn_ln_b': r1(p['ffn_ln_b']),
        'ffn_w2': bf16(p['ffn_w2']), 'ffn_b2': r1(p['ffn_b2']),
    }


def decoder_layer(vis, txt, pp, cross_bias, nhead, tm, tt):
    # --- self attention (no bias input: zero mask dropped entirely) ---
    q, k, v = self_attn_prep(vis, pp['sa_pos_q'], pp['sa_pos_k'],
                             pp['norm1_g'], pp['norm1_b'],
                             pp['sa_w_qkv'], pp['sa_b_v'], tm=tm)
    vis = attention_block(q, k, v, vis, pp['sa_w_o'], pp['sa_b_o'],
                          pp['sa_norm_g'], pp['sa_norm_b'],
                          nhead=nhead, bias=None, tq=tm)

    # --- cross attention ---
    q = cross_q_prep(vis, pp['ca_pos_q'], pp['norm2_g'], pp['norm2_b'],
                     pp['ca_w_q'], tm=tm)
    k, v = txt_kv_prep(txt, pp['ca_pos_k'], pp['ca_w_kv'], pp['ca_b_v'], tt=tt)
    vis = attention_block(q, k, v, vis, pp['ca_w_o'], pp['ca_b_o'],
                          pp['ca_norm_g'], pp['ca_norm_b'],
                          nhead=nhead, bias=cross_bias, tq=tm)

    # --- FFN (fully fused) ---
    vis = ffn(vis, pp['norm3_g'], pp['norm3_b'], pp['ffn_w1'], pp['ffn_b1'],
              pp['ffn_ln_g'], pp['ffn_ln_b'], pp['ffn_w2'], pp['ffn_b2'], tm=tm)
    return vis


@functools.partial(jax.jit, static_argnums=(4,))
def transformer_decoder(vis, txt, pad_mask, params, nhead):
    """vis: (B, C, H, W), txt: (B, L, C), pad_mask: (B, L) bool -> (B, C, H*W)."""
    B, C, H, W = vis.shape
    _, L, D = txt.shape
    HW = H * W
    assert D == C and C % nhead == 0

    vis_pos = pos2d(C, H, W)                    # (HW, C), shared across batch (not tiled)
    txt_pos = pos1d(D, L)                       # (L, D)

    x = vis.reshape(B, C, HW).transpose(0, 2, 1)          # (B, HW, C)
    t = txt                                               # (B, L, D)

    cross_bias = jnp.where(pad_mask, NEG_INF, 0.0).astype(jnp.float32).reshape(B, 1, L)
    # NOTE: rows whose key_padding_mask is entirely True give a uniform softmax
    # instead of PyTorch's NaNs (benign semantic difference).

    tm = _seq_tile(HW)
    tt = _seq_tile(L)

    for lp in params['layers']:
        pp = _prepare_layer(lp, vis_pos, txt_pos, nhead)
        x = decoder_layer(x, t, pp, cross_bias, nhead, tm, tt)

    x = layernorm(x, params['final_g'], params['final_b'], tm=tm)
    return x.transpose(0, 2, 1)                            # (B, C, HW)


# ----------------------------------------------------------------------------
# deterministic synthetic parameter init
# ----------------------------------------------------------------------------

def init_mha_params(key, d):
    ks = jax.random.split(key, 4)
    s = 0.05
    zb = jnp.zeros((d,), jnp.float32)
    return {'w_q': jax.random.normal(ks[0], (d, d), jnp.float32) * s, 'b_q': zb,
            'w_k': jax.random.normal(ks[1], (d, d), jnp.float32) * s, 'b_k': zb,
            'w_v': jax.random.normal(ks[2], (d, d), jnp.float32) * s, 'b_v': zb,
            'w_o': jax.random.normal(ks[3], (d, d), jnp.float32) * s, 'b_o': zb}


def init_layer_params(key, d, f):
    ks = jax.random.split(key, 4)
    s = 0.05
    return {
        'norm1_g': jnp.ones((d,), jnp.float32), 'norm1_b': jnp.zeros((d,), jnp.float32),
        'norm2_g': jnp.ones((d,), jnp.float32), 'norm2_b': jnp.zeros((d,), jnp.float32),
        'norm3_g': jnp.ones((d,), jnp.float32), 'norm3_b': jnp.zeros((d,), jnp.float32),
        'sa_norm_g': jnp.ones((d,), jnp.float32), 'sa_norm_b': jnp.zeros((d,), jnp.float32),
        'ca_norm_g': jnp.ones((d,), jnp.float32), 'ca_norm_b': jnp.zeros((d,), jnp.float32),
        'self_attn': init_mha_params(ks[0], d),
        'cross_attn': init_mha_params(ks[1], d),
        'ffn_w1': jax.random.normal(ks[2], (d, f), jnp.float32) * s,
        'ffn_b1': jnp.zeros((f,), jnp.float32),
        'ffn_ln_g': jnp.ones((f,), jnp.float32), 'ffn_ln_b': jnp.zeros((f,), jnp.float32),
        'ffn_w2': jax.random.normal(ks[3], (f, d), jnp.float32) * s,
        'ffn_b2': jnp.zeros((d,), jnp.float32),
    }


if __name__ == "__main__":
    # small shapes consistent with the module: d_model divisible by nhead and by 4
    B, C, H, W = 2, 128, 4, 4       # vis: (B, C, H, W), d_model = 128
    L = 8                           # txt seq length
    nhead = 4
    dim_ffn = 256
    num_layers = 2

    key = jax.random.PRNGKey(0)
    k_vis, k_txt, k_par = jax.random.split(key, 3)
    vis = jax.random.normal(k_vis, (B, C, H, W), jnp.float32)
    txt = jax.random.normal(k_txt, (B, L, C), jnp.float32)
    pad_mask = jnp.zeros((B, L), dtype=bool).at[:, L - 2:].set(True)  # last 2 tokens padded

    layer_keys = jax.random.split(k_par, num_layers)
    params = {
        'layers': [init_layer_params(lk, C, dim_ffn) for lk in layer_keys],
        'final_g': jnp.ones((C,), jnp.float32),
        'final_b': jnp.zeros((C,), jnp.float32),
    }

    out = transformer_decoder(vis, txt, pad_mask, params, nhead)
    jax.block_until_ready(out)
    assert out.shape == (B, C, H * W), out.shape
    assert bool(jnp.all(jnp.isfinite(out)))
    print("KERNEL_OK")
</pallas_src>

<mosaic_0001>
module attributes {stable_mosaic.version = 11 : i64} {
  func.func @_self_prep_kernel(%arg0: i32, %arg1: i32, %arg2: memref<1x8x128xf32, #tpu.memory_space<vmem>>, %arg3: memref<8x128xf32, #tpu.memory_space<vmem>>, %arg4: memref<8x128xf32, #tpu.memory_space<vmem>>, %arg5: memref<1x128xf32, #tpu.memory_space<vmem>>, %arg6: memref<1x128xf32, #tpu.memory_space<vmem>>, %arg7: memref<128x384xbf16, #tpu.memory_space<vmem>>, %arg8: memref<1x128xf32, #tpu.memory_space<vmem>>, %arg9: memref<1x8x128xf32, #tpu.memory_space<vmem>>, %arg10: memref<1x8x128xf32, #tpu.memory_space<vmem>>, %arg11: memref<1x8x128xf32, #tpu.memory_space<vmem>>) attributes {dimension_semantics = [#tpu.dimension_semantics<parallel>, #tpu.dimension_semantics<parallel>], iteration_bounds = array<i64: 2, 2>, scalar_prefetch = 0 : i64, scratch_operands = 0 : i64, tpu.core_type = #tpu.core_type<tc>, window_params = [{transform_indices = @transform_0, window_bounds = array<i64: 1, 8, 128>}, {transform_indices = @transform_1, window_bounds = array<i64: 8, 128>}, {transform_indices = @transform_2, window_bounds = array<i64: 8, 128>}, {pipeline_mode = #tpu.pipeline_mode<synchronous>, transform_indices = @transform_3, window_bounds = array<i64: 1, 128>}, {pipeline_mode = #tpu.pipeline_mode<synchronous>, transform_indices = @transform_4, window_bounds = array<i64: 1, 128>}, {pipeline_mode = #tpu.pipeline_mode<synchronous>, transform_indices = @transform_5, window_bounds = array<i64: 128, 384>}, {pipeline_mode = #tpu.pipeline_mode<synchronous>, transform_indices = @transform_6, window_bounds = array<i64: 1, 128>}, {transform_indices = @transform_7, window_bounds = array<i64: 1, 8, 128>}, {transform_indices = @transform_8, window_bounds = array<i64: 1, 8, 128>}, {transform_indices = @transform_9, window_bounds = array<i64: 1, 8, 128>}]} {
    %c0 = arith.constant 0 : index
    %c0_0 = arith.constant 0 : index
    %c0_1 = arith.constant 0 : index
    %0 = vector.load %arg2[%c0, %c0_0, %c0_1] : memref<1x8x128xf32, #tpu.memory_space<vmem>>, vector<1x8x128xf32>
    %1 = vector.shape_cast %0 : vector<1x8x128xf32> to vector<8x128xf32>
    %c0_2 = arith.constant 0 : index
    %c0_3 = arith.constant 0 : index
    %2 = vector.load %arg5[%c0_2, %c0_3] : memref<1x128xf32, #tpu.memory_space<vmem>>, vector<1x128xf32>
    %c0_4 = arith.constant 0 : index
    %c0_5 = arith.constant 0 : index
    %3 = vector.load %arg6[%c0_4, %c0_5] : memref<1x128xf32, #tpu.memory_space<vmem>>, vector<1x128xf32>
    %cst = arith.constant dense<0.000000e+00> : vector<8xf32>
    %4 = vector.multi_reduction <add>, %1, %cst [1] : vector<8x128xf32> to vector<8xf32>
    %5 = vector.shape_cast %4 : vector<8xf32> to vector<8x1xf32>
    %cst_6 = arith.constant 1.280000e+02 : f32
    %6 = vector.broadcast %cst_6 : f32 to vector<8x1xf32>
    %7 = arith.divf %5, %6 : vector<8x1xf32>
    %8 = vector.broadcast %7 : vector<8x1xf32> to vector<8x128xf32>
    %9 = arith.subf %1, %8 : vector<8x128xf32>
    %10 = arith.mulf %9, %9 : vector<8x128xf32>
    %cst_7 = arith.constant dense<0.000000e+00> : vector<8xf32>
    %11 = vector.multi_reduction <add>, %10, %cst_7 [1] : vector<8x128xf32> to vector<8xf32>
    %12 = vector.shape_cast %11 : vector<8xf32> to vector<8x1xf32>
    %cst_8 = arith.constant 1.280000e+02 : f32
    %13 = vector.broadcast %cst_8 : f32 to vector<8x1xf32>
    %14 = arith.divf %12, %13 : vector<8x1xf32>
    %15 = vector.broadcast %7 : vector<8x1xf32> to vector<8x128xf32>
    %16 = arith.subf %1, %15 : vector<8x128xf32>
    %cst_9 = arith.constant 9.99999974E-6 : f32
    %17 = vector.broadcast %cst_9 : f32 to vector<8x1xf32>
    %18 = arith.addf %14, %17 : vector<8x1xf32>
    %19 = math.rsqrt %18 : vector<8x1xf32>
    %20 = vector.broadcast %19 : vector<8x1xf32> to vector<8x128xf32>
    %21 = arith.mulf %16, %20 : vector<8x128xf32>
    %22 = vector.broadcast %2 : vector<1x128xf32> to vector<8x128xf32>
    %23 = arith.mulf %21, %22 : vector<8x128xf32>
    %24 = vector.broadcast %3 : vector<1x128xf32> to vector<8x128xf32>
    %25 = arith.addf %23, %24 : vector<8x128xf32>
    %c0_10 = arith.constant 0 : index
    %c0_11 = arith.constant 0 : index
    %26 = vector.load %arg7[%c0_10, %c0_11] : memref<128x384xbf16, #tpu.memory_space<vmem>>, vector<128x384xbf16>
    %27 = arith.truncf %25 : vector<8x128xf32> to vector<8x128xbf16>
    %cst_12 = arith.constant dense<0.000000e+00> : vector<8x384xf32>
    %28 = tpu.matmul %27, %26, %cst_12 {dimension_numbers = #tpu.dot_dimension_numbers<[1], [0], [0], [1], [0, 0, 1, 1], [], []>} : vector<8x128xbf16>, vector<128x384xbf16>, vector<8x384xf32> -> vector<8x384xf32>
    %29 = vector.extract_strided_slice %28 {offsets = [0, 0], sizes = [8, 128], strides = [1, 1]} : vector<8x384xf32> to vector<8x128xf32>
    %c0_13 = arith.constant 0 : index
    %c0_14 = arith.constant 0 : index
    %30 = vector.load %arg3[%c0_13, %c0_14] : memref<8x128xf32, #tpu.memory_space<vmem>>, vector<8x128xf32>
    %31 = arith.addf %29, %30 : vector<8x128xf32>
    %c0_15 = arith.constant 0 : index
    %c0_16 = arith.constant 0 : index
    %c0_17 = arith.constant 0 : index
    %32 = vector.load %arg9[%c0_15, %c0_16, %c0_17] : memref<1x8x128xf32, #tpu.memory_space<vmem>>, vector<1x8x128xf32>
    %33 = vector.shape_cast %32 : vector<1x8x128xf32> to vector<8x128xf32>
    %34 = vector.shape_cast %31 : vector<8x128xf32> to vector<1x8x128xf32>
    tpu.vector_store %arg9[%c0_15, %c0_16, %c0_17], %34 {strides = array<i32>} : memref<1x8x128xf32, #tpu.memory_space<vmem>>, vector<1x8x128xf32>,
    %35 = vector.extract_strided_slice %28 {offsets = [0, 128], sizes = [8, 128], strides = [1, 1]} : vector<8x384xf32> to vector<8x128xf32>
    %c0_18 = arith.constant 0 : index
    %c0_19 = arith.constant 0 : index
    %36 = vector.load %arg4[%c0_18, %c0_19] : memref<8x128xf32, #tpu.memory_space<vmem>>, vector<8x128xf32>
    %37 = arith.addf %35, %36 : vector<8x128xf32>
    %c0_20 = arith.constant 0 : index
    %c0_21 = arith.constant 0 : index
    %c0_22 = arith.constant 0 : index
    %38 = vector.load %arg10[%c0_20, %c0_21, %c0_22] : memref<1x8x128xf32, #tpu.memory_space<vmem>>, vector<1x8x128xf32>
    %39 = vector.shape_cast %38 : vector<1x8x128xf32> to vector<8x128xf32>
    %40 = vector.shape_cast %37 : vector<8x128xf32> to vector<1x8x128xf32>
    tpu.vector_store %arg10[%c0_20, %c0_21, %c0_22], %40 {strides = array<i32>} : memref<1x8x128xf32, #tpu.memory_space<vmem>>, vector<1x8x128xf32>,
    %41 = vector.extract_strided_slice %28 {offsets = [0, 256], sizes = [8, 128], strides = [1, 1]} : vector<8x384xf32> to vector<8x128xf32>
    %c0_23 = arith.constant 0 : index
    %c0_24 = arith.constant 0 : index
    %42 = vector.load %arg8[%c0_23, %c0_24] : memref<1x128xf32, #tpu.memory_space<vmem>>, vector<1x128xf32>
    %43 = vector.broadcast %42 : vector<1x128xf32> to vector<8x128xf32>
    %44 = arith.addf %41, %43 : vector<8x128xf32>
    %c0_25 = arith.constant 0 : index
    %c0_26 = arith.constant 0 : index
    %c0_27 = arith.constant 0 : index
    %45 = vector.load %arg11[%c0_25, %c0_26, %c0_27] : memref<1x8x128xf32, #tpu.memory_space<vmem>>, vector<1x8x128xf32>
    %46 = vector.shape_cast %45 : vector<1x8x128xf32> to vector<8x128xf32>
    %47 = vector.shape_cast %44 : vector<8x128xf32> to vector<1x8x128xf32>
    tpu.vector_store %arg11[%c0_25, %c0_26, %c0_27], %47 {strides = array<i32>} : memref<1x8x128xf32, #tpu.memory_space<vmem>>, vector<1x8x128xf32>,
    return
  }
  func.func @transform_0(%arg0: i32, %arg1: i32) -> (i32, i32, i32) {
    %c0_i32 = arith.constant 0 : i32
    %c0_i32_0 = arith.constant 0 : i32
    return %arg0, %arg1, %c0_i32 : i32, i32, i32
  }
  func.func @transform_1(%arg0: i32, %arg1: i32) -> (i32, i32) {
    %c0_i32 = arith.constant 0 : i32
    %c0_i32_0 = arith.constant 0 : i32
    return %arg1, %c0_i32 : i32, i32
  }
  func.func @transform_2(%arg0: i32, %arg1: i32) -> (i32, i32) {
    %c0_i32 = arith.constant 0 : i32
    %c0_i32_0 = arith.constant 0 : i32
    return %arg1, %c0_i32 : i32, i32
  }
  func.func @transform_3(%arg0: i32, %arg1: i32) -> (i32, i32) {
    %c0_i32 = arith.constant 0 : i32
    %c0_i32_0 = arith.constant 0 : i32
    %c0_i32_1 = arith.constant 0 : i32
    return %c0_i32, %c0_i32_0 : i32, i32
  }
  func.func @transform_4(%arg0: i32, %arg1: i32) -> (i32, i32) {
    %c0_i32 = arith.constant 0 : i32
    %c0_i32_0 = arith.constant 0 : i32
    %c0_i32_1 = arith.constant 0 : i32
    return %c0_i32, %c0_i32_0 : i32, i32
  }
  func.func @transform_5(%arg0: i32, %arg1: i32) -> (i32, i32) {
    %c0_i32 = arith.constant 0 : i32
    %c0_i32_0 = arith.constant 0 : i32
    %c0_i32_1 = arith.constant 0 : i32
    return %c0_i32, %c0_i32_0 : i32, i32
  }
  func.func @transform_6(%arg0: i32, %arg1: i32) -> (i32, i32) {
    %c0_i32 = arith.constant 0 : i32
    %c0_i32_0 = arith.constant 0 : i32
    %c0_i32_1 = arith.constant 0 : i32
    return %c0_i32, %c0_i32_0 : i32, i32
  }
  func.func @transform_7(%arg0: i32, %arg1: i32) -> (i32, i32, i32) {
    %c0_i32 = arith.constant 0 : i32
    %c0_i32_0 = arith.constant 0 : i32
    return %arg0, %arg1, %c0_i32 : i32, i32, i32
  }
  func.func @transform_8(%arg0: i32, %arg1: i32) -> (i32, i32, i32) {
    %c0_i32 = arith.constant 0 : i32
    %c0_i32_0 = arith.constant 0 : i32
    return %arg0, %arg1, %c0_i32 : i32, i32, i32
  }
  func.func @transform_9(%arg0: i32, %arg1: i32) -> (i32, i32, i32) {
    %c0_i32 = arith.constant 0 : i32
    %c0_i32_0 = arith.constant 0 : i32
    return %arg0, %arg1, %c0_i32 : i32, i32, i32
  }
}

module attributes {stable_mosaic.version = 11 : i64} {
  func.func @_attn_kernel(%arg0: i32, %arg1: i32, %arg2: memref<1x8x128xf32, #tpu.memory_space<vmem>>, %arg3: memref<1x16x128xf32, #tpu.memory_space<vmem>>, %arg4: memref<1x16x128xf32, #tpu.memory_space<vmem>>, %arg5: memref<1x8x128xf32, #tpu.memory_space<vmem>>, %arg6: memref<128x128xbf16, #tpu.memory_space<vmem>>, %arg7: memref<1x128xf32, #tpu.memory_space<vmem>>, %arg8: memref<1x128xf32, #tpu.memory_space<vmem>>, %arg9: memref<1x128xf32, #tpu.memory_space<vmem>>, %arg10: memref<1x8x128xf32, #tpu.memory_space<vmem>>) attributes {dimension_semantics = [#tpu.dimension_semantics<parallel>, #tpu.dimension_semantics<parallel>], iteration_bounds = array<i64: 2, 2>, scalar_prefetch = 0 : i64, scratch_operands = 0 : i64, tpu.core_type = #tpu.core_type<tc>, window_params = [{transform_indices = @transform_0, window_bounds = array<i64: 1, 8, 128>}, {transform_indices = @transform_1, window_bounds = array<i64: 1, 16, 128>}, {transform_indices = @transform_2, window_bounds = array<i64: 1, 16, 128>}, {transform_indices = @transform_3, window_bounds = array<i64: 1, 8, 128>}, {pipeline_mode = #tpu.pipeline_mode<synchronous>, transform_indices = @transform_4, window_bounds = array<i64: 128, 128>}, {pipeline_mode = #tpu.pipeline_mode<synchronous>, transform_indices = @transform_5, window_bounds = array<i64: 1, 128>}, {pipeline_mode = #tpu.pipeline_mode<synchronous>, transform_indices = @transform_6, window_bounds = array<i64: 1, 128>}, {pipeline_mode = #tpu.pipeline_mode<synchronous>, transform_indices = @transform_7, window_bounds = array<i64: 1, 128>}, {transform_indices = @transform_8, window_bounds = array<i64: 1, 8, 128>}]} {
    %c0 = arith.constant 0 : index
    %c0_0 = arith.constant 0 : index
    %c0_1 = arith.constant 0 : index
    %0 = vector.load %arg2[%c0, %c0_0, %c0_1] : memref<1x8x128xf32, #tpu.memory_space<vmem>>, vector<1x8x128xf32>
    %1 = vector.shape_cast %0 : vector<1x8x128xf32> to vector<8x128xf32>
    %2 = arith.truncf %1 : vector<8x128xf32> to vector<8x128xbf16>
    %3 = vector.extract_strided_slice %2 {offsets = [0, 0], sizes = [8, 32], strides = [1, 1]} : vector<8x128xbf16> to vector<8x32xbf16>
    %4 = vector.extract_strided_slice %2 {offsets = [0, 32], sizes = [8, 32], strides = [1, 1]} : vector<8x128xbf16> to vector<8x32xbf16>
    %5 = vector.extract_strided_slice %2 {offsets = [0, 64], sizes = [8, 32], strides = [1, 1]} : vector<8x128xbf16> to vector<8x32xbf16>
    %6 = vector.extract_strided_slice %2 {offsets = [0, 96], sizes = [8, 32], strides = [1, 1]} : vector<8x128xbf16> to vector<8x32xbf16>
    %7 = vector.shape_cast %3 : vector<8x32xbf16> to vector<1x8x32xbf16>
    %8 = vector.shape_cast %4 : vector<8x32xbf16> to vector<1x8x32xbf16>
    %9 = vector.shape_cast %5 : vector<8x32xbf16> to vector<1x8x32xbf16>
    %10 = vector.shape_cast %6 : vector<8x32xbf16> to vector<1x8x32xbf16>
    %11 = tpu.concatenate %7, %8, %9, %10 in 0 : vector<1x8x32xbf16>, vector<1x8x32xbf16>, vector<1x8x32xbf16>, vector<1x8x32xbf16> -> vector<4x8x32xbf16>
    %c0_2 = arith.constant 0 : index
    %c0_3 = arith.constant 0 : index
    %c0_4 = arith.constant 0 : index
    %12 = vector.load %arg3[%c0_2, %c0_3, %c0_4] : memref<1x16x128xf32, #tpu.memory_space<vmem>>, vector<1x16x128xf32>
    %13 = vector.shape_cast %12 : vector<1x16x128xf32> to vector<16x128xf32>
    %14 = arith.truncf %13 : vector<16x128xf32> to vector<16x128xbf16>
    %15 = vector.extract_strided_slice %14 {offsets = [0, 0], sizes = [16, 32], strides = [1, 1]} : vector<16x128xbf16> to vector<16x32xbf16>
    %16 = vector.extract_strided_slice %14 {offsets = [0, 32], sizes = [16, 32], strides = [1, 1]} : vector<16x128xbf16> to vector<16x32xbf16>
    %17 = vector.extract_strided_slice %14 {offsets = [0, 64], sizes = [16, 32], strides = [1, 1]} : vector<16x128xbf16> to vector<16x32xbf16>
    %18 = vector.extract_strided_slice %14 {offsets = [0, 96], sizes = [16, 32], strides = [1, 1]} : vector<16x128xbf16> to vector<16x32xbf16>
    %19 = vector.shape_cast %15 : vector<16x32xbf16> to vector<1x16x32xbf16>
    %20 = vector.shape_cast %16 : vector<16x32xbf16> to vector<1x16x32xbf16>
    %21 = vector.shape_cast %17 : vector<16x32xbf16> to vector<1x16x32xbf16>
    %22 = vector.shape_cast %18 : vector<16x32xbf16> to vector<1x16x32xbf16>
    %23 = tpu.concatenate %19, %20, %21, %22 in 0 : vector<1x16x32xbf16>, vector<1x16x32xbf16>, vector<1x16x32xbf16>, vector<1x16x32xbf16> -> vector<4x16x32xbf16>
    %c0_5 = arith.constant 0 : index
    %c0_6 = arith.constant 0 : index
    %c0_7 = arith.constant 0 : index
    %24 = vector.load %arg4[%c0_5, %c0_6, %c0_7] : memref<1x16x128xf32, #tpu.memory_space<vmem>>, vector<1x16x128xf32>
    %25 = vector.shape_cast %24 : vector<1x16x128xf32> to vector<16x128xf32>
    %26 = arith.truncf %25 : vector<16x128xf32> to vector<16x128xbf16>
    %27 = vector.extract_strided_slice %26 {offsets = [0, 0], sizes = [16, 32], strides = [1, 1]} : vector<16x128xbf16> to vector<16x32xbf16>
    %28 = vector.extract_strided_slice %26 {offsets = [0, 32], sizes = [16, 32], strides = [1, 1]} : vector<16x128xbf16> to vector<16x32xbf16>
    %29 = vector.extract_strided_slice %26 {offsets = [0, 64], sizes = [16, 32], strides = [1, 1]} : vector<16x128xbf16> to vector<16x32xbf16>
    %30 = vector.extract_strided_slice %26 {offsets = [0, 96], sizes = [16, 32], strides = [1, 1]} : vector<16x128xbf16> to vector<16x32xbf16>
    %31 = vector.shape_cast %27 : vector<16x32xbf16> to vector<1x16x32xbf16>
    %32 = vector.shape_cast %28 : vector<16x32xbf16> to vector<1x16x32xbf16>
    %33 = vector.shape_cast %29 : vector<16x32xbf16> to vector<1x16x32xbf16>
    %34 = vector.shape_cast %30 : vector<16x32xbf16> to vector<1x16x32xbf16>
    %35 = tpu.concatenate %31, %32, %33, %34 in 0 : vector<1x16x32xbf16>, vector<1x16x32xbf16>, vector<1x16x32xbf16>, vector<1x16x32xbf16> -> vector<4x16x32xbf16>
    "tpu.trace_start"() <{level = 10 : i32, message = "hqd,hkd->hqk"}> : () -> ()
    %cst = arith.constant dense<0.000000e+00> : vector<4x8x16xf32>
    %36 = tpu.matmul %11, %23, %cst {dimension_numbers = #tpu.dot_dimension_numbers<[2], [2], [1], [1], [0, 0, 0, 1, 1, 1], [0], [0]>} : vector<4x8x32xbf16>, vector<4x16x32xbf16>, vector<4x8x16xf32> -> vector<4x8x16xf32>
    "tpu.trace_stop"() : () -> ()
    %cst_8 = arith.constant dense<0xFF800000> : vector<4x8xf32>
    %37 = vector.multi_reduction <maximumf>, %36, %cst_8 [2] : vector<4x8x16xf32> to vector<4x8xf32>
    %38 = vector.shape_cast %37 : vector<4x8xf32> to vector<4x8x1xf32>
    %39 = vector.broadcast %38 : vector<4x8x1xf32> to vector<4x8x16xf32>
    %40 = arith.subf %36, %39 : vector<4x8x16xf32>
    %41 = math.exp %40 : vector<4x8x16xf32>
    %cst_9 = arith.constant dense<0.000000e+00> : vector<4x8xf32>
    %42 = vector.multi_reduction <add>, %41, %cst_9 [2] : vector<4x8x16xf32> to vector<4x8xf32>
    %43 = vector.shape_cast %42 : vector<4x8xf32> to vector<4x8x1xf32>
    %44 = tpu.reciprocal %43 {approx = true} : vector<4x8x1xf32> -> vector<4x8x1xf32>
    %45 = vector.broadcast %44 : vector<4x8x1xf32> to vector<4x8x16xf32>
    %46 = arith.mulf %41, %45 : vector<4x8x16xf32>
    %47 = arith.truncf %46 : vector<4x8x16xf32> to vector<4x8x16xbf16>
    "tpu.trace_start"() <{level = 10 : i32, message = "hqk,hkd->hqd"}> : () -> ()
    %cst_10 = arith.constant dense<0.000000e+00> : vector<4x8x32xf32>
    %48 = tpu.matmul %47, %35, %cst_10 {dimension_numbers = #tpu.dot_dimension_numbers<[2], [1], [1], [2], [0, 0, 0, 1, 1, 2], [0], [0]>} : vector<4x8x16xbf16>, vector<4x16x32xbf16>, vector<4x8x32xf32> -> vector<4x8x32xf32>
    "tpu.trace_stop"() : () -> ()
    %c0_11 = arith.constant 0 : index
    %c0_12 = arith.constant 0 : index
    %49 = vector.load %arg6[%c0_11, %c0_12] : memref<128x128xbf16, #tpu.memory_space<vmem>>, vector<128x128xbf16>
    %cst_13 = arith.constant 0.000000e+00 : f32
    %50 = vector.broadcast %cst_13 : f32 to vector<8x128xf32>
    %51 = vector.extract_strided_slice %48 {offsets = [0, 0, 0], sizes = [1, 8, 32], strides = [1, 1, 1]} : vector<4x8x32xf32> to vector<1x8x32xf32>
    %52 = vector.shape_cast %51 : vector<1x8x32xf32> to vector<8x32xf32>
    %53 = arith.truncf %52 : vector<8x32xf32> to vector<8x32xbf16>
    %54 = vector.extract_strided_slice %49 {offsets = [0, 0], sizes = [32, 128], strides = [1, 1]} : vector<128x128xbf16> to vector<32x128xbf16>
    %cst_14 = arith.constant dense<0.000000e+00> : vector<8x128xf32>
    %55 = tpu.matmul %53, %54, %cst_14 {dimension_numbers = #tpu.dot_dimension_numbers<[1], [0], [0], [1], [0, 0, 1, 1], [], []>} : vector<8x32xbf16>, vector<32x128xbf16>, vector<8x128xf32> -> vector<8x128xf32>
    %56 = arith.addf %50, %55 : vector<8x128xf32>
    %57 = vector.extract_strided_slice %48 {offsets = [1, 0, 0], sizes = [1, 8, 32], strides = [1, 1, 1]} : vector<4x8x32xf32> to vector<1x8x32xf32>
    %58 = vector.shape_cast %57 : vector<1x8x32xf32> to vector<8x32xf32>
    %59 = arith.truncf %58 : vector<8x32xf32> to vector<8x32xbf16>
    %60 = vector.extract_strided_slice %49 {offsets = [32, 0], sizes = [32, 128], strides = [1, 1]} : vector<128x128xbf16> to vector<32x128xbf16>
    %cst_15 = arith.constant dense<0.000000e+00> : vector<8x128xf32>
    %61 = tpu.matmul %59, %60, %cst_15 {dimension_numbers = #tpu.dot_dimension_numbers<[1], [0], [0], [1], [0, 0, 1, 1], [], []>} : vector<8x32xbf16>, vector<32x128xbf16>, vector<8x128xf32> -> vector<8x128xf32>
    %62 = arith.addf %56, %61 : vector<8x128xf32>
    %63 = vector.extract_strided_slice %48 {offsets = [2, 0, 0], sizes = [1, 8, 32], strides = [1, 1, 1]} : vector<4x8x32xf32> to vector<1x8x32xf32>
    %64 = vector.shape_cast %63 : vector<1x8x32xf32> to vector<8x32xf32>
    %65 = arith.truncf %64 : vector<8x32xf32> to vector<8x32xbf16>
    %66 = vector.extract_strided_slice %49 {offsets = [64, 0], sizes = [32, 128], strides = [1, 1]} : vector<128x128xbf16> to vector<32x128xbf16>
    %cst_16 = arith.constant dense<0.000000e+00> : vector<8x128xf32>
    %67 = tpu.matmul %65, %66, %cst_16 {dimension_numbers = #tpu.dot_dimension_numbers<[1], [0], [0], [1], [0, 0, 1, 1], [], []>} : vector<8x32xbf16>, vector<32x128xbf16>, vector<8x128xf32> -> vector<8x128xf32>
    %68 = arith.addf %62, %67 : vector<8x128xf32>
    %69 = vector.extract_strided_slice %48 {offsets = [3, 0, 0], sizes = [1, 8, 32], strides = [1, 1, 1]} : vector<4x8x32xf32> to vector<1x8x32xf32>
    %70 = vector.shape_cast %69 : vector<1x8x32xf32> to vector<8x32xf32>
    %71 = arith.truncf %70 : vector<8x32xf32> to vector<8x32xbf16>
    %72 = vector.extract_strided_slice %49 {offsets = [96, 0], sizes = [32, 128], strides = [1, 1]} : vector<128x128xbf16> to vector<32x128xbf16>
    %cst_17 = arith.constant dense<0.000000e+00> : vector<8x128xf32>
    %73 = tpu.matmul %71, %72, %cst_17 {dimension_numbers = #tpu.dot_dimension_numbers<[1], [0], [0], [1], [0, 0, 1, 1], [], []>} : vector<8x32xbf16>, vector<32x128xbf16>, vector<8x128xf32> -> vector<8x128xf32>
    %74 = arith.addf %68, %73 : vector<8x128xf32>
    %c0_18 = arith.constant 0 : index
    %c0_19 = arith.constant 0 : index
    %75 = vector.load %arg7[%c0_18, %c0_19] : memref<1x128xf32, #tpu.memory_space<vmem>>, vector<1x128xf32>
    %76 = vector.broadcast %75 : vector<1x128xf32> to vector<8x128xf32>
    %77 = arith.addf %74, %76 : vector<8x128xf32>
    %c0_20 = arith.constant 0 : index
    %c0_21 = arith.constant 0 : index
    %78 = vector.load %arg8[%c0_20, %c0_21] : memref<1x128xf32, #tpu.memory_space<vmem>>, vector<1x128xf32>
    %c0_22 = arith.constant 0 : index
    %c0_23 = arith.constant 0 : index
    %79 = vector.load %arg9[%c0_22, %c0_23] : memref<1x128xf32, #tpu.memory_space<vmem>>, vector<1x128xf32>
    %cst_24 = arith.constant dense<0.000000e+00> : vector<8xf32>
    %80 = vector.multi_reduction <add>, %77, %cst_24 [1] : vector<8x128xf32> to vector<8xf32>
    %81 = vector.shape_cast %80 : vector<8xf32> to vector<8x1xf32>
    %cst_25 = arith.constant 1.280000e+02 : f32
    %82 = vector.broadcast %cst_25 : f32 to vector<8x1xf32>
    %83 = arith.divf %81, %82 : vector<8x1xf32>
    %84 = vector.broadcast %83 : vector<8x1xf32> to vector<8x128xf32>
    %85 = arith.subf %77, %84 : vector<8x128xf32>
    %86 = arith.mulf %85, %85 : vector<8x128xf32>
    %cst_26 = arith.constant dense<0.000000e+00> : vector<8xf32>
    %87 = vector.multi_reduction <add>, %86, %cst_26 [1] : vector<8x128xf32> to vector<8xf32>
    %88 = vector.shape_cast %87 : vector<8xf32> to vector<8x1xf32>
    %cst_27 = arith.constant 1.280000e+02 : f32
    %89 = vector.broadcast %cst_27 : f32 to vector<8x1xf32>
    %90 = arith.divf %88, %89 : vector<8x1xf32>
    %91 = vector.broadcast %83 : vector<8x1xf32> to vector<8x128xf32>
    %92 = arith.subf %77, %91 : vector<8x128xf32>
    %cst_28 = arith.constant 9.99999974E-6 : f32
    %93 = vector.broadcast %cst_28 : f32 to vector<8x1xf32>
    %94 = arith.addf %90, %93 : vector<8x1xf32>
    %95 = math.rsqrt %94 : vector<8x1xf32>
    %96 = vector.broadcast %95 : vector<8x1xf32> to vector<8x128xf32>
    %97 = arith.mulf %92, %96 : vector<8x128xf32>
    %98 = vector.broadcast %78 : vector<1x128xf32> to vector<8x128xf32>
    %99 = arith.mulf %97, %98 : vector<8x128xf32>
    %100 = vector.broadcast %79 : vector<1x128xf32> to vector<8x128xf32>
    %101 = arith.addf %99, %100 : vector<8x128xf32>
    %c0_29 = arith.constant 0 : index
    %c0_30 = arith.constant 0 : index
    %c0_31 = arith.constant 0 : index
    %102 = vector.load %arg5[%c0_29, %c0_30, %c0_31] : memref<1x8x128xf32, #tpu.memory_space<vmem>>, vector<1x8x128xf32>
    %103 = vector.shape_cast %102 : vector<1x8x128xf32> to vector<8x128xf32>
    %104 = arith.addf %103, %101 : vector<8x128xf32>
    %c0_32 = arith.constant 0 : index
    %c0_33 = arith.constant 0 : index
    %c0_34 = arith.constant 0 : index
    %105 = vector.load %arg10[%c0_32, %c0_33, %c0_34] : memref<1x8x128xf32, #tpu.memory_space<vmem>>, vector<1x8x128xf32>
    %106 = vector.shape_cast %105 : vector<1x8x128xf32> to vector<8x128xf32>
    %107 = vector.shape_cast %104 : vector<8x128xf32> to vector<1x8x128xf32>
    tpu.vector_store %arg10[%c0_32, %c0_33, %c0_34], %107 {strides = array<i32>} : memref<1x8x128xf32, #tpu.memory_space<vmem>>, vector<1x8x128xf32>,
    return
  }
  func.func @transform_0(%arg0: i32, %arg1: i32) -> (i32, i32, i32) {
    %c0_i32 = arith.constant 0 : i32
    %c0_i32_0 = arith.constant 0 : i32
    return %arg0, %arg1, %c0_i32 : i32, i32, i32
  }
  func.func @transform_1(%arg0: i32, %arg1: i32) -> (i32, i32, i32) {
    %c0_i32 = arith.constant 0 : i32
    %c0_i32_0 = arith.constant 0 : i32
    %c0_i32_1 = arith.constant 0 : i32
    return %arg0, %c0_i32, %c0_i32_0 : i32, i32, i32
  }
  func.func @transform_2(%arg0: i32, %arg1: i32) -> (i32, i32, i32) {
    %c0_i32 = arith.constant 0 : i32
    %c0_i32_0 = arith.constant 0 : i32
    %c0_i32_1 = arith.constant 0 : i32
    return %arg0, %c0_i32, %c0_i32_0 : i32, i32, i32
  }
  func.func @transform_3(%arg0: i32, %arg1: i32) -> (i32, i32, i32) {
    %c0_i32 = arith.constant 0 : i32
    %c0_i32_0 = arith.constant 0 : i32
    return %arg0, %arg1, %c0_i32 : i32, i32, i32
  }
  func.func @transform_4(%arg0: i32, %arg1: i32) -> (i32, i32) {
    %c0_i32 = arith.constant 0 : i32
    %c0_i32_0 = arith.constant 0 : i32
    %c0_i32_1 = arith.constant 0 : i32
    return %c0_i32, %c0_i32_0 : i32, i32
  }
  func.func @transform_5(%arg0: i32, %arg1: i32) -> (i32, i32) {
    %c0_i32 = arith.constant 0 : i32
    %c0_i32_0 = arith.constant 0 : i32
    %c0_i32_1 = arith.constant 0 : i32
    return %c0_i32, %c0_i32_0 : i32, i32
  }
  func.func @transform_6(%arg0: i32, %arg1: i32) -> (i32, i32) {
    %c0_i32 = arith.constant 0 : i32
    %c0_i32_0 = arith.constant 0 : i32
    %c0_i32_1 = arith.constant 0 : i32
    return %c0_i32, %c0_i32_0 : i32, i32
  }
  func.func @transform_7(%arg0: i32, %arg1: i32) -> (i32, i32) {
    %c0_i32 = arith.constant 0 : i32
    %c0_i32_0 = arith.constant 0 : i32
    %c0_i32_1 = arith.constant 0 : i32
    return %c0_i32, %c0_i32_0 : i32, i32
  }
  func.func @transform_8(%arg0: i32, %arg1: i32) -> (i32, i32, i32) {
    %c0_i32 = arith.constant 0 : i32
    %c0_i32_0 = arith.constant 0 : i32
    return %arg0, %arg1, %c0_i32 : i32, i32, i32
  }
}

module attributes {stable_mosaic.version = 11 : i64} {
  func.func @_ln_linear_pos_kernel(%arg0: i32, %arg1: i32, %arg2: memref<1x8x128xf32, #tpu.memory_space<vmem>>, %arg3: memref<8x128xf32, #tpu.memory_space<vmem>>, %arg4: memref<1x128xf32, #tpu.memory_space<vmem>>, %arg5: memref<1x128xf32, #tpu.memory_space<vmem>>, %arg6: memref<128x128xbf16, #tpu.memory_space<vmem>>, %arg7: memref<1x8x128xf32, #tpu.memory_space<vmem>>) attributes {dimension_semantics = [#tpu.dimension_semantics<parallel>, #tpu.dimension_semantics<parallel>], iteration_bounds = array<i64: 2, 2>, scalar_prefetch = 0 : i64, scratch_operands = 0 : i64, tpu.core_type = #tpu.core_type<tc>, window_params = [{transform_indices = @transform_0, window_bounds = array<i64: 1, 8, 128>}, {transform_indices = @transform_1, window_bounds = array<i64: 8, 128>}, {pipeline_mode = #tpu.pipeline_mode<synchronous>, transform_indices = @transform_2, window_bounds = array<i64: 1, 128>}, {pipeline_mode = #tpu.pipeline_mode<synchronous>, transform_indices = @transform_3, window_bounds = array<i64: 1, 128>}, {pipeline_mode = #tpu.pipeline_mode<synchronous>, transform_indices = @transform_4, window_bounds = array<i64: 128, 128>}, {transform_indices = @transform_5, window_bounds = array<i64: 1, 8, 128>}]} {
    %c0 = arith.constant 0 : index
    %c0_0 = arith.constant 0 : index
    %c0_1 = arith.constant 0 : index
    %0 = vector.load %arg2[%c0, %c0_0, %c0_1] : memref<1x8x128xf32, #tpu.memory_space<vmem>>, vector<1x8x128xf32>
    %1 = vector.shape_cast %0 : vector<1x8x128xf32> to vector<8x128xf32>
    %c0_2 = arith.constant 0 : index
    %c0_3 = arith.constant 0 : index
    %2 = vector.load %arg4[%c0_2, %c0_3] : memref<1x128xf32, #tpu.memory_space<vmem>>, vector<1x128xf32>
    %c0_4 = arith.constant 0 : index
    %c0_5 = arith.constant 0 : index
    %3 = vector.load %arg5[%c0_4, %c0_5] : memref<1x128xf32, #tpu.memory_space<vmem>>, vector<1x128xf32>
    %cst = arith.constant dense<0.000000e+00> : vector<8xf32>
    %4 = vector.multi_reduction <add>, %1, %cst [1] : vector<8x128xf32> to vector<8xf32>
    %5 = vector.shape_cast %4 : vector<8xf32> to vector<8x1xf32>
    %cst_6 = arith.constant 1.280000e+02 : f32
    %6 = vector.broadcast %cst_6 : f32 to vector<8x1xf32>
    %7 = arith.divf %5, %6 : vector<8x1xf32>
    %8 = vector.broadcast %7 : vector<8x1xf32> to vector<8x128xf32>
    %9 = arith.subf %1, %8 : vector<8x128xf32>
    %10 = arith.mulf %9, %9 : vector<8x128xf32>
    %cst_7 = arith.constant dense<0.000000e+00> : vector<8xf32>
    %11 = vector.multi_reduction <add>, %10, %cst_7 [1] : vector<8x128xf32> to vector<8xf32>
    %12 = vector.shape_cast %11 : vector<8xf32> to vector<8x1xf32>
    %cst_8 = arith.constant 1.280000e+02 : f32
    %13 = vector.broadcast %cst_8 : f32 to vector<8x1xf32>
    %14 = arith.divf %12, %13 : vector<8x1xf32>
    %15 = vector.broadcast %7 : vector<8x1xf32> to vector<8x128xf32>
    %16 = arith.subf %1, %15 : vector<8x128xf32>
    %cst_9 = arith.constant 9.99999974E-6 : f32
    %17 = vector.broadcast %cst_9 : f32 to vector<8x1xf32>
    %18 = arith.addf %14, %17 : vector<8x1xf32>
    %19 = math.rsqrt %18 : vector<8x1xf32>
    %20 = vector.broadcast %19 : vector<8x1xf32> to vector<8x128xf32>
    %21 = arith.mulf %16, %20 : vector<8x128xf32>
    %22 = vector.broadcast %2 : vector<1x128xf32> to vector<8x128xf32>
    %23 = arith.mulf %21, %22 : vector<8x128xf32>
    %24 = vector.broadcast %3 : vector<1x128xf32> to vector<8x128xf32>
    %25 = arith.addf %23, %24 : vector<8x128xf32>
    %c0_10 = arith.constant 0 : index
    %c0_11 = arith.constant 0 : index
    %26 = vector.load %arg6[%c0_10, %c0_11] : memref<128x128xbf16, #tpu.memory_space<vmem>>, vector<128x128xbf16>
    %27 = arith.truncf %25 : vector<8x128xf32> to vector<8x128xbf16>
    %cst_12 = arith.constant dense<0.000000e+00> : vector<8x128xf32>
    %28 = tpu.matmul %27, %26, %cst_12 {dimension_numbers = #tpu.dot_dimension_numbers<[1], [0], [0], [1], [0, 0, 1, 1], [], []>} : vector<8x128xbf16>, vector<128x128xbf16>, vector<8x128xf32> -> vector<8x128xf32>
    %c0_13 = arith.constant 0 : index
    %c0_14 = arith.constant 0 : index
    %29 = vector.load %arg3[%c0_13, %c0_14] : memref<8x128xf32, #tpu.memory_space<vmem>>, vector<8x128xf32>
    %30 = arith.addf %28, %29 : vector<8x128xf32>
    %c0_15 = arith.constant 0 : index
    %c0_16 = arith.constant 0 : index
    %c0_17 = arith.constant 0 : index
    %31 = vector.load %arg7[%c0_15, %c0_16, %c0_17] : memref<1x8x128xf32, #tpu.memory_space<vmem>>, vector<1x8x128xf32>
    %32 = vector.shape_cast %31 : vector<1x8x128xf32> to vector<8x128xf32>
    %33 = vector.shape_cast %30 : vector<8x128xf32> to vector<1x8x128xf32>
    tpu.vector_store %arg7[%c0_15, %c0_16, %c0_17], %33 {strides = array<i32>} : memref<1x8x128xf32, #tpu.memory_space<vmem>>, vector<1x8x128xf32>,
    return
  }
  func.func @transform_0(%arg0: i32, %arg1: i32) -> (i32, i32, i32) {
    %c0_i32 = arith.constant 0 : i32
    %c0_i32_0 = arith.constant 0 : i32
    return %arg0, %arg1, %c0_i32 : i32, i32, i32
  }
  func.func @transform_1(%arg0: i32, %arg1: i32) -> (i32, i32) {
    %c0_i32 = arith.constant 0 : i32
    %c0_i32_0 = arith.constant 0 : i32
    return %arg1, %c0_i32 : i32, i32
  }
  func.func @transform_2(%arg0: i32, %arg1: i32) -> (i32, i32) {
    %c0_i32 = arith.constant 0 : i32
    %c0_i32_0 = arith.constant 0 : i32
    %c0_i32_1 = arith.constant 0 : i32
    return %c0_i32, %c0_i32_0 : i32, i32
  }
  func.func @transform_3(%arg0: i32, %arg1: i32) -> (i32, i32) {
    %c0_i32 = arith.constant 0 : i32
    %c0_i32_0 = arith.constant 0 : i32
    %c0_i32_1 = arith.constant 0 : i32
    return %c0_i32, %c0_i32_0 : i32, i32
  }
  func.func @transform_4(%arg0: i32, %arg1: i32) -> (i32, i32) {
    %c0_i32 = arith.constant 0 : i32
    %c0_i32_0 = arith.constant 0 : i32
    %c0_i32_1 = arith.constant 0 : i32
    return %c0_i32, %c0_i32_0 : i32, i32
  }
  func.func @transform_5(%arg0: i32, %arg1: i32) -> (i32, i32, i32) {
    %c0_i32 = arith.constant 0 : i32
    %c0_i32_0 = arith.constant 0 : i32
    return %arg0, %arg1, %c0_i32 : i32, i32, i32
  }
}

module attributes {stable_mosaic.version = 11 : i64} {
  func.func @_txt_kv_kernel(%arg0: i32, %arg1: i32, %arg2: memref<1x8x128xf32, #tpu.memory_space<vmem>>, %arg3: memref<8x128xf32, #tpu.memory_space<vmem>>, %arg4: memref<128x256xbf16, #tpu.memory_space<vmem>>, %arg5: memref<1x128xf32, #tpu.memory_space<vmem>>, %arg6: memref<1x8x128xf32, #tpu.memory_space<vmem>>, %arg7: memref<1x8x128xf32, #tpu.memory_space<vmem>>) attributes {dimension_semantics = [#tpu.dimension_semantics<parallel>, #tpu.dimension_semantics<parallel>], iteration_bounds = array<i64: 2, 1>, scalar_prefetch = 0 : i64, scratch_operands = 0 : i64, tpu.core_type = #tpu.core_type<tc>, window_params = [{transform_indices = @transform_0, window_bounds = array<i64: 1, 8, 128>}, {transform_indices = @transform_1, window_bounds = array<i64: 8, 128>}, {pipeline_mode = #tpu.pipeline_mode<synchronous>, transform_indices = @transform_2, window_bounds = array<i64: 128, 256>}, {pipeline_mode = #tpu.pipeline_mode<synchronous>, transform_indices = @transform_3, window_bounds = array<i64: 1, 128>}, {transform_indices = @transform_4, window_bounds = array<i64: 1, 8, 128>}, {transform_indices = @transform_5, window_bounds = array<i64: 1, 8, 128>}]} {
    %c0 = arith.constant 0 : index
    %c0_0 = arith.constant 0 : index
    %c0_1 = arith.constant 0 : index
    %0 = vector.load %arg2[%c0, %c0_0, %c0_1] : memref<1x8x128xf32, #tpu.memory_space<vmem>>, vector<1x8x128xf32>
    %1 = vector.shape_cast %0 : vector<1x8x128xf32> to vector<8x128xf32>
    %c0_2 = arith.constant 0 : index
    %c0_3 = arith.constant 0 : index
    %2 = vector.load %arg4[%c0_2, %c0_3] : memref<128x256xbf16, #tpu.memory_space<vmem>>, vector<128x256xbf16>
    %3 = arith.truncf %1 : vector<8x128xf32> to vector<8x128xbf16>
    %cst = arith.constant dense<0.000000e+00> : vector<8x256xf32>
    %4 = tpu.matmul %3, %2, %cst {dimension_numbers = #tpu.dot_dimension_numbers<[1], [0], [0], [1], [0, 0, 1, 1], [], []>} : vector<8x128xbf16>, vector<128x256xbf16>, vector<8x256xf32> -> vector<8x256xf32>
    %5 = vector.extract_strided_slice %4 {offsets = [0, 0], sizes = [8, 128], strides = [1, 1]} : vector<8x256xf32> to vector<8x128xf32>
    %c0_4 = arith.constant 0 : index
    %c0_5 = arith.constant 0 : index
    %6 = vector.load %arg3[%c0_4, %c0_5] : memref<8x128xf32, #tpu.memory_space<vmem>>, vector<8x128xf32>
    %7 = arith.addf %5, %6 : vector<8x128xf32>
    %c0_6 = arith.constant 0 : index
    %c0_7 = arith.constant 0 : index
    %c0_8 = arith.constant 0 : index
    %8 = vector.load %arg6[%c0_6, %c0_7, %c0_8] : memref<1x8x128xf32, #tpu.memory_space<vmem>>, vector<1x8x128xf32>
    %9 = vector.shape_cast %8 : vector<1x8x128xf32> to vector<8x128xf32>
    %10 = vector.shape_cast %7 : vector<8x128xf32> to vector<1x8x128xf32>
    tpu.vector_store %arg6[%c0_6, %c0_7, %c0_8], %10 {strides = array<i32>} : memref<1x8x128xf32, #tpu.memory_space<vmem>>, vector<1x8x128xf32>,
    %11 = vector.extract_strided_slice %4 {offsets = [0, 128], sizes = [8, 128], strides = [1, 1]} : vector<8x256xf32> to vector<8x128xf32>
    %c0_9 = arith.constant 0 : index
    %c0_10 = arith.constant 0 : index
    %12 = vector.load %arg5[%c0_9, %c0_10] : memref<1x128xf32, #tpu.memory_space<vmem>>, vector<1x128xf32>
    %13 = vector.broadcast %12 : vector<1x128xf32> to vector<8x128xf32>
    %14 = arith.addf %11, %13 : vector<8x128xf32>
    %c0_11 = arith.constant 0 : index
    %c0_12 = arith.constant 0 : index
    %c0_13 = arith.constant 0 : index
    %15 = vector.load %arg7[%c0_11, %c0_12, %c0_13] : memref<1x8x128xf32, #tpu.memory_space<vmem>>, vector<1x8x128xf32>
    %16 = vector.shape_cast %15 : vector<1x8x128xf32> to vector<8x128xf32>
    %17 = vector.shape_cast %14 : vector<8x128xf32> to vector<1x8x128xf32>
    tpu.vector_store %arg7[%c0_11, %c0_12, %c0_13], %17 {strides = array<i32>} : memref<1x8x128xf32, #tpu.memory_space<vmem>>, vector<1x8x128xf32>,
    return
  }
  func.func @transform_0(%arg0: i32, %arg1: i32) -> (i32, i32, i32) {
    %c0_i32 = arith.constant 0 : i32
    %c0_i32_0 = arith.constant 0 : i32
    return %arg0, %arg1, %c0_i32 : i32, i32, i32
  }
  func.func @transform_1(%arg0: i32, %arg1: i32) -> (i32, i32) {
    %c0_i32 = arith.constant 0 : i32
    %c0_i32_0 = arith.constant 0 : i32
    return %arg1, %c0_i32 : i32, i32
  }
  func.func @transform_2(%arg0: i32, %arg1: i32) -> (i32, i32) {
    %c0_i32 = arith.constant 0 : i32
    %c0_i32_0 = arith.constant 0 : i32
    %c0_i32_1 = arith.constant 0 : i32
    return %c0_i32, %c0_i32_0 : i32, i32
  }
  func.func @transform_3(%arg0: i32, %arg1: i32) -> (i32, i32) {
    %c0_i32 = arith.constant 0 : i32
    %c0_i32_0 = arith.constant 0 : i32
    %c0_i32_1 = arith.constant 0 : i32
    return %c0_i32, %c0_i32_0 : i32, i32
  }
  func.func @transform_4(%arg0: i32, %arg1: i32) -> (i32, i32, i32) {
    %c0_i32 = arith.constant 0 : i32
    %c0_i32_0 = arith.constant 0 : i32
    return %arg0, %arg1, %c0_i32 : i32, i32, i32
  }
  func.func @transform_5(%arg0: i32, %arg1: i32) -> (i32, i32, i32) {
    %c0_i32 = arith.constant 0 : i32
    %c0_i32_0 = arith.constant 0 : i32
    return %arg0, %arg1, %c0_i32 : i32, i32, i32
  }
}

module attributes {stable_mosaic.version = 11 : i64} {
  func.func @_attn_kernel(%arg0: i32, %arg1: i32, %arg2: memref<1x8x128xf32, #tpu.memory_space<vmem>>, %arg3: memref<1x8x128xf32, #tpu.memory_space<vmem>>, %arg4: memref<1x8x128xf32, #tpu.memory_space<vmem>>, %arg5: memref<1x1x8xf32, #tpu.memory_space<vmem>>, %arg6: memref<1x8x128xf32, #tpu.memory_space<vmem>>, %arg7: memref<128x128xbf16, #tpu.memory_space<vmem>>, %arg8: memref<1x128xf32, #tpu.memory_space<vmem>>, %arg9: memref<1x128xf32, #tpu.memory_space<vmem>>, %arg10: memref<1x128xf32, #tpu.memory_space<vmem>>, %arg11: memref<1x8x128xf32, #tpu.memory_space<vmem>>) attributes {dimension_semantics = [#tpu.dimension_semantics<parallel>, #tpu.dimension_semantics<parallel>], iteration_bounds = array<i64: 2, 2>, scalar_prefetch = 0 : i64, scratch_operands = 0 : i64, tpu.core_type = #tpu.core_type<tc>, window_params = [{transform_indices = @transform_0, window_bounds = array<i64: 1, 8, 128>}, {transform_indices = @transform_1, window_bounds = array<i64: 1, 8, 128>}, {transform_indices = @transform_2, window_bounds = array<i64: 1, 8, 128>}, {transform_indices = @transform_3, window_bounds = array<i64: 1, 1, 8>}, {transform_indices = @transform_4, window_bounds = array<i64: 1, 8, 128>}, {pipeline_mode = #tpu.pipeline_mode<synchronous>, transform_indices = @transform_5, window_bounds = array<i64: 128, 128>}, {pipeline_mode = #tpu.pipeline_mode<synchronous>, transform_indices = @transform_6, window_bounds = array<i64: 1, 128>}, {pipeline_mode = #tpu.pipeline_mode<synchronous>, transform_indices = @transform_7, window_bounds = array<i64: 1, 128>}, {pipeline_mode = #tpu.pipeline_mode<synchronous>, transform_indices = @transform_8, window_bounds = array<i64: 1, 128>}, {transform_indices = @transform_9, window_bounds = array<i64: 1, 8, 128>}]} {
    %c0 = arith.constant 0 : index
    %c0_0 = arith.constant 0 : index
    %c0_1 = arith.constant 0 : index
    %0 = vector.load %arg2[%c0, %c0_0, %c0_1] : memref<1x8x128xf32, #tpu.memory_space<vmem>>, vector<1x8x128xf32>
    %1 = vector.shape_cast %0 : vector<1x8x128xf32> to vector<8x128xf32>
    %2 = arith.truncf %1 : vector<8x128xf32> to vector<8x128xbf16>
    %3 = vector.extract_strided_slice %2 {offsets = [0, 0], sizes = [8, 32], strides = [1, 1]} : vector<8x128xbf16> to vector<8x32xbf16>
    %4 = vector.extract_strided_slice %2 {offsets = [0, 32], sizes = [8, 32], strides = [1, 1]} : vector<8x128xbf16> to vector<8x32xbf16>
    %5 = vector.extract_strided_slice %2 {offsets = [0, 64], sizes = [8, 32], strides = [1, 1]} : vector<8x128xbf16> to vector<8x32xbf16>
    %6 = vector.extract_strided_slice %2 {offsets = [0, 96], sizes = [8, 32], strides = [1, 1]} : vector<8x128xbf16> to vector<8x32xbf16>
    %7 = vector.shape_cast %3 : vector<8x32xbf16> to vector<1x8x32xbf16>
    %8 = vector.shape_cast %4 : vector<8x32xbf16> to vector<1x8x32xbf16>
    %9 = vector.shape_cast %5 : vector<8x32xbf16> to vector<1x8x32xbf16>
    %10 = vector.shape_cast %6 : vector<8x32xbf16> to vector<1x8x32xbf16>
    %11 = tpu.concatenate %7, %8, %9, %10 in 0 : vector<1x8x32xbf16>, vector<1x8x32xbf16>, vector<1x8x32xbf16>, vector<1x8x32xbf16> -> vector<4x8x32xbf16>
    %c0_2 = arith.constant 0 : index
    %c0_3 = arith.constant 0 : index
    %c0_4 = arith.constant 0 : index
    %12 = vector.load %arg3[%c0_2, %c0_3, %c0_4] : memref<1x8x128xf32, #tpu.memory_space<vmem>>, vector<1x8x128xf32>
    %13 = vector.shape_cast %12 : vector<1x8x128xf32> to vector<8x128xf32>
    %14 = arith.truncf %13 : vector<8x128xf32> to vector<8x128xbf16>
    %15 = vector.extract_strided_slice %14 {offsets = [0, 0], sizes = [8, 32], strides = [1, 1]} : vector<8x128xbf16> to vector<8x32xbf16>
    %16 = vector.extract_strided_slice %14 {offsets = [0, 32], sizes = [8, 32], strides = [1, 1]} : vector<8x128xbf16> to vector<8x32xbf16>
    %17 = vector.extract_strided_slice %14 {offsets = [0, 64], sizes = [8, 32], strides = [1, 1]} : vector<8x128xbf16> to vector<8x32xbf16>
    %18 = vector.extract_strided_slice %14 {offsets = [0, 96], sizes = [8, 32], strides = [1, 1]} : vector<8x128xbf16> to vector<8x32xbf16>
    %19 = vector.shape_cast %15 : vector<8x32xbf16> to vector<1x8x32xbf16>
    %20 = vector.shape_cast %16 : vector<8x32xbf16> to vector<1x8x32xbf16>
    %21 = vector.shape_cast %17 : vector<8x32xbf16> to vector<1x8x32xbf16>
    %22 = vector.shape_cast %18 : vector<8x32xbf16> to vector<1x8x32xbf16>
    %23 = tpu.concatenate %19, %20, %21, %22 in 0 : vector<1x8x32xbf16>, vector<1x8x32xbf16>, vector<1x8x32xbf16>, vector<1x8x32xbf16> -> vector<4x8x32xbf16>
    %c0_5 = arith.constant 0 : index
    %c0_6 = arith.constant 0 : index
    %c0_7 = arith.constant 0 : index
    %24 = vector.load %arg4[%c0_5, %c0_6, %c0_7] : memref<1x8x128xf32, #tpu.memory_space<vmem>>, vector<1x8x128xf32>
    %25 = vector.shape_cast %24 : vector<1x8x128xf32> to vector<8x128xf32>
    %26 = arith.truncf %25 : vector<8x128xf32> to vector<8x128xbf16>
    %27 = vector.extract_strided_slice %26 {offsets = [0, 0], sizes = [8, 32], strides = [1, 1]} : vector<8x128xbf16> to vector<8x32xbf16>
    %28 = vector.extract_strided_slice %26 {offsets = [0, 32], sizes = [8, 32], strides = [1, 1]} : vector<8x128xbf16> to vector<8x32xbf16>
    %29 = vector.extract_strided_slice %26 {offsets = [0, 64], sizes = [8, 32], strides = [1, 1]} : vector<8x128xbf16> to vector<8x32xbf16>
    %30 = vector.extract_strided_slice %26 {offsets = [0, 96], sizes = [8, 32], strides = [1, 1]} : vector<8x128xbf16> to vector<8x32xbf16>
    %31 = vector.shape_cast %27 : vector<8x32xbf16> to vector<1x8x32xbf16>
    %32 = vector.shape_cast %28 : vector<8x32xbf16> to vector<1x8x32xbf16>
    %33 = vector.shape_cast %29 : vector<8x32xbf16> to vector<1x8x32xbf16>
    %34 = vector.shape_cast %30 : vector<8x32xbf16> to vector<1x8x32xbf16>
    %35 = tpu.concatenate %31, %32, %33, %34 in 0 : vector<1x8x32xbf16>, vector<1x8x32xbf16>, vector<1x8x32xbf16>, vector<1x8x32xbf16> -> vector<4x8x32xbf16>
    "tpu.trace_start"() <{level = 10 : i32, message = "hqd,hkd->hqk"}> : () -> ()
    %cst = arith.constant dense<0.000000e+00> : vector<4x8x8xf32>
    %36 = tpu.matmul %11, %23, %cst {dimension_numbers = #tpu.dot_dimension_numbers<[2], [2], [1], [1], [0, 0, 0, 1, 1, 1], [0], [0]>} : vector<4x8x32xbf16>, vector<4x8x32xbf16>, vector<4x8x8xf32> -> vector<4x8x8xf32>
    "tpu.trace_stop"() : () -> ()
    %c0_8 = arith.constant 0 : index
    %c0_9 = arith.constant 0 : index
    %c0_10 = arith.constant 0 : index
    %37 = vector.load %arg5[%c0_8, %c0_9, %c0_10] : memref<1x1x8xf32, #tpu.memory_space<vmem>>, vector<1x1x8xf32>
    %38 = vector.shape_cast %37 : vector<1x1x8xf32> to vector<1x8xf32>
    %39 = vector.shape_cast %38 : vector<1x8xf32> to vector<1x1x8xf32>
    %40 = vector.broadcast %39 : vector<1x1x8xf32> to vector<4x8x8xf32>
    %41 = arith.addf %36, %40 : vector<4x8x8xf32>
    %cst_11 = arith.constant dense<0xFF800000> : vector<4x8xf32>
    %42 = vector.multi_reduction <maximumf>, %41, %cst_11 [2] : vector<4x8x8xf32> to vector<4x8xf32>
    %43 = vector.shape_cast %42 : vector<4x8xf32> to vector<4x8x1xf32>
    %44 = vector.broadcast %43 : vector<4x8x1xf32> to vector<4x8x8xf32>
    %45 = arith.subf %41, %44 : vector<4x8x8xf32>
    %46 = math.exp %45 : vector<4x8x8xf32>
    %cst_12 = arith.constant dense<0.000000e+00> : vector<4x8xf32>
    %47 = vector.multi_reduction <add>, %46, %cst_12 [2] : vector<4x8x8xf32> to vector<4x8xf32>
    %48 = vector.shape_cast %47 : vector<4x8xf32> to vector<4x8x1xf32>
    %49 = tpu.reciprocal %48 {approx = true} : vector<4x8x1xf32> -> vector<4x8x1xf32>
    %50 = vector.broadcast %49 : vector<4x8x1xf32> to vector<4x8x8xf32>
    %51 = arith.mulf %46, %50 : vector<4x8x8xf32>
    %52 = arith.truncf %51 : vector<4x8x8xf32> to vector<4x8x8xbf16>
    "tpu.trace_start"() <{level = 10 : i32, message = "hqk,hkd->hqd"}> : () -> ()
    %cst_13 = arith.constant dense<0.000000e+00> : vector<4x8x32xf32>
    %53 = tpu.matmul %52, %35, %cst_13 {dimension_numbers = #tpu.dot_dimension_numbers<[2], [1], [1], [2], [0, 0, 0, 1, 1, 2], [0], [0]>} : vector<4x8x8xbf16>, vector<4x8x32xbf16>, vector<4x8x32xf32> -> vector<4x8x32xf32>
    "tpu.trace_stop"() : () -> ()
    %c0_14 = arith.constant 0 : index
    %c0_15 = arith.constant 0 : index
    %54 = vector.load %arg7[%c0_14, %c0_15] : memref<128x128xbf16, #tpu.memory_space<vmem>>, vector<128x128xbf16>
    %cst_16 = arith.constant 0.000000e+00 : f32
    %55 = vector.broadcast %cst_16 : f32 to vector<8x128xf32>
    %56 = vector.extract_strided_slice %53 {offsets = [0, 0, 0], sizes = [1, 8, 32], strides = [1, 1, 1]} : vector<4x8x32xf32> to vector<1x8x32xf32>
    %57 = vector.shape_cast %56 : vector<1x8x32xf32> to vector<8x32xf32>
    %58 = arith.truncf %57 : vector<8x32xf32> to vector<8x32xbf16>
    %59 = vector.extract_strided_slice %54 {offsets = [0, 0], sizes = [32, 128], strides = [1, 1]} : vector<128x128xbf16> to vector<32x128xbf16>
    %cst_17 = arith.constant dense<0.000000e+00> : vector<8x128xf32>
    %60 = tpu.matmul %58, %59, %cst_17 {dimension_numbers = #tpu.dot_dimension_numbers<[1], [0], [0], [1], [0, 0, 1, 1], [], []>} : vector<8x32xbf16>, vector<32x128xbf16>, vector<8x128xf32> -> vector<8x128xf32>
    %61 = arith.addf %55, %60 : vector<8x128xf32>
    %62 = vector.extract_strided_slice %53 {offsets = [1, 0, 0], sizes = [1, 8, 32], strides = [1, 1, 1]} : vector<4x8x32xf32> to vector<1x8x32xf32>
    %63 = vector.shape_cast %62 : vector<1x8x32xf32> to vector<8x32xf32>
    %64 = arith.truncf %63 : vector<8x32xf32> to vector<8x32xbf16>
    %65 = vector.extract_strided_slice %54 {offsets = [32, 0], sizes = [32, 128], strides = [1, 1]} : vector<128x128xbf16> to vector<32x128xbf16>
    %cst_18 = arith.constant dense<0.000000e+00> : vector<8x128xf32>
    %66 = tpu.matmul %64, %65, %cst_18 {dimension_numbers = #tpu.dot_dimension_numbers<[1], [0], [0], [1], [0, 0, 1, 1], [], []>} : vector<8x32xbf16>, vector<32x128xbf16>, vector<8x128xf32> -> vector<8x128xf32>
    %67 = arith.addf %61, %66 : vector<8x128xf32>
    %68 = vector.extract_strided_slice %53 {offsets = [2, 0, 0], sizes = [1, 8, 32], strides = [1, 1, 1]} : vector<4x8x32xf32> to vector<1x8x32xf32>
    %69 = vector.shape_cast %68 : vector<1x8x32xf32> to vector<8x32xf32>
    %70 = arith.truncf %69 : vector<8x32xf32> to vector<8x32xbf16>
    %71 = vector.extract_strided_slice %54 {offsets = [64, 0], sizes = [32, 128], strides = [1, 1]} : vector<128x128xbf16> to vector<32x128xbf16>
    %cst_19 = arith.constant dense<0.000000e+00> : vector<8x128xf32>
    %72 = tpu.matmul %70, %71, %cst_19 {dimension_numbers = #tpu.dot_dimension_numbers<[1], [0], [0], [1], [0, 0, 1, 1], [], []>} : vector<8x32xbf16>, vector<32x128xbf16>, vector<8x128xf32> -> vector<8x128xf32>
    %73 = arith.addf %67, %72 : vector<8x128xf32>
    %74 = vector.extract_strided_slice %53 {offsets = [3, 0, 0], sizes = [1, 8, 32], strides = [1, 1, 1]} : vector<4x8x32xf32> to vector<1x8x32xf32>
    %75 = vector.shape_cast %74 : vector<1x8x32xf32> to vector<8x32xf32>
    %76 = arith.truncf %75 : vector<8x32xf32> to vector<8x32xbf16>
    %77 = vector.extract_strided_slice %54 {offsets = [96, 0], sizes = [32, 128], strides = [1, 1]} : vector<128x128xbf16> to vector<32x128xbf16>
    %cst_20 = arith.constant dense<0.000000e+00> : vector<8x128xf32>
    %78 = tpu.matmul %76, %77, %cst_20 {dimension_numbers = #tpu.dot_dimension_numbers<[1], [0], [0], [1], [0, 0, 1, 1], [], []>} : vector<8x32xbf16>, vector<32x128xbf16>, vector<8x128xf32> -> vector<8x128xf32>
    %79 = arith.addf %73, %78 : vector<8x128xf32>
    %c0_21 = arith.constant 0 : index
    %c0_22 = arith.constant 0 : index
    %80 = vector.load %arg8[%c0_21, %c0_22] : memref<1x128xf32, #tpu.memory_space<vmem>>, vector<1x128xf32>
    %81 = vector.broadcast %80 : vector<1x128xf32> to vector<8x128xf32>
    %82 = arith.addf %79, %81 : vector<8x128xf32>
    %c0_23 = arith.constant 0 : index
    %c0_24 = arith.constant 0 : index
    %83 = vector.load %arg9[%c0_23, %c0_24] : memref<1x128xf32, #tpu.memory_space<vmem>>, vector<1x128xf32>
    %c0_25 = arith.constant 0 : index
    %c0_26 = arith.constant 0 : index
    %84 = vector.load %arg10[%c0_25, %c0_26] : memref<1x128xf32, #tpu.memory_space<vmem>>, vector<1x128xf32>
    %cst_27 = arith.constant dense<0.000000e+00> : vector<8xf32>
    %85 = vector.multi_reduction <add>, %82, %cst_27 [1] : vector<8x128xf32> to vector<8xf32>
    %86 = vector.shape_cast %85 : vector<8xf32> to vector<8x1xf32>
    %cst_28 = arith.constant 1.280000e+02 : f32
    %87 = vector.broadcast %cst_28 : f32 to vector<8x1xf32>
    %88 = arith.divf %86, %87 : vector<8x1xf32>
    %89 = vector.broadcast %88 : vector<8x1xf32> to vector<8x128xf32>
    %90 = arith.subf %82, %89 : vector<8x128xf32>
    %91 = arith.mulf %90, %90 : vector<8x128xf32>
    %cst_29 = arith.constant dense<0.000000e+00> : vector<8xf32>
    %92 = vector.multi_reduction <add>, %91, %cst_29 [1] : vector<8x128xf32> to vector<8xf32>
    %93 = vector.shape_cast %92 : vector<8xf32> to vector<8x1xf32>
    %cst_30 = arith.constant 1.280000e+02 : f32
    %94 = vector.broadcast %cst_30 : f32 to vector<8x1xf32>
    %95 = arith.divf %93, %94 : vector<8x1xf32>
    %96 = vector.broadcast %88 : vector<8x1xf32> to vector<8x128xf32>
    %97 = arith.subf %82, %96 : vector<8x128xf32>
    %cst_31 = arith.constant 9.99999974E-6 : f32
    %98 = vector.broadcast %cst_31 : f32 to vector<8x1xf32>
    %99 = arith.addf %95, %98 : vector<8x1xf32>
    %100 = math.rsqrt %99 : vector<8x1xf32>
    %101 = vector.broadcast %100 : vector<8x1xf32> to vector<8x128xf32>
    %102 = arith.mulf %97, %101 : vector<8x128xf32>
    %103 = vector.broadcast %83 : vector<1x128xf32> to vector<8x128xf32>
    %104 = arith.mulf %102, %103 : vector<8x128xf32>
    %105 = vector.broadcast %84 : vector<1x128xf32> to vector<8x128xf32>
    %106 = arith.addf %104, %105 : vector<8x128xf32>
    %c0_32 = arith.constant 0 : index
    %c0_33 = arith.constant 0 : index
    %c0_34 = arith.constant 0 : index
    %107 = vector.load %arg6[%c0_32, %c0_33, %c0_34] : memref<1x8x128xf32, #tpu.memory_space<vmem>>, vector<1x8x128xf32>
    %108 = vector.shape_cast %107 : vector<1x8x128xf32> to vector<8x128xf32>
    %109 = arith.addf %108, %106 : vector<8x128xf32>
    %c0_35 = arith.constant 0 : index
    %c0_36 = arith.constant 0 : index
    %c0_37 = arith.constant 0 : index
    %110 = vector.load %arg11[%c0_35, %c0_36, %c0_37] : memref<1x8x128xf32, #tpu.memory_space<vmem>>, vector<1x8x128xf32>
    %111 = vector.shape_cast %110 : vector<1x8x128xf32> to vector<8x128xf32>
    %112 = vector.shape_cast %109 : vector<8x128xf32> to vector<1x8x128xf32>
    tpu.vector_store %arg11[%c0_35, %c0_36, %c0_37], %112 {strides = array<i32>} : memref<1x8x128xf32, #tpu.memory_space<vmem>>, vector<1x8x128xf32>,
    return
  }
  func.func @transform_0(%arg0: i32, %arg1: i32) -> (i32, i32, i32) {
    %c0_i32 = arith.constant 0 : i32
    %c0_i32_0 = arith.constant 0 : i32
    return %arg0, %arg1, %c0_i32 : i32, i32, i32
  }
  func.func @transform_1(%arg0: i32, %arg1: i32) -> (i32, i32, i32) {
    %c0_i32 = arith.constant 0 : i32
    %c0_i32_0 = arith.constant 0 : i32
    %c0_i32_1 = arith.constant 0 : i32
    return %arg0, %c0_i32, %c0_i32_0 : i32, i32, i32
  }
  func.func @transform_2(%arg0: i32, %arg1: i32) -> (i32, i32, i32) {
    %c0_i32 = arith.constant 0 : i32
    %c0_i32_0 = arith.constant 0 : i32
    %c0_i32_1 = arith.constant 0 : i32
    return %arg0, %c0_i32, %c0_i32_0 : i32, i32, i32
  }
  func.func @transform_3(%arg0: i32, %arg1: i32) -> (i32, i32, i32) {
    %c0_i32 = arith.constant 0 : i32
    %c0_i32_0 = arith.constant 0 : i32
    %c0_i32_1 = arith.constant 0 : i32
    return %arg0, %c0_i32, %c0_i32_0 : i32, i32, i32
  }
  func.func @transform_4(%arg0: i32, %arg1: i32) -> (i32, i32, i32) {
    %c0_i32 = arith.constant 0 : i32
    %c0_i32_0 = arith.constant 0 : i32
    return %arg0, %arg1, %c0_i32 : i32, i32, i32
  }
  func.func @transform_5(%arg0: i32, %arg1: i32) -> (i32, i32) {
    %c0_i32 = arith.constant 0 : i32
    %c0_i32_0 = arith.constant 0 : i32
    %c0_i32_1 = arith.constant 0 : i32
    return %c0_i32, %c0_i32_0 : i32, i32
  }
  func.func @transform_6(%arg0: i32, %arg1: i32) -> (i32, i32) {
    %c0_i32 = arith.constant 0 : i32
    %c0_i32_0 = arith.constant 0 : i32
    %c0_i32_1 = arith.constant 0 : i32
    return %c0_i32, %c0_i32_0 : i32, i32
  }
  func.func @transform_7(%arg0: i32, %arg1: i32) -> (i32, i32) {
    %c0_i32 = arith.constant 0 : i32
    %c0_i32_0 = arith.constant 0 : i32
    %c0_i32_1 = arith.constant 0 : i32
    return %c0_i32, %c0_i32_0 : i32, i32
  }
  func.func @transform_8(%arg0: i32, %arg1: i32) -> (i32, i32) {
    %c0_i32 = arith.constant 0 : i32
    %c0_i32_0 = arith.constant 0 : i32
    %c0_i32_1 = arith.constant 0 : i32
    return %c0_i32, %c0_i32_0 : i32, i32
  }
  func.func @transform_9(%arg0: i32, %arg1: i32) -> (i32, i32, i32) {
    %c0_i32 = arith.constant 0 : i32
    %c0_i32_0 = arith.constant 0 : i32
    return %arg0, %arg1, %c0_i32 : i32, i32, i32
  }
}

module attributes {stable_mosaic.version = 11 : i64} {
  func.func @_ffn_kernel(%arg0: i32, %arg1: i32, %arg2: memref<1x8x128xf32, #tpu.memory_space<vmem>>, %arg3: memref<1x128xf32, #tpu.memory_space<vmem>>, %arg4: memref<1x128xf32, #tpu.memory_space<vmem>>, %arg5: memref<128x256xbf16, #tpu.memory_space<vmem>>, %arg6: memref<1x256xf32, #tpu.memory_space<vmem>>, %arg7: memref<1x256xf32, #tpu.memory_space<vmem>>, %arg8: memref<1x256xf32, #tpu.memory_space<vmem>>, %arg9: memref<256x128xbf16, #tpu.memory_space<vmem>>, %arg10: memref<1x128xf32, #tpu.memory_space<vmem>>, %arg11: memref<1x8x128xf32, #tpu.memory_space<vmem>>) attributes {dimension_semantics = [#tpu.dimension_semantics<parallel>, #tpu.dimension_semantics<parallel>], iteration_bounds = array<i64: 2, 2>, scalar_prefetch = 0 : i64, scratch_operands = 0 : i64, tpu.core_type = #tpu.core_type<tc>, window_params = [{transform_indices = @transform_0, window_bounds = array<i64: 1, 8, 128>}, {pipeline_mode = #tpu.pipeline_mode<synchronous>, transform_indices = @transform_1, window_bounds = array<i64: 1, 128>}, {pipeline_mode = #tpu.pipeline_mode<synchronous>, transform_indices = @transform_2, window_bounds = array<i64: 1, 128>}, {pipeline_mode = #tpu.pipeline_mode<synchronous>, transform_indices = @transform_3, window_bounds = array<i64: 128, 256>}, {pipeline_mode = #tpu.pipeline_mode<synchronous>, transform_indices = @transform_4, window_bounds = array<i64: 1, 256>}, {pipeline_mode = #tpu.pipeline_mode<synchronous>, transform_indices = @transform_5, window_bounds = array<i64: 1, 256>}, {pipeline_mode = #tpu.pipeline_mode<synchronous>, transform_indices = @transform_6, window_bounds = array<i64: 1, 256>}, {pipeline_mode = #tpu.pipeline_mode<synchronous>, transform_indices = @transform_7, window_bounds = array<i64: 256, 128>}, {pipeline_mode = #tpu.pipeline_mode<synchronous>, transform_indices = @transform_8, window_bounds = array<i64: 1, 128>}, {transform_indices = @transform_9, window_bounds = array<i64: 1, 8, 128>}]} {
    %c0 = arith.constant 0 : index
    %c0_0 = arith.constant 0 : index
    %c0_1 = arith.constant 0 : index
    %0 = vector.load %arg2[%c0, %c0_0, %c0_1] : memref<1x8x128xf32, #tpu.memory_space<vmem>>, vector<1x8x128xf32>
    %1 = vector.shape_cast %0 : vector<1x8x128xf32> to vector<8x128xf32>
    %c0_2 = arith.constant 0 : index
    %c0_3 = arith.constant 0 : index
    %2 = vector.load %arg3[%c0_2, %c0_3] : memref<1x128xf32, #tpu.memory_space<vmem>>, vector<1x128xf32>
    %c0_4 = arith.constant 0 : index
    %c0_5 = arith.constant 0 : index
    %3 = vector.load %arg4[%c0_4, %c0_5] : memref<1x128xf32, #tpu.memory_space<vmem>>, vector<1x128xf32>
    %cst = arith.constant dense<0.000000e+00> : vector<8xf32>
    %4 = vector.multi_reduction <add>, %1, %cst [1] : vector<8x128xf32> to vector<8xf32>
    %5 = vector.shape_cast %4 : vector<8xf32> to vector<8x1xf32>
    %cst_6 = arith.constant 1.280000e+02 : f32
    %6 = vector.broadcast %cst_6 : f32 to vector<8x1xf32>
    %7 = arith.divf %5, %6 : vector<8x1xf32>
    %8 = vector.broadcast %7 : vector<8x1xf32> to vector<8x128xf32>
    %9 = arith.subf %1, %8 : vector<8x128xf32>
    %10 = arith.mulf %9, %9 : vector<8x128xf32>
    %cst_7 = arith.constant dense<0.000000e+00> : vector<8xf32>
    %11 = vector.multi_reduction <add>, %10, %cst_7 [1] : vector<8x128xf32> to vector<8xf32>
    %12 = vector.shape_cast %11 : vector<8xf32> to vector<8x1xf32>
    %cst_8 = arith.constant 1.280000e+02 : f32
    %13 = vector.broadcast %cst_8 : f32 to vector<8x1xf32>
    %14 = arith.divf %12, %13 : vector<8x1xf32>
    %15 = vector.broadcast %7 : vector<8x1xf32> to vector<8x128xf32>
    %16 = arith.subf %1, %15 : vector<8x128xf32>
    %cst_9 = arith.constant 9.99999974E-6 : f32
    %17 = vector.broadcast %cst_9 : f32 to vector<8x1xf32>
    %18 = arith.addf %14, %17 : vector<8x1xf32>
    %19 = math.rsqrt %18 : vector<8x1xf32>
    %20 = vector.broadcast %19 : vector<8x1xf32> to vector<8x128xf32>
    %21 = arith.mulf %16, %20 : vector<8x128xf32>
    %22 = vector.broadcast %2 : vector<1x128xf32> to vector<8x128xf32>
    %23 = arith.mulf %21, %22 : vector<8x128xf32>
    %24 = vector.broadcast %3 : vector<1x128xf32> to vector<8x128xf32>
    %25 = arith.addf %23, %24 : vector<8x128xf32>
    %c0_10 = arith.constant 0 : index
    %c0_11 = arith.constant 0 : index
    %26 = vector.load %arg5[%c0_10, %c0_11] : memref<128x256xbf16, #tpu.memory_space<vmem>>, vector<128x256xbf16>
    %27 = arith.truncf %25 : vector<8x128xf32> to vector<8x128xbf16>
    %cst_12 = arith.constant dense<0.000000e+00> : vector<8x256xf32>
    %28 = tpu.matmul %27, %26, %cst_12 {dimension_numbers = #tpu.dot_dimension_numbers<[1], [0], [0], [1], [0, 0, 1, 1], [], []>} : vector<8x128xbf16>, vector<128x256xbf16>, vector<8x256xf32> -> vector<8x256xf32>
    %c0_13 = arith.constant 0 : index
    %c0_14 = arith.constant 0 : index
    %29 = vector.load %arg6[%c0_13, %c0_14] : memref<1x256xf32, #tpu.memory_space<vmem>>, vector<1x256xf32>
    %30 = vector.broadcast %29 : vector<1x256xf32> to vector<8x256xf32>
    %31 = arith.addf %28, %30 : vector<8x256xf32>
    %cst_15 = arith.constant 0.000000e+00 : f32
    %32 = vector.broadcast %cst_15 : f32 to vector<8x256xf32>
    %33 = arith.maximumf %31, %32 : vector<8x256xf32>
    %c0_16 = arith.constant 0 : index
    %c0_17 = arith.constant 0 : index
    %34 = vector.load %arg7[%c0_16, %c0_17] : memref<1x256xf32, #tpu.memory_space<vmem>>, vector<1x256xf32>
    %c0_18 = arith.constant 0 : index
    %c0_19 = arith.constant 0 : index
    %35 = vector.load %arg8[%c0_18, %c0_19] : memref<1x256xf32, #tpu.memory_space<vmem>>, vector<1x256xf32>
    %cst_20 = arith.constant dense<0.000000e+00> : vector<8xf32>
    %36 = vector.multi_reduction <add>, %33, %cst_20 [1] : vector<8x256xf32> to vector<8xf32>
    %37 = vector.shape_cast %36 : vector<8xf32> to vector<8x1xf32>
    %cst_21 = arith.constant 2.560000e+02 : f32
    %38 = vector.broadcast %cst_21 : f32 to vector<8x1xf32>
    %39 = arith.divf %37, %38 : vector<8x1xf32>
    %40 = vector.broadcast %39 : vector<8x1xf32> to vector<8x256xf32>
    %41 = arith.subf %33, %40 : vector<8x256xf32>
    %42 = arith.mulf %41, %41 : vector<8x256xf32>
    %cst_22 = arith.constant dense<0.000000e+00> : vector<8xf32>
    %43 = vector.multi_reduction <add>, %42, %cst_22 [1] : vector<8x256xf32> to vector<8xf32>
    %44 = vector.shape_cast %43 : vector<8xf32> to vector<8x1xf32>
    %cst_23 = arith.constant 2.560000e+02 : f32
    %45 = vector.broadcast %cst_23 : f32 to vector<8x1xf32>
    %46 = arith.divf %44, %45 : vector<8x1xf32>
    %47 = vector.broadcast %39 : vector<8x1xf32> to vector<8x256xf32>
    %48 = arith.subf %33, %47 : vector<8x256xf32>
    %cst_24 = arith.constant 9.99999974E-6 : f32
    %49 = vector.broadcast %cst_24 : f32 to vector<8x1xf32>
    %50 = arith.addf %46, %49 : vector<8x1xf32>
    %51 = math.rsqrt %50 : vector<8x1xf32>
    %52 = vector.broadcast %51 : vector<8x1xf32> to vector<8x256xf32>
    %53 = arith.mulf %48, %52 : vector<8x256xf32>
    %54 = vector.broadcast %34 : vector<1x256xf32> to vector<8x256xf32>
    %55 = arith.mulf %53, %54 : vector<8x256xf32>
    %56 = vector.broadcast %35 : vector<1x256xf32> to vector<8x256xf32>
    %57 = arith.addf %55, %56 : vector<8x256xf32>
    %c0_25 = arith.constant 0 : index
    %c0_26 = arith.constant 0 : index
    %58 = vector.load %arg9[%c0_25, %c0_26] : memref<256x128xbf16, #tpu.memory_space<vmem>>, vector<256x128xbf16>
    %59 = arith.truncf %57 : vector<8x256xf32> to vector<8x256xbf16>
    %cst_27 = arith.constant dense<0.000000e+00> : vector<8x128xf32>
    %60 = tpu.matmul %59, %58, %cst_27 {dimension_numbers = #tpu.dot_dimension_numbers<[1], [0], [0], [1], [0, 0, 1, 1], [], []>} : vector<8x256xbf16>, vector<256x128xbf16>, vector<8x128xf32> -> vector<8x128xf32>
    %c0_28 = arith.constant 0 : index
    %c0_29 = arith.constant 0 : index
    %61 = vector.load %arg10[%c0_28, %c0_29] : memref<1x128xf32, #tpu.memory_space<vmem>>, vector<1x128xf32>
    %62 = vector.broadcast %61 : vector<1x128xf32> to vector<8x128xf32>
    %63 = arith.addf %60, %62 : vector<8x128xf32>
    %64 = arith.addf %1, %63 : vector<8x128xf32>
    %c0_30 = arith.constant 0 : index
    %c0_31 = arith.constant 0 : index
    %c0_32 = arith.constant 0 : index
    %65 = vector.load %arg11[%c0_30, %c0_31, %c0_32] : memref<1x8x128xf32, #tpu.memory_space<vmem>>, vector<1x8x128xf32>
    %66 = vector.shape_cast %65 : vector<1x8x128xf32> to vector<8x128xf32>
    %67 = vector.shape_cast %64 : vector<8x128xf32> to vector<1x8x128xf32>
    tpu.vector_store %arg11[%c0_30, %c0_31, %c0_32], %67 {strides = array<i32>} : memref<1x8x128xf32, #tpu.memory_space<vmem>>, vector<1x8x128xf32>,
    return
  }
  func.func @transform_0(%arg0: i32, %arg1: i32) -> (i32, i32, i32) {
    %c0_i32 = arith.constant 0 : i32
    %c0_i32_0 = arith.constant 0 : i32
    return %arg0, %arg1, %c0_i32 : i32, i32, i32
  }
  func.func @transform_1(%arg0: i32, %arg1: i32) -> (i32, i32) {
    %c0_i32 = arith.constant 0 : i32
    %c0_i32_0 = arith.constant 0 : i32
    %c0_i32_1 = arith.constant 0 : i32
    return %c0_i32, %c0_i32_0 : i32, i32
  }
  func.func @transform_2(%arg0: i32, %arg1: i32) -> (i32, i32) {
    %c0_i32 = arith.constant 0 : i32
    %c0_i32_0 = arith.constant 0 : i32
    %c0_i32_1 = arith.constant 0 : i32
    return %c0_i32, %c0_i32_0 : i32, i32
  }
  func.func @transform_3(%arg0: i32, %arg1: i32) -> (i32, i32) {
    %c0_i32 = arith.constant 0 : i32
    %c0_i32_0 = arith.constant 0 : i32
    %c0_i32_1 = arith.constant 0 : i32
    return %c0_i32, %c0_i32_0 : i32, i32
  }
  func.func @transform_4(%arg0: i32, %arg1: i32) -> (i32, i32) {
    %c0_i32 = arith.constant 0 : i32
    %c0_i32_0 = arith.constant 0 : i32
    %c0_i32_1 = arith.constant 0 : i32
    return %c0_i32, %c0_i32_0 : i32, i32
  }
  func.func @transform_5(%arg0: i32, %arg1: i32) -> (i32, i32) {
    %c0_i32 = arith.constant 0 : i32
    %c0_i32_0 = arith.constant 0 : i32
    %c0_i32_1 = arith.constant 0 : i32
    return %c0_i32, %c0_i32_0 : i32, i32
  }
  func.func @transform_6(%arg0: i32, %arg1: i32) -> (i32, i32) {
    %c0_i32 = arith.constant 0 : i32
    %c0_i32_0 = arith.constant 0 : i32
    %c0_i32_1 = arith.constant 0 : i32
    return %c0_i32, %c0_i32_0 : i32, i32
  }
  func.func @transform_7(%arg0: i32, %arg1: i32) -> (i32, i32) {
    %c0_i32 = arith.constant 0 : i32
    %c0_i32_0 = arith.constant 0 : i32
    %c0_i32_1 = arith.constant 0 : i32
    return %c0_i32, %c0_i32_0 : i32, i32
  }
  func.func @transform_8(%arg0: i32, %arg1: i32) -> (i32, i32) {
    %c0_i32 = arith.constant 0 : i32
    %c0_i32_0 = arith.constant 0 : i32
    %c0_i32_1 = arith.constant 0 : i32
    return %c0_i32, %c0_i32_0 : i32, i32
  }
  func.func @transform_9(%arg0: i32, %arg1: i32) -> (i32, i32, i32) {
    %c0_i32 = arith.constant 0 : i32
    %c0_i32_0 = arith.constant 0 : i32
    return %arg0, %arg1, %c0_i32 : i32, i32, i32
  }
}

module attributes {stable_mosaic.version = 11 : i64} {
  func.func @_ln_kernel(%arg0: i32, %arg1: i32, %arg2: memref<1x8x128xf32, #tpu.memory_space<vmem>>, %arg3: memref<1x128xf32, #tpu.memory_space<vmem>>, %arg4: memref<1x128xf32, #tpu.memory_space<vmem>>, %arg5: memref<1x8x128xf32, #tpu.memory_space<vmem>>) attributes {dimension_semantics = [#tpu.dimension_semantics<parallel>, #tpu.dimension_semantics<parallel>], iteration_bounds = array<i64: 2, 2>, scalar_prefetch = 0 : i64, scratch_operands = 0 : i64, tpu.core_type = #tpu.core_type<tc>, window_params = [{transform_indices = @transform_0, window_bounds = array<i64: 1, 8, 128>}, {pipeline_mode = #tpu.pipeline_mode<synchronous>, transform_indices = @transform_1, window_bounds = array<i64: 1, 128>}, {pipeline_mode = #tpu.pipeline_mode<synchronous>, transform_indices = @transform_2, window_bounds = array<i64: 1, 128>}, {transform_indices = @transform_3, window_bounds = array<i64: 1, 8, 128>}]} {
    %c0 = arith.constant 0 : index
    %c0_0 = arith.constant 0 : index
    %c0_1 = arith.constant 0 : index
    %0 = vector.load %arg2[%c0, %c0_0, %c0_1] : memref<1x8x128xf32, #tpu.memory_space<vmem>>, vector<1x8x128xf32>
    %1 = vector.shape_cast %0 : vector<1x8x128xf32> to vector<8x128xf32>
    %c0_2 = arith.constant 0 : index
    %c0_3 = arith.constant 0 : index
    %2 = vector.load %arg3[%c0_2, %c0_3] : memref<1x128xf32, #tpu.memory_space<vmem>>, vector<1x128xf32>
    %c0_4 = arith.constant 0 : index
    %c0_5 = arith.constant 0 : index
    %3 = vector.load %arg4[%c0_4, %c0_5] : memref<1x128xf32, #tpu.memory_space<vmem>>, vector<1x128xf32>
    %cst = arith.constant dense<0.000000e+00> : vector<8xf32>
    %4 = vector.multi_reduction <add>, %1, %cst [1] : vector<8x128xf32> to vector<8xf32>
    %5 = vector.shape_cast %4 : vector<8xf32> to vector<8x1xf32>
    %cst_6 = arith.constant 1.280000e+02 : f32
    %6 = vector.broadcast %cst_6 : f32 to vector<8x1xf32>
    %7 = arith.divf %5, %6 : vector<8x1xf32>
    %8 = vector.broadcast %7 : vector<8x1xf32> to vector<8x128xf32>
    %9 = arith.subf %1, %8 : vector<8x128xf32>
    %10 = arith.mulf %9, %9 : vector<8x128xf32>
    %cst_7 = arith.constant dense<0.000000e+00> : vector<8xf32>
    %11 = vector.multi_reduction <add>, %10, %cst_7 [1] : vector<8x128xf32> to vector<8xf32>
    %12 = vector.shape_cast %11 : vector<8xf32> to vector<8x1xf32>
    %cst_8 = arith.constant 1.280000e+02 : f32
    %13 = vector.broadcast %cst_8 : f32 to vector<8x1xf32>
    %14 = arith.divf %12, %13 : vector<8x1xf32>
    %15 = vector.broadcast %7 : vector<8x1xf32> to vector<8x128xf32>
    %16 = arith.subf %1, %15 : vector<8x128xf32>
    %cst_9 = arith.constant 9.99999974E-6 : f32
    %17 = vector.broadcast %cst_9 : f32 to vector<8x1xf32>
    %18 = arith.addf %14, %17 : vector<8x1xf32>
    %19 = math.rsqrt %18 : vector<8x1xf32>
    %20 = vector.broadcast %19 : vector<8x1xf32> to vector<8x128xf32>
    %21 = arith.mulf %16, %20 : vector<8x128xf32>
    %22 = vector.broadcast %2 : vector<1x128xf32> to vector<8x128xf32>
    %23 = arith.mulf %21, %22 : vector<8x128xf32>
    %24 = vector.broadcast %3 : vector<1x128xf32> to vector<8x128xf32>
    %25 = arith.addf %23, %24 : vector<8x128xf32>
    %c0_10 = arith.constant 0 : index
    %c0_11 = arith.constant 0 : index
    %c0_12 = arith.constant 0 : index
    %26 = vector.load %arg5[%c0_10, %c0_11, %c0_12] : memref<1x8x128xf32, #tpu.memory_space<vmem>>, vector<1x8x128xf32>
    %27 = vector.shape_cast %26 : vector<1x8x128xf32> to vector<8x128xf32>
    %28 = vector.shape_cast %25 : vector<8x128xf32> to vector<1x8x128xf32>
    tpu.vector_store %arg5[%c0_10, %c0_11, %c0_12], %28 {strides = array<i32>} : memref<1x8x128xf32, #tpu.memory_space<vmem>>, vector<1x8x128xf32>,
    return
  }
  func.func @transform_0(%arg0: i32, %arg1: i32) -> (i32, i32, i32) {
    %c0_i32 = arith.constant 0 : i32
    %c0_i32_0 = arith.constant 0 : i32
    return %arg0, %arg1, %c0_i32 : i32, i32, i32
  }
  func.func @transform_1(%arg0: i32, %arg1: i32) -> (i32, i32) {
    %c0_i32 = arith.constant 0 : i32
    %c0_i32_0 = arith.constant 0 : i32
    %c0_i32_1 = arith.constant 0 : i32
    return %c0_i32, %c0_i32_0 : i32, i32
  }
  func.func @transform_2(%arg0: i32, %arg1: i32) -> (i32, i32) {
    %c0_i32 = arith.constant 0 : i32
    %c0_i32_0 = arith.constant 0 : i32
    %c0_i32_1 = arith.constant 0 : i32
    return %c0_i32, %c0_i32_0 : i32, i32
  }
  func.func @transform_3(%arg0: i32, %arg1: i32) -> (i32, i32, i32) {
    %c0_i32 = arith.constant 0 : i32
    %c0_i32_0 = arith.constant 0 : i32
    return %arg0, %arg1, %c0_i32 : i32, i32, i32
  }
}

</mosaic_0001>

<bundles_post_ra>
// kernel: transformer_decoder.15
= control target key start
LH: loop header
LB: loop body
LE: loop exit
PB: predicated region body
PF: predicated region fallthrough
CT: control target
= control target key end

     0   :  { %s683_s18 = smov 0   ;;  %s685_s19 = smov 0   ;;  %s778_s0 = inlined_call_operand.vmem [shape: f32[2,16,128], index: 0, kind: input, shape index: {}]   ;;  %s779_s1 = inlined_call_operand.vmem [shape: f32[16,128], index: 1, kind: input, shape index: {}]   ;;  %s780_s2 = inlined_call_operand.vmem [shape: f32[1,128], index: 2, kind: input, shape index: {}]   ;;  %s781_s3 = inlined_call_operand.vmem [shape: f32[1,128], index: 3, kind: input, shape index: {}]   ;;  %s782_s4 = inlined_call_operand.vmem [shape: bf16[128,128], index: 4, kind: input, shape index: {}]   ;;  %s783_s5 = inlined_call_operand.vmem [shape: f32[2,16,128], index: 5, kind: output, shape index: {}]  }
   0x1   :  { %s687_s20 = smov 0   ;;  %s689_s21 = smov 0  }
   0x2   :  { %s691_s22 = smov 0  }
   0x3 LB: > { %s24_s23 = sadd.s32 1, %s641_s20  ;;  %s27_s24 = sadd.s32 1, %s645_s21  ;;  %s649_s22 = sphi %s691_s22, %s15_s22   ;;  %s645_s21 = sphi %s689_s21, %s787_s21   ;;  %s641_s20 = sphi %s687_s20, %s786_s20   ;;  %s637_s19 = sphi %s685_s19, %s785_s19   ;;  %s633_s18 = sphi %s683_s18, %s784_s18  }
   0x4   : > { %p25_p0 = scmp.ge.s32.totalorder %s24_s23, 2  ;;  %p512_p1 = scmp.ge.s32.totalorder %s649_s22, 1 }
   0x5   : > { %p215_p2 = scmp.lt.s32.totalorder %s649_s22, 5 }
   0x6   : > { %s789_s23 = smov (%p25_p0, %s24_s23), 0  ;;  %s791_s24 = smov (!%p25_p0, %s27_s24), %s645_s21 }
   0x7   : > { %p216_p3 = pnand %p512_p1, %p215_p2  ;;  %p29_p4 = scmp.ge.s32.totalorder %s791_s24, 2 }
   0x8   : > { %p253_p5 = scmp.lt.s32.totalorder (!%p216_p3), %s637_s19, 1  ;;  %p255_p6 = scmp.lt.s32.totalorder (!%p216_p3), %s633_s18, 1 }
   0x9   : > { %s793_s24 = smov (%p29_p4, %s791_s24), 0  ;;  %219 = sbr.rel (%p216_p3) target bundleno = 527 (0x20f), region = 40 }
   0xe   : > { %s795_s19 = smov (!%p253_p5, %s637_s19), 1  ;;  %s797_s18 = smov (!%p255_p6, %s633_s18), 1  ;;  %v601_v1 = vld [vmem:[%s782_s4 + $0x38] sm:$0xff]   ;;  %v651_v2 = vmov 0.0   ;;  %v602_v3 = vld [vmem:[%s782_s4 + $0x30] sm:$0xff]   ;;  %v603_v8 = vld [vmem:[%s782_s4 + $0x28] sm:$0xff]  }
   0xf   : > { %s513_s25 = sshll.u32 %s795_s19, 1  ;;  %539 = vmatprep.subr.bf16.mxu0 %v651_v2  ;;  %v604_v9 = vld [vmem:[%s782_s4 + $0x20] sm:$0xff]   ;;  %vm652_vm0 = vmmov 0   ;;  %v605_v10 = vld [vmem:[%s782_s4 + $0x18] sm:$0xff]   ;;  %v606_v11 = vld [vmem:[%s782_s4 + $0x10] sm:$0xff]   ;;  %s515_s9 = sshll.u32 %s797_s18, 3 }
  0x10   : > { %s716_s26 = sadd.s32 %s513_s25, %s797_s18  ;;  %540 = vmatpush3.bf16.msra.mxu0 %v601_v1  ;;  %555 = vmatprep.mubr.msk.bf16.mxu0 %vm652_vm0, %v651_v2  ;;  %v607_v12 = vld [vmem:[%s782_s4 + $0x8] sm:$0xff]   ;;  %v608_v13 = vld [vmem:[%s782_s4] sm:$0xff]   ;;  %s264_s12 = scalar_lea.vmem %s779_s1, %s515_s9 }
  0x11   : > { %s514_s27 = sshll.u32 %s716_s26, 3  ;;  %541 = vmatprep.subr.bf16.mxu0 %v651_v2  ;;  %v518_v18 = vld [vmem:[%s780_s2] ss:$0 sm:$0xff] }
  0x12   : > { %s260_s30 = scalar_lea.vmem %s778_s0, %s514_s27  ;;  %v519_v20 = vld [vmem:[%s781_s3] ss:$0 sm:$0xff]  ;;  %s272_s15 = scalar_lea.vmem %s783_s5, %s514_s27 }
  0x13   : > { %v274_v0 = vld [vmem:[%s260_s30] sm:$0xff] }
  0x14   : > { %277 = vadd.xlane.f32.xlu0 %v274_v0  ;;  %542 = vmatpush3.bf16.msra.mxu0 %v602_v3  ;;  %v320_v24 = vld [vmem:[%s264_s12] sm:$0xff] }
  0x15   : > { %543 = vmatprep.subr.bf16.mxu0 %v651_v2 }
  0x18   : > { %544 = vmatpush3.bf16.msra.mxu0 %v603_v8 }
  0x19   : > { %545 = vmatprep.subr.bf16.mxu0 %v651_v2 }
  0x1c   : > { %546 = vmatpush3.bf16.msra.mxu0 %v604_v9 }
  0x1d   : > { %547 = vmatprep.subr.bf16.mxu0 %v651_v2 }
  0x20   : > { %548 = vmatpush3.bf16.msra.mxu0 %v605_v10 }
  0x21   : > { %549 = vmatprep.subr.bf16.mxu0 %v651_v2 }
  0x24   : > { %550 = vmatpush3.bf16.msra.mxu0 %v606_v11 }
  0x25   : > { %551 = vmatprep.subr.bf16.mxu0 %v651_v2 }
  0x28   : > { %552 = vmatpush3.bf16.msra.mxu0 %v607_v12 }
  0x29   : > { %553 = vmatprep.subr.bf16.mxu0 %v651_v2 }
  0x2c   : > { %554 = vmatpush3.bf16.msra.mxu0 %v608_v13 }
  0x9d   : > { %v278_v4 = vpop.xlane.xlu0 %277 }
  0x9e   : > { %v280_v5 = vmul.f32 0.0078125, %v278_v4 }
  0xa0   : > { %v281_v6 = vsub.f32 %v274_v0, %v280_v5 }
  0xa2   : > { %v282_v7 = vmul.f32 %v281_v6, %v281_v6 }
  0xa4   : > { %283 = vadd.xlane.f32.xlu0 %v282_v7 }
 0x12d   : > { %v284_v14 = vpop.xlane.xlu0 %283 }
 0x12e   : > { %v285_v15 = vmul.f32 0.0078125, %v284_v14 }
 0x130   : > { %v286_v16 = vadd.f32 1e-05, %v285_v15 }
 0x132   : > { %609 = vrsqrt.f32 %v286_v16 }
 0x13f   : > { %v610_v17 = vpop.eup %609 }
 0x140   : > { %v288_v19 = vmul.f32 %v610_v17, %v281_v6 }
 0x142   : > { %v295_v21 = vmul.f32 %v518_v18, %v288_v19 }
 0x144   : > { %v302_v22 = vadd.f32 %v519_v20, %v295_v21 }
 0x146   : > { %v319_v23 = vpack.c.bf16 %v302_v22, %v302_v22 }
 0x148   : > { %556 = vmatmul.mubr.bf16.vlgmr.msra.gmra.mxu0 %v319_v23 }
 0x208   : > { %v403_v25 = vpop.f32.mrf.mxu0 }
 0x209   : > { %v404_v26 = vadd.f32 %v403_v25, %v320_v24 }
 0x20a   : > { %v557_v27 = vpop.f32.mrf.mxu0 }
 0x20b   : > { %409 = vst [vmem:[%s272_s15] sm:$0xff] %v404_v26 }
 0x20c   : > { %v406_v28 = vpop.f32.mrf.mxu0 }
 0x20e   : > { %v558_v29 = vpop.f32.mrf.mxu0 }
 0x20f PF: > { %s15_s22 = sadd.s32 1, %s649_s22   ;;  %s784_s18 = smov %s641_s20 }
 0x210   : > { %p12_p7 = scmp.ge.s32.totalorder %s15_s22, 6   ;;  %s785_s19 = smov %s645_s21 }
 0x211   : > { %s786_s20 = smov %s789_s23  ;;  %s787_s21 = smov %s793_s24 }
 0x212   :  { %14 = sbr.rel (!%p12_p7) target bundleno = 3 (0x3), region = 73 }

// kernel: transformer_decoder.13
= control target key start
LH: loop header
LB: loop body
LE: loop exit
PB: predicated region body
PF: predicated region fallthrough
CT: control target
= control target key end

     0   :  { %s1173_s30 = smov 0   ;;  %s1175_s10 = smov 0   ;;  %s1327_s0 = inlined_call_operand.vmem [shape: f32[2,16,128], index: 0, kind: input, shape index: {}]   ;;  %s1328_s1 = inlined_call_operand.vmem [shape: f32[16,128], index: 1, kind: input, shape index: {}]   ;;  %s1329_s2 = inlined_call_operand.vmem [shape: f32[16,128], index: 2, kind: input, shape index: {}]   ;;  %s1330_s3 = inlined_call_operand.vmem [shape: f32[1,128], index: 3, kind: input, shape index: {}]   ;;  %s1331_s4 = inlined_call_operand.vmem [shape: f32[1,128], index: 4, kind: input, shape index: {}]   ;;  %s1332_s5 = inlined_call_operand.vmem [shape: bf16[128,384], index: 5, kind: input, shape index: {}]   ;;  %s1333_s6 = inlined_call_operand.vmem [shape: f32[1,128], index: 6, kind: input, shape index: {}]   ;;  %s1334_s7 = inlined_call_operand.vmem [shape: f32[2,16,128], index: 7, kind: output, shape index: {0}]   ;;  %s1335_s8 = inlined_call_operand.vmem [shape: f32[2,16,128], index: 8, kind: output, shape index: {1}]   ;;  %s1336_s9 = inlined_call_operand.vmem [shape: f32[2,16,128], index: 9, kind: output, shape index: {2}]  }
   0x1   :  { %s1177_s11 = smov 0   ;;  %s1179_s12 = smov 0  }
   0x2   :  { %s1181_s13 = smov 0  }
   0x3 LB: > { %s29_s14 = sadd.s32 1, %s1110_s11  ;;  %s32_s15 = sadd.s32 1, %s1114_s12  ;;  %s1118_s13 = sphi %s1181_s13, %s20_s13   ;;  %s1114_s12 = sphi %s1179_s12, %s1340_s12   ;;  %s1110_s11 = sphi %s1177_s11, %s1339_s11   ;;  %s1106_s10 = sphi %s1175_s10, %s1338_s10   ;;  %s1102_s30 = sphi %s1173_s30, %s1337_s30  }
   0x4   : > { %p30_p0 = scmp.ge.s32.totalorder %s29_s14, 2  ;;  %p934_p1 = scmp.ge.s32.totalorder %s1118_s13, 1 }
   0x5   : > { %p333_p2 = scmp.lt.s32.totalorder %s1118_s13, 5 }
   0x6   : > { %s1342_s14 = smov (%p30_p0, %s29_s14), 0  ;;  %s1344_s15 = smov (!%p30_p0, %s32_s15), %s1114_s12 }
   0x7   : > { %p334_p3 = pnand %p934_p1, %p333_p2  ;;  %p34_p4 = scmp.ge.s32.totalorder %s1344_s15, 2 }
   0x8   : > { %p399_p5 = scmp.lt.s32.totalorder (!%p334_p3), %s1106_s10, 1  ;;  %p401_p6 = scmp.lt.s32.totalorder (!%p334_p3), %s1102_s30, 1 }
   0x9   : > { %s1346_s15 = smov (%p34_p4, %s1344_s15), 0  ;;  %337 = sbr.rel (%p334_p3) target bundleno = 527 (0x20f), region = 48 }
   0xe   : > { %s1348_s10 = smov (!%p399_p5, %s1106_s10), 1  ;;  %s1350_s30 = smov (!%p401_p6, %s1102_s30), 1  ;;  %v1046_v1 = vld [vmem:[%s1332_s5 + $0xac] ss:$12 sps:$4 sm:$0xff]   ;;  %v1048_v2 = vld [vmem:[%s1332_s5 + $0xa8] ss:$12 sps:$4 sm:$0xff]  }
   0xf   : > { %s935_s16 = sshll.u32 %s1348_s10, 1  ;;  %v1120_v3 = vmov 0.0   ;;  %v1049_v4 = vld [vmem:[%s1332_s5 + $0xb0] ss:$12 sps:$4 sm:$0xff]   ;;  %v1050_v5 = vld [vmem:[%s1332_s5 + $0x94] ss:$12 sps:$4 sm:$0xff]   ;;  %630 = vmatprep.subr.bf16.mxu0 %v1046_v1 }
  0x10   : > { %s404_s17 = sadd.s32 %s935_s16, %s1350_s30  ;;  %983 = vmatprep.subr.bf16.mxu1 %v1120_v3  ;;  %631 = vmatpush1.bf16.msra.mxu0 %v1048_v2  ;;  %v1052_v6 = vld [vmem:[%s1332_s5 + $0x90] ss:$12 sps:$4 sm:$0xff]   ;;  %v1053_v7 = vld [vmem:[%s1332_s5 + $0x98] ss:$12 sps:$4 sm:$0xff]   ;;  %v1057_v14 = vld [vmem:[%s1332_s5 + $0x80] ss:$12 sps:$4 sm:$0xff]  }
  0x11   : > { %s1206_s18 = sshll.u32 %s404_s17, 3  ;;  %984 = vmatpush3.bf16.msra.mxu1 %v1049_v4  ;;  %632 = vmatprep.subr.bf16.mxu0 %v1050_v5  ;;  %v1054_v12 = vld [vmem:[%s1332_s5 + $0x7c] ss:$12 sps:$4 sm:$0xff]   ;;  %v1056_v13 = vld [vmem:[%s1332_s5 + $0x78] ss:$12 sps:$4 sm:$0xff]   ;;  %v1121_v22 = vmov 0  }
  0x12   : > { %s406_s21 = scalar_lea.vmem %s1327_s0, %s1206_s18  ;;  %985 = vmatprep.subr.bf16.mxu1 %v1120_v3  ;;  %v1058_v15 = vld [vmem:[%s1332_s5 + $0x64] ss:$12 sps:$4 sm:$0xff]   ;;  %v1060_v16 = vld [vmem:[%s1332_s5 + $0x60] ss:$12 sps:$4 sm:$0xff]   ;;  %v1061_v17 = vld [vmem:[%s1332_s5 + $0x68] ss:$12 sps:$4 sm:$0xff]   ;;  %662 = vmatprep.mubr.bf16.mxu0 %v1121_v22  ;;  %s422_s29 = scalar_lea.vmem %s1334_s7, %s1206_s18 }
  0x13   : > { %v440_v0 = vld [vmem:[%s406_s21] sm:$0xff]  ;;  %v1062_v18 = vld [vmem:[%s1332_s5 + $0x4c] ss:$12 sps:$4 sm:$0xff]   ;;  %v1064_v19 = vld [vmem:[%s1332_s5 + $0x48] ss:$12 sps:$4 sm:$0xff]   ;;  %vm1122_vm0 = vmmov 0   ;;  %s438_s16 = scalar_lea.vmem %s1336_s9, %s1206_s18  ;;  %s430_s20 = scalar_lea.vmem %s1335_s8, %s1206_s18 }
  0x14   : > { %443 = vadd.xlane.f32.xlu0 %v440_v0  ;;  %633 = vmatpush1.bf16.msra.mxu0 %v1052_v6  ;;  %v1065_v20 = vld [vmem:[%s1332_s5 + $0x50] ss:$12 sps:$4 sm:$0xff]   ;;  %v1066_v21 = vld [vmem:[%s1332_s5 + $0x34] ss:$12 sps:$4 sm:$0xff]   ;;  %v1069_v24 = vld [vmem:[%s1332_s5 + $0x38] ss:$12 sps:$4 sm:$0xff]  }
  0x15   : > { %986 = vmatpush3.bf16.msra.mxu1 %v1053_v7  ;;  %634 = vmatprep.subr.bf16.mxu0 %v1054_v12  ;;  %v1068_v23 = vld [vmem:[%s1332_s5 + $0x30] ss:$12 sps:$4 sm:$0xff]   ;;  %v1072_v26 = vld [vmem:[%s1332_s5 + $0x18] ss:$12 sps:$4 sm:$0xff]   ;;  %v1073_v27 = vld [vmem:[%s1332_s5 + $0x20] ss:$12 sps:$4 sm:$0xff]  }
  0x16   : > { %987 = vmatprep.subr.bf16.mxu1 %v1120_v3  ;;  %999 = vmatprep.mubr.msk.bf16.mxu1 %vm1122_vm0, %v1120_v3  ;;  %v1070_v25 = vld [vmem:[%s1332_s5 + $0x1c] ss:$12 sps:$4 sm:$0xff]   ;;  %v1074_v28 = vld [vmem:[%s1332_s5 + $0x4] ss:$12 sps:$4 sm:$0xff]   ;;  %v1076_v29 = vld [vmem:[%s1332_s5] ss:$12 sps:$4 sm:$0xff]  }
  0x17   : > { %v1077_v30 = vld [vmem:[%s1332_s5 + $0x8] ss:$12 sps:$4 sm:$0xff]   ;;  %v945_v35 = vld [vmem:[%s1330_s3] ss:$0 sm:$0xff]  ;;  %s937_s17 = sshll.u32 %s1350_s30, 3 }
  0x18   : > { %635 = vmatpush1.bf16.msra.mxu0 %v1056_v13  ;;  %v946_v37 = vld [vmem:[%s1331_s4] ss:$0 sm:$0xff]  ;;  %s410_s21 = scalar_lea.vmem %s1328_s1, %s937_s17  ;;  %s414_s24 = scalar_lea.vmem %s1329_s2, %s937_s17 }
  0x19   : > { %988 = vmatpush3.bf16.msra.mxu1 %v1057_v14  ;;  %636 = vmatprep.subr.bf16.mxu0 %v1058_v15  ;;  %v711_v41 = vld [vmem:[%s410_s21] sm:$0xff] }
  0x1a   : > { %989 = vmatprep.subr.bf16.mxu1 %v1120_v3  ;;  %v971_v42 = vld [vmem:[%s1333_s6] ss:$0 sm:$0xff] }
  0x1b   : > { %v714_v45 = vld [vmem:[%s414_s24] sm:$0xff] }
  0x1c   : > { %637 = vmatpush1.bf16.msra.mxu0 %v1060_v16 }
  0x1d   : > { %990 = vmatpush3.bf16.msra.mxu1 %v1061_v17  ;;  %638 = vmatprep.subr.bf16.mxu0 %v1062_v18 }
  0x1e   : > { %991 = vmatprep.subr.bf16.mxu1 %v1120_v3 }
  0x20   : > { %639 = vmatpush1.bf16.msra.mxu0 %v1064_v19 }
  0x21   : > { %992 = vmatpush3.bf16.msra.mxu1 %v1065_v20  ;;  %640 = vmatprep.subr.bf16.mxu0 %v1066_v21 }
  0x22   : > { %993 = vmatprep.subr.bf16.mxu1 %v1120_v3 }
  0x24   : > { %641 = vmatpush1.bf16.msra.mxu0 %v1068_v23 }
  0x25   : > { %994 = vmatpush3.bf16.msra.mxu1 %v1069_v24  ;;  %642 = vmatprep.subr.bf16.mxu0 %v1070_v25 }
  0x26   : > { %995 = vmatprep.subr.bf16.mxu1 %v1120_v3 }
  0x28   : > { %643 = vmatpush1.bf16.msra.mxu0 %v1072_v26 }
  0x29   : > { %996 = vmatpush3.bf16.msra.mxu1 %v1073_v27  ;;  %644 = vmatprep.subr.bf16.mxu0 %v1074_v28 }
  0x2a   : > { %997 = vmatprep.subr.bf16.mxu1 %v1120_v3 }
  0x2c   : > { %645 = vmatpush1.bf16.msra.mxu0 %v1076_v29 }
  0x2d   : > { %998 = vmatpush3.bf16.msra.mxu1 %v1077_v30 }
  0x9d   : > { %v444_v8 = vpop.xlane.xlu0 %443 }
  0x9e   : > { %v446_v9 = vmul.f32 0.0078125, %v444_v8 }
  0xa0   : > { %v447_v10 = vsub.f32 %v440_v0, %v446_v9 }
  0xa2   : > { %v448_v11 = vmul.f32 %v447_v10, %v447_v10 }
  0xa4   : > { %449 = vadd.xlane.f32.xlu0 %v448_v11 }
 0x12d   : > { %v450_v31 = vpop.xlane.xlu0 %449 }
 0x12e   : > { %v451_v32 = vmul.f32 0.0078125, %v450_v31 }
 0x130   : > { %v452_v33 = vadd.f32 1e-05, %v451_v32 }
 0x132   : > { %1078 = vrsqrt.f32 %v452_v33 }
 0x13f   : > { %v1079_v34 = vpop.eup %1078 }
 0x140   : > { %v454_v36 = vmul.f32 %v1079_v34, %v447_v10 }
 0x142   : > { %v461_v38 = vmul.f32 %v945_v35, %v454_v36 }
 0x144   : > { %v468_v39 = vadd.f32 %v946_v37, %v461_v38 }
 0x146   : > { %v501_v40 = vpack.c.bf16 %v468_v39, %v468_v39 }
 0x148   : > { %663 = vmatmul.mubr.bf16.vlgmr.msra.gmra.mxu0 %v501_v40  ;;  %1000 = vmatmul.mubr.bf16.vlgmr.msra.gmra.mxu1 %v501_v40 }
 0x208   : > { %v664_v43 = vpop.f32.mrf.mxu0  ;;  %v705_v44 = vpop.f32.mrf.mxu1 }
 0x209   : > { %v712_v46 = vadd.f32 %v711_v41, %v664_v43  ;;  %v724_v47 = vadd.f32 %v971_v42, %v705_v44 }
 0x20a   : > { %v666_v48 = vpop.f32.mrf.mxu0  ;;  %v1001_v49 = vpop.f32.mrf.mxu1 }
 0x20b   : > { %713 = vst [vmem:[%s422_s29] sm:$0xff] %v712_v46  ;;  %725 = vst [vmem:[%s438_s16] sm:$0xff] %v724_v47  ;;  %v715_v50 = vadd.f32 %v714_v45, %v666_v48 }
 0x20c   : > { %v668_v51 = vpop.f32.mrf.mxu0  ;;  %v708_v52 = vpop.f32.mrf.mxu1 }
 0x20d   : > { %716 = vst [vmem:[%s430_s20] sm:$0xff] %v715_v50 }
 0x20e   : > { %v669_v53 = vpop.f32.mrf.mxu0  ;;  %v1002_v54 = vpop.f32.mrf.mxu1 }
 0x20f PF: > { %s20_s13 = sadd.s32 1, %s1118_s13   ;;  %s1337_s30 = smov %s1110_s11 }
 0x210   : > { %p17_p7 = scmp.ge.s32.totalorder %s20_s13, 6   ;;  %s1338_s10 = smov %s1114_s12 }
 0x211   : > { %s1339_s11 = smov %s1342_s14  ;;  %s1340_s12 = smov %s1346_s15 }
 0x212   :  { %19 = sbr.rel (!%p17_p7) target bundleno = 3 (0x3), region = 108 }

// kernel: transformer_decoder.14
= control target key start
LH: loop header
LB: loop body
LE: loop exit
PB: predicated region body
PF: predicated region fallthrough
CT: control target
= control target key end

     0   :  { %s1567_s27 = smov 0   ;;  %s1569_s28 = smov 0   ;;  %s1746_s0 = inlined_call_operand.vmem [shape: f32[2,16,128], index: 0, kind: input, shape index: {}]   ;;  %s1747_s1 = inlined_call_operand.vmem [shape: f32[2,16,128], index: 1, kind: input, shape index: {}]   ;;  %s1748_s2 = inlined_call_operand.vmem [shape: f32[2,16,128], index: 2, kind: input, shape index: {}]   ;;  %s1749_s3 = inlined_call_operand.vmem [shape: f32[2,16,128], index: 3, kind: input, shape index: {}]   ;;  %s1750_s4 = inlined_call_operand.vmem [shape: bf16[128,128], index: 4, kind: input, shape index: {}]   ;;  %s1751_s5 = inlined_call_operand.vmem [shape: f32[1,128], index: 5, kind: input, shape index: {}]   ;;  %s1752_s6 = inlined_call_operand.vmem [shape: f32[1,128], index: 6, kind: input, shape index: {}]   ;;  %s1753_s7 = inlined_call_operand.vmem [shape: f32[1,128], index: 7, kind: input, shape index: {}]   ;;  %s1754_s8 = inlined_call_operand.vmem [shape: f32[2,16,128], index: 8, kind: output, shape index: {}]  }
   0x1   :  { %s1571_s29 = smov 0   ;;  %s1573_s30 = smov 0  }
   0x2   :  { %s1575_s9 = smov 0  }
   0x3 LB: > { %s27_s10 = sadd.s32 1, %s1507_s29  ;;  %s30_s11 = sadd.s32 1, %s1511_s30  ;;  %s1515_s9 = sphi %s1575_s9, %s18_s9   ;;  %s1511_s30 = sphi %s1573_s30, %s1758_s30   ;;  %s1507_s29 = sphi %s1571_s29, %s1757_s29   ;;  %s1503_s28 = sphi %s1569_s28, %s1756_s28   ;;  %s1499_s27 = sphi %s1567_s27, %s1755_s27  }
   0x4   : > { %p28_p0 = scmp.ge.s32.totalorder %s27_s10, 2  ;;  %p1260_p1 = scmp.ge.s32.totalorder %s1515_s9, 1 }
   0x5   : > { %p316_p2 = scmp.lt.s32.totalorder %s1515_s9, 5 }
   0x6   : > { %s1760_s10 = smov (%p28_p0, %s27_s10), 0  ;;  %s1762_s11 = smov (!%p28_p0, %s30_s11), %s1511_s30 }
   0x7   : > { %p317_p3 = pnand %p1260_p1, %p316_p2  ;;  %p32_p4 = scmp.ge.s32.totalorder %s1762_s11, 2 }
   0x8   : > { %p374_p5 = scmp.lt.s32.totalorder (!%p317_p3), %s1503_s28, 1  ;;  %p376_p6 = scmp.lt.s32.totalorder (!%p317_p3), %s1499_s27, 1 }
   0x9   : > { %s1764_s11 = smov (%p32_p4, %s1762_s11), 0  ;;  %320 = sbr.rel (%p317_p3) target bundleno = 1361 (0x551), region = 52 }
   0xa   : > { %s1519_s22 = smov (!%p317_p3), 64   ;;  %s1520_s23 = smov (!%p317_p3), 96  }
   0xb   : > { %s1521_s24 = smov (!%p317_p3), 32  }
   0xe   : > { %v1517_v0 = vmov 0.0   ;;  %vm1518_vm0 = vmmov 0   ;;  %s1766_s28 = smov (!%p374_p5, %s1503_s28), 1  ;;  %vm441_vm1 = vcmask 261120   ;;  %s1768_s27 = smov (!%p376_p6, %s1499_s27), 1  ;;  %vm626_vm2 = vcmask 130048  }
   0xf   : > { %1326 = vmatprep.subr.bf16.mxu0 %v1517_v0  ;;  %1328 = vmatprep.mubr.msk.bf16.mxu0 %vm1518_vm0, %v1517_v0  ;;  %s1296_s12 = sshll.u32 %s1766_s28, 4  ;;  %s1261_s13 = sshll.u32 %s1766_s28, 1 }
  0x10   : > { %1332 = vmatprep.subr.bf16.mxu1 %v1517_v0  ;;  %1334 = vmatprep.mubr.msk.bf16.mxu1 %vm1518_vm0, %v1517_v0  ;;  %s386_s16 = scalar_lea.vmem %s1747_s1, %s1296_s12  ;;  %s379_s17 = sadd.s32 %s1261_s13, %s1768_s27 }
  0x11   : > { %v418_v1 = vld [vmem:[%s386_s16] sm:$0xff]  ;;  %v419_v2 = vld [vmem:[%s386_s16 + $0x8] sm:$0xff]  ;;  %s1612_s18 = sshll.u32 %s379_s17, 3  ;;  %s391_s27 = scalar_lea.vmem %s1748_s2, %s1296_s12 }
  0x12   : > { %v420_v3 = vpack.c.bf16 %v419_v2, %v418_v1  ;;  %s381_s21 = scalar_lea.vmem %s1746_s0, %s1612_s18  ;;  %v428_v19 = vld [vmem:[%s391_s27] sm:$0xff]  ;;  %v429_v20 = vld [vmem:[%s391_s27 + $0x8] sm:$0xff]  ;;  %s399_s17 = scalar_lea.vmem %s1749_s3, %s1612_s18 }
  0x13   : > { %v409_v4 = vld [vmem:[%s381_s21] sm:$0xff]  ;;  %v430_v21 = vpack.c.bf16 %v429_v20, %v428_v19  ;;  %v1456_v20 = vld [vmem:[%s1750_s4 + $0x38] sm:$0xff]  }
  0x14   : > { %424 = vrot.lane.b32.xlu1 %v420_v3, %s1519_s22  ;;  %422 = vrot.lane.b32.xlu0 %v420_v3, %s1520_s23  ;;  %v446_v5 = vsel %vm441_vm1, %v420_v3, 0  ;;  %v410_v6 = vpack.c.bf16 %v409_v4, %v409_v4 }
  0x15   : > { %1327 = vmatpush3.bf16.xpose.msra.mxu0 %v446_v5 }
  0x16   : > { %1338 = vmatprep.subr.bf16.mxu0 %v1517_v0 }
  0x18   : > { %412 = vrot.lane.b32.xlu0 %v410_v6, %s1520_s23  ;;  %426 = vrot.lane.b32.xlu1 %v420_v3, %s1521_s24 }
  0x1c   : > { %414 = vrot.lane.b32.xlu0 %v410_v6, %s1519_s22  ;;  %1329 = vmatmul.mubr.msk.bf16.vlgmr.msra.gmra.mxu0 %vm441_vm1, %v410_v6 }
  0x1d   : > { %416 = vrot.lane.b32.xlu1 %v410_v6, %s1521_s24  ;;  %1340 = vmatprep.mubr.msk.bf16.mxu0 %vm1518_vm0, %v1517_v0 }
  0x86   : > { %v425_v7 = vpop.permute.xlu1 %424  ;;  %v423_v8 = vpop.permute.xlu0 %422 }
  0x87   : > { %v538_v9 = vsel %vm441_vm1, %v425_v7, 0  ;;  %v492_v10 = vsel %vm441_vm1, %v423_v8, 0 }
  0x88   : > { %1333 = vmatpush3.bf16.xpose.msra.mxu1 %v492_v10  ;;  %1339 = vmatpush3.bf16.xpose.msra.mxu0 %v538_v9 }
  0x89   : > { %1344 = vmatprep.subr.bf16.mxu1 %v1517_v0  ;;  %1350 = vmatprep.subr.bf16.mxu0 %v1517_v0 }
  0x8a   : > { %v413_v11 = vpop.permute.xlu0 %412  ;;  %v427_v12 = vpop.permute.xlu1 %426 }
  0x8b   : > { %v584_v13 = vsel %vm441_vm1, %v427_v12, 0  ;;  %v1453_v12 = vld [vmem:[%s1750_s4 + $0x18] sm:$0xff]  }
  0x8e   : > { %v415_v14 = vpop.permute.xlu0 %414 }
  0x8f   : > { %1335 = vmatmul.mubr.msk.bf16.vlgmr.msra.gmra.mxu1 %vm441_vm1, %v413_v11  ;;  %1341 = vmatmul.mubr.msk.bf16.vlgmr.msra.gmra.mxu0 %vm441_vm1, %v415_v14  ;;  %v417_v15 = vpop.permute.xlu1 %416  ;;  %v1454_v14 = vld [vmem:[%s1750_s4 + $0x10] sm:$0xff]  }
  0x90   : > { %1345 = vmatpush3.bf16.xpose.msra.mxu1 %v584_v13  ;;  %1346 = vmatprep.mubr.msk.bf16.mxu1 %vm1518_vm0, %v1517_v0 }
  0x91   : > { %1352 = vmatprep.mubr.msk.bf16.mxu0 %vm1518_vm0, %v1517_v0  ;;  %1356 = vmatprep.subr.bf16.mxu1 %v1517_v0 }
  0x92   : > { %1351 = vmatpush3.bf16.msra.mxu0 %v430_v21 }
  0x93   : > { %1362 = vmatprep.subr.bf16.mxu0 %v1517_v0 }
  0x97   : > { %1347 = vmatmul.mubr.msk.bf16.vlgmr.msra.gmra.mxu1 %vm441_vm1, %v417_v15 }
  0x98   : > { %1358 = vmatprep.mubr.msk.bf16.mxu1 %vm1518_vm0, %v1517_v0 }
  0xdc   : > { %v482_v16 = vpop.f32.mrf.mxu0 }
  0xdd   : > { %v627_v17 = vsel %vm626_vm2, %v482_v16, -inf }
  0xde   : > { %628 = vmax.xlane.f32.xlu0 %v627_v17  ;;  %v1330_v18 = vpop.f32.mrf.mxu0 }
  0xdf   : > { %v1452_v18 = vld [vmem:[%s1750_s4] sm:$0xff]  }
  0xe0   : > { %v485_v22 = vpop.f32.mrf.mxu0 }
  0xe2   : > { %v1331_v23 = vpop.f32.mrf.mxu0 }
 0x14f   : > { %v528_v24 = vpop.f32.mrf.mxu1  ;;  %v574_v25 = vpop.f32.mrf.mxu0 }
 0x150   : > { %v630_v26 = vsel %vm626_vm2, %v528_v24, -inf  ;;  %v633_v27 = vsel %vm626_vm2, %v574_v25, -inf }
 0x151   : > { %631 = vmax.xlane.f32.xlu1 %v630_v26  ;;  %v1336_v28 = vpop.f32.mrf.mxu1  ;;  %634 = vmax.xlane.f32.xlu0 %v633_v27  ;;  %v1342_v29 = vpop.f32.mrf.mxu0  ;;  %v1455_v27 = vld [vmem:[%s1750_s4 + $0x28] sm:$0xff]  }
 0x153   : > { %v531_v30 = vpop.f32.mrf.mxu1  ;;  %v577_v31 = vpop.f32.mrf.mxu0 }
 0x155   : > { %v1337_v32 = vpop.f32.mrf.mxu1  ;;  %v1343_v33 = vpop.f32.mrf.mxu0 }
 0x156   : > { %v1457_v33 = vld [vmem:[%s1750_s4 + $0x20] sm:$0xff]  }
 0x157   : > { %v620_v34 = vpop.f32.mrf.mxu1 }
 0x158   : > { %v636_v35 = vsel %vm626_vm2, %v620_v34, -inf }
 0x159   : > { %v1348_v36 = vpop.f32.mrf.mxu1  ;;  %637 = vmax.xlane.f32.xlu0 %v636_v35 }
 0x15b   : > { %v623_v37 = vpop.f32.mrf.mxu1 }
 0x15d   : > { %v1349_v38 = vpop.f32.mrf.mxu1 }
 0x162   : > { %432 = vrot.lane.b32.xlu1 %v430_v21, %s1520_s23  ;;  %s407_s23 = scalar_lea.vmem %s1754_s8, %s1612_s18 }
 0x167   : > { %v629_v39 = vpop.xlane.xlu0 %628 }
 0x168   : > { %v639_v40 = vsub.f32 %v482_v16, %v629_v39  ;;  %v1451_v16 = vld [vmem:[%s1750_s4 + $0x8] sm:$0xff]  }
 0x16a   : > { %v643_v41 = vmul.f32 1.442695, %v639_v40 }
 0x16c   : > { %1459 = vpow2.f32 %v643_v41 }
 0x179   : > { %v1460_v42 = vpop.eup %1459 }
 0x17a   : > { %v651_v43 = vsel %vm626_vm2, %v1460_v42, 0.0 }
 0x186   : > { %652 = vadd.xlane.f32.xlu1 %v651_v43 }
 0x1da   : > { %v632_v44 = vpop.xlane.xlu1 %631  ;;  %v635_v45 = vpop.xlane.xlu0 %634 }
 0x1db   : > { %v640_v46 = vsub.f32 %v528_v24, %v632_v44  ;;  %v641_v47 = vsub.f32 %v574_v25, %v635_v45  ;;  %v1458_v24 = vld [vmem:[%s1750_s4 + $0x30] sm:$0xff]  }
 0x1dd   : > { %v645_v48 = vmul.f32 1.442695, %v640_v46  ;;  %v647_v49 = vmul.f32 1.442695, %v641_v47 }
 0x1de   : > { %v433_v50 = vpop.permute.xlu1 %432 }
 0x1df   : > { %1461 = vpow2.f32 %v645_v48  ;;  %1357 = vmatpush3.bf16.msra.mxu1 %v433_v50 }
 0x1e0   : > { %1463 = vpow2.f32 %v647_v49  ;;  %1368 = vmatprep.subr.bf16.mxu1 %v1517_v0 }
 0x1e2   : > { %v638_v51 = vpop.xlane.xlu0 %637 }
 0x1e3   : > { %v642_v52 = vsub.f32 %v620_v34, %v638_v51 }
 0x1e5   : > { %v649_v53 = vmul.f32 1.442695, %v642_v52 }
 0x1e7   : > { %1465 = vpow2.f32 %v649_v53 }
 0x1ec   : > { %v1462_v54 = vpop.eup %1461 }
 0x1ed   : > { %v1464_v55 = vpop.eup %1463  ;;  %v654_v56 = vsel %vm626_vm2, %v1462_v54, 0.0 }
 0x1ee   : > { %655 = vadd.xlane.f32.xlu0 %v654_v56  ;;  %v657_v57 = vsel %vm626_vm2, %v1464_v55, 0.0  ;;  %v1291_v56 = vld [vmem:[%s1751_s5] ss:$0 sm:$0xff] }
 0x1ef   : > { %658 = vadd.xlane.f32.xlu1 %v657_v57 }
 0x1f4   : > { %v1466_v58 = vpop.eup %1465 }
 0x1f5   : > { %v660_v59 = vsel %vm626_vm2, %v1466_v58, 0.0 }
 0x1f6   : > { %661 = vadd.xlane.f32.xlu0 %v660_v59 }
 0x200   : > { %438 = vrot.lane.b32.xlu1 %v430_v21, %s1521_s24 }
 0x20c   : > { %435 = vrot.lane.b32.xlu0 %v430_v21, %s1519_s22 }
 0x20f   : > { %v653_v60 = vpop.xlane.xlu1 %652 }
 0x210   : > { %1467 = vrcp.f32 %v653_v60 }
 0x21d   : > { %v1468_v61 = vpop.eup %1467 }
 0x21e   : > { %v667_v62 = vmul.f32 %v1468_v61, %v1460_v42 }
 0x220   : > { %v671_v63 = vpack.c.bf16 %v667_v62, %v667_v62 }
 0x222   : > { %1353 = vmatmul.mubr.msk.bf16.vlgmr.msra.gmra.mxu0 %vm626_vm2, %v671_v63 }
 0x223   : > { %1364 = vmatprep.mubr.msk.bf16.mxu0 %vm1518_vm0, %v1517_v0 }
 0x277   : > { %v656_v1 = vpop.xlane.xlu0 %655 }
 0x278   : > { %v659_v2 = vpop.xlane.xlu1 %658  ;;  %1469 = vrcp.f32 %v656_v1 }
 0x279   : > { %1471 = vrcp.f32 %v659_v2 }
 0x27c   : > { %v439_v10 = vpop.permute.xlu1 %438 }
 0x27f   : > { %v662_v3 = vpop.xlane.xlu0 %661 }
 0x280   : > { %1473 = vrcp.f32 %v662_v3 }
 0x283   : > { %v436_v4 = vpop.permute.xlu0 %435 }
 0x284   : > { %1363 = vmatpush3.bf16.msra.mxu0 %v436_v4 }
 0x285   : > { %v1470_v5 = vpop.eup %1469  ;;  %1374 = vmatprep.subr.bf16.mxu0 %v1517_v0 }
 0x286   : > { %v1472_v6 = vpop.eup %1471  ;;  %v668_v7 = vmul.f32 %v1470_v5, %v1462_v54 }
 0x287   : > { %v669_v8 = vmul.f32 %v1472_v6, %v1464_v55 }
 0x288   : > { %v672_v9 = vpack.c.bf16 %v668_v7, %v668_v7 }
 0x289   : > { %v673_v11 = vpack.c.bf16 %v669_v8, %v669_v8  ;;  %v1292_v8 = vld [vmem:[%s1752_s6] ss:$0 sm:$0xff] }
 0x28a   : > { %1359 = vmatmul.mubr.msk.bf16.vlgmr.msra.gmra.mxu1 %vm626_vm2, %v672_v9 }
 0x28b   : > { %1365 = vmatmul.mubr.msk.bf16.vlgmr.msra.gmra.mxu0 %vm626_vm2, %v673_v11  ;;  %1369 = vmatpush3.bf16.msra.mxu1 %v439_v10  ;;  %v1293_v10 = vld [vmem:[%s1753_s7] ss:$0 sm:$0xff] }
 0x28c   : > { %1370 = vmatprep.mubr.msk.bf16.mxu1 %vm1518_vm0, %v1517_v0  ;;  %1382 = vmatprep.subr.bf16.mxu1 %v1517_v0 }
 0x28d   : > { %v1474_v13 = vpop.eup %1473  ;;  %1375 = vmatpush3.bf16.msra.mxu0 %v1453_v12  ;;  %1378 = vmatprep.mubr.msk.bf16.mxu0 %vm1518_vm0, %v1517_v0  ;;  %v1125_v12 = vld [vmem:[%s399_s17] sm:$0xff] }
 0x28e   : > { %v670_v15 = vmul.f32 %v1474_v13, %v1466_v58  ;;  %1376 = vmatprep.subr.bf16.mxu0 %v1517_v0 }
 0x290   : > { %v674_v17 = vpack.c.bf16 %v670_v15, %v670_v15 }
 0x291   : > { %1377 = vmatpush3.bf16.msra.mxu0 %v1454_v14 }
 0x292   : > { %1371 = vmatmul.mubr.msk.bf16.vlgmr.msra.gmra.mxu1 %vm626_vm2, %v674_v17  ;;  %1390 = vmatprep.subr.bf16.mxu0 %v1517_v0 }
 0x293   : > { %1383 = vmatpush3.bf16.msra.mxu1 %v1451_v16  ;;  %1386 = vmatprep.mubr.msk.bf16.mxu1 %vm1518_vm0, %v1517_v0 }
 0x294   : > { %1384 = vmatprep.subr.bf16.mxu1 %v1517_v0 }
 0x297   : > { %1385 = vmatpush3.bf16.msra.mxu1 %v1452_v18 }
 0x298   : > { %1398 = vmatprep.subr.bf16.mxu1 %v1517_v0 }
 0x2e2   : > { %v712_v19 = vpop.f32.mrf.mxu0 }
 0x2e3   : > { %v863_v21 = vpack.c.bf16 %v712_v19, %v712_v19 }
 0x2e4   : > { %v1354_v22 = vpop.f32.mrf.mxu0 }
 0x2e5   : > { %1387 = vmatmul.mubr.msk.bf16.vlgmr.msra.gmra.mxu1 %vm441_vm1, %v863_v21 }
 0x2e6   : > { %v715_v23 = vpop.f32.mrf.mxu0  ;;  %1399 = vmatpush3.bf16.msra.mxu1 %v1456_v20  ;;  %1402 = vmatprep.mubr.msk.bf16.mxu1 %vm1518_vm0, %v1517_v0 }
 0x2e7   : > { %1400 = vmatprep.subr.bf16.mxu1 %v1517_v0 }
 0x2e8   : > { %v1355_v25 = vpop.f32.mrf.mxu0 }
 0x2ea   : > { %1401 = vmatpush3.bf16.msra.mxu1 %v1458_v24 }
 0x34a   : > { %v755_v26 = vpop.f32.mrf.mxu1 }
 0x34b   : > { %v864_v28 = vpack.c.bf16 %v755_v26, %v755_v26  ;;  %v798_v29 = vpop.f32.mrf.mxu0 }
 0x34c   : > { %v1360_v30 = vpop.f32.mrf.mxu1  ;;  %v975_v38 = vpack.c.bf16 %v798_v29, %v798_v29 }
 0x34d   : > { %v1366_v31 = vpop.f32.mrf.mxu0  ;;  %1379 = vmatmul.mubr.msk.bf16.vlgmr.msra.gmra.mxu0 %vm441_vm1, %v864_v28 }
 0x34e   : > { %1391 = vmatpush3.bf16.msra.mxu0 %v1455_v27  ;;  %v758_v32 = vpop.f32.mrf.mxu1  ;;  %1394 = vmatprep.mubr.msk.bf16.mxu0 %vm1518_vm0, %v1517_v0 }
 0x34f   : > { %v801_v34 = vpop.f32.mrf.mxu0  ;;  %1392 = vmatprep.subr.bf16.mxu0 %v1517_v0 }
 0x350   : > { %v1361_v35 = vpop.f32.mrf.mxu1 }
 0x351   : > { %v1367_v36 = vpop.f32.mrf.mxu0 }
 0x352   : > { %1393 = vmatpush3.bf16.msra.mxu0 %v1457_v33  ;;  %v841_v37 = vpop.f32.mrf.mxu1 }
 0x353   : > { %v1032_v39 = vpack.c.bf16 %v841_v37, %v841_v37 }
 0x354   : > { %v1372_v40 = vpop.f32.mrf.mxu1 }
 0x355   : > { %1395 = vmatmul.mubr.msk.bf16.vlgmr.msra.gmra.mxu0 %vm441_vm1, %v975_v38  ;;  %1403 = vmatmul.mubr.msk.bf16.vlgmr.msra.gmra.mxu1 %vm441_vm1, %v1032_v39 }
 0x356   : > { %v844_v41 = vpop.f32.mrf.mxu1 }
 0x358   : > { %v1373_v42 = vpop.f32.mrf.mxu1 }
 0x3a5   : > { %v969_v43 = vpop.f32.mrf.mxu1 }
 0x3a7   : > { %v1388_v44 = vpop.f32.mrf.mxu1 }
 0x3a9   : > { %v972_v45 = vpop.f32.mrf.mxu1 }
 0x3ab   : > { %v1389_v46 = vpop.f32.mrf.mxu1 }
 0x40d   : > { %v914_v47 = vpop.f32.mrf.mxu0 }
 0x40e   : > { %v970_v50 = vadd.f32 %v969_v43, %v914_v47 }
 0x40f   : > { %v1380_v48 = vpop.f32.mrf.mxu0 }
 0x411   : > { %v917_v0 = vpop.f32.mrf.mxu0 }
 0x413   : > { %v1381_v49 = vpop.f32.mrf.mxu0 }
 0x415   : > { %v1025_v51 = vpop.f32.mrf.mxu0  ;;  %v1082_v52 = vpop.f32.mrf.mxu1 }
 0x416   : > { %v1031_v53 = vadd.f32 %v1025_v51, %v970_v50 }
 0x417   : > { %v1396_v54 = vpop.f32.mrf.mxu0  ;;  %v1404_v55 = vpop.f32.mrf.mxu1 }
 0x418   : > { %v1088_v57 = vadd.f32 %v1082_v52, %v1031_v53 }
 0x419   : > { %v1028_v58 = vpop.f32.mrf.mxu0  ;;  %v1085_v59 = vpop.f32.mrf.mxu1 }
 0x41a   : > { %v1096_v60 = vadd.f32 %v1291_v56, %v1088_v57 }
 0x41b   : > { %v1397_v61 = vpop.f32.mrf.mxu0  ;;  %v1405_v62 = vpop.f32.mrf.mxu1 }
 0x41c   : > { %1099 = vadd.xlane.f32.xlu1 %v1096_v60 }
 0x4a5   : > { %v1100_v63 = vpop.xlane.xlu1 %1099 }
 0x4a6   : > { %v1102_v1 = vmul.f32 0.0078125, %v1100_v63 }
 0x4a8   : > { %v1103_v2 = vsub.f32 %v1096_v60, %v1102_v1 }
 0x4aa   : > { %v1104_v3 = vmul.f32 %v1103_v2, %v1103_v2 }
 0x4ac   : > { %1105 = vadd.xlane.f32.xlu0 %v1104_v3 }
 0x535   : > { %v1106_v4 = vpop.xlane.xlu0 %1105 }
 0x536   : > { %v1107_v5 = vmul.f32 0.0078125, %v1106_v4 }
 0x538   : > { %v1108_v6 = vadd.f32 1e-05, %v1107_v5 }
 0x53a   : > { %1475 = vrsqrt.f32 %v1108_v6 }
 0x547   : > { %v1476_v7 = vpop.eup %1475 }
 0x548   : > { %v1110_v9 = vmul.f32 %v1476_v7, %v1103_v2 }
 0x54a   : > { %v1117_v11 = vmul.f32 %v1292_v8, %v1110_v9 }
 0x54c   : > { %v1124_v13 = vadd.f32 %v1293_v10, %v1117_v11 }
 0x54e   : > { %v1126_v14 = vadd.f32 %v1125_v12, %v1124_v13 }
 0x550   : > { %1127 = vst [vmem:[%s407_s23] sm:$0xff] %v1126_v14 }
 0x551 PF: > { %s18_s9 = sadd.s32 1, %s1515_s9   ;;  %s1755_s27 = smov %s1507_s29 }
 0x552   : > { %p15_p7 = scmp.ge.s32.totalorder %s18_s9, 6   ;;  %s1756_s28 = smov %s1511_s30 }
 0x553   : > { %s1757_s29 = smov %s1760_s10  ;;  %s1758_s30 = smov %s1764_s11 }
 0x554   :  { %17 = sbr.rel (!%p15_p7) target bundleno = 3 (0x3), region = 91 }

// kernel: transformer_decoder.16
= control target key start
LH: loop header
LB: loop body
LE: loop exit
PB: predicated region body
PF: predicated region fallthrough
CT: control target
= control target key end

     0   :  { %s702_s18 = smov 0   ;;  %s704_s19 = smov 0   ;;  %s796_s0 = inlined_call_operand.vmem [shape: f32[2,8,128], index: 0, kind: input, shape index: {}]   ;;  %s797_s1 = inlined_call_operand.vmem [shape: f32[8,128], index: 1, kind: input, shape index: {}]   ;;  %s798_s2 = inlined_call_operand.vmem [shape: bf16[128,256], index: 2, kind: input, shape index: {}]   ;;  %s799_s3 = inlined_call_operand.vmem [shape: f32[1,128], index: 3, kind: input, shape index: {}]   ;;  %s800_s4 = inlined_call_operand.vmem [shape: f32[2,8,128], index: 4, kind: output, shape index: {0}]   ;;  %s801_s5 = inlined_call_operand.vmem [shape: f32[2,8,128], index: 5, kind: output, shape index: {1}]  }
   0x1   :  { %s706_s20 = smov 0  }
   0x2 LB: > { %s28_s21 = sadd.s32 1, %s665_s19  ;;  %p575_p0 = scmp.ge.s32.totalorder %s669_s20, 1  ;;  %s669_s20 = sphi %s706_s20, %s16_s20   ;;  %s665_s19 = sphi %s704_s19, %s803_s19   ;;  %s661_s18 = sphi %s702_s18, %s802_s18  }
   0x3   : > { %p30_p1 = scmp.ge.s32.totalorder %s28_s21, 2  ;;  %p219_p2 = scmp.lt.s32.totalorder %s669_s20, 3 }
   0x5   : > { %s805_s21 = smov (%p30_p1, %s28_s21), 0  ;;  %p220_p3 = pnand %p575_p0, %p219_p2 }
   0x6   : > { %p262_p4 = scmp.lt.s32.totalorder (!%p220_p3), %s661_s18, 1 }
   0x7   : > { %223 = sbr.rel (%p220_p3) target bundleno = 244 (0xf4), region = 36 }
   0xc   : > { %v623_v0 = vld [vmem:[%s798_s2 + $0x74] ss:$8 sps:$4 sm:$0xff]   ;;  %v625_v1 = vld [vmem:[%s798_s2 + $0x70] ss:$8 sps:$4 sm:$0xff]   ;;  %v671_v2 = vmov 0   ;;  %s807_s18 = smov (!%p262_p4, %s661_s18), 1 }
   0xd   : > { %418 = vmatprep.mubr.bf16.mxu0 %v671_v2  ;;  %386 = vmatprep.subr.bf16.mxu0 %v623_v0  ;;  %v626_v3 = vld [vmem:[%s798_s2 + $0x64] ss:$8 sps:$4 sm:$0xff]   ;;  %v628_v4 = vld [vmem:[%s798_s2 + $0x60] ss:$8 sps:$4 sm:$0xff]   ;;  %v629_v5 = vld [vmem:[%s798_s2 + $0x54] ss:$8 sps:$4 sm:$0xff]  }
   0xe   : > { %387 = vmatpush1.bf16.msra.mxu0 %v625_v1  ;;  %v631_v6 = vld [vmem:[%s798_s2 + $0x50] ss:$8 sps:$4 sm:$0xff]   ;;  %v632_v7 = vld [vmem:[%s798_s2 + $0x44] ss:$8 sps:$4 sm:$0xff]   ;;  %v634_v8 = vld [vmem:[%s798_s2 + $0x40] ss:$8 sps:$4 sm:$0xff]  }
   0xf   : > { %388 = vmatprep.subr.bf16.mxu0 %v626_v3  ;;  %v635_v9 = vld [vmem:[%s798_s2 + $0x34] ss:$8 sps:$4 sm:$0xff]   ;;  %v637_v10 = vld [vmem:[%s798_s2 + $0x30] ss:$8 sps:$4 sm:$0xff]   ;;  %v638_v11 = vld [vmem:[%s798_s2 + $0x24] ss:$8 sps:$4 sm:$0xff]  }
  0x10   : > { %v640_v12 = vld [vmem:[%s798_s2 + $0x20] ss:$8 sps:$4 sm:$0xff]   ;;  %v641_v13 = vld [vmem:[%s798_s2 + $0x14] ss:$8 sps:$4 sm:$0xff]   ;;  %s576_s27 = sshll.u32 %s807_s18, 3 }
  0x11   : > { %v643_v14 = vld [vmem:[%s798_s2 + $0x10] ss:$8 sps:$4 sm:$0xff]   ;;  %v644_v15 = vld [vmem:[%s798_s2 + $0x4] ss:$8 sps:$4 sm:$0xff]   ;;  %s268_s9 = scalar_lea.vmem %s796_s0, %s576_s27  ;;  %v646_v16 = vld [vmem:[%s798_s2] ss:$8 sps:$4 sm:$0xff]   ;;  %s279_s15 = scalar_lea.vmem %s800_s4, %s576_s27 }
  0x12   : > { %389 = vmatpush1.bf16.msra.mxu0 %v628_v4  ;;  %v288_v17 = vld [vmem:[%s268_s9] sm:$0xff]  ;;  %s286_s24 = scalar_lea.vmem %s801_s5, %s576_s27 }
  0x13   : > { %390 = vmatprep.subr.bf16.mxu0 %v629_v5  ;;  %v305_v18 = vpack.c.bf16 %v288_v17, %v288_v17  ;;  %v427_v19 = vld [vmem:[%s797_s1] sm:$0xff] }
  0x14   : > { %v595_v21 = vld [vmem:[%s799_s3] ss:$0 sm:$0xff] }
  0x16   : > { %391 = vmatpush1.bf16.msra.mxu0 %v631_v6 }
  0x17   : > { %392 = vmatprep.subr.bf16.mxu0 %v632_v7 }
  0x1a   : > { %393 = vmatpush1.bf16.msra.mxu0 %v634_v8 }
  0x1b   : > { %394 = vmatprep.subr.bf16.mxu0 %v635_v9 }
  0x1e   : > { %395 = vmatpush1.bf16.msra.mxu0 %v637_v10 }
  0x1f   : > { %396 = vmatprep.subr.bf16.mxu0 %v638_v11 }
  0x22   : > { %397 = vmatpush1.bf16.msra.mxu0 %v640_v12 }
  0x23   : > { %398 = vmatprep.subr.bf16.mxu0 %v641_v13 }
  0x26   : > { %399 = vmatpush1.bf16.msra.mxu0 %v643_v14 }
  0x27   : > { %400 = vmatprep.subr.bf16.mxu0 %v644_v15 }
  0x2a   : > { %401 = vmatpush1.bf16.msra.mxu0 %v646_v16 }
  0x2d   : > { %419 = vmatmul.mubr.bf16.vlgmr.msra.gmra.mxu0 %v305_v18 }
  0xed   : > { %v420_v20 = vpop.f32.mrf.mxu0 }
  0xee   : > { %v428_v22 = vadd.f32 %v427_v19, %v420_v20 }
  0xef   : > { %v422_v23 = vpop.f32.mrf.mxu0 }
  0xf0   : > { %429 = vst [vmem:[%s279_s15] sm:$0xff] %v428_v22  ;;  %v437_v24 = vadd.f32 %v595_v21, %v422_v23 }
  0xf1   : > { %v424_v25 = vpop.f32.mrf.mxu0 }
  0xf2   : > { %438 = vst [vmem:[%s286_s24] sm:$0xff] %v437_v24 }
  0xf3   : > { %v425_v26 = vpop.f32.mrf.mxu0 }
  0xf4 PF: > { %s16_s20 = sadd.s32 1, %s669_s20   ;;  %s802_s18 = smov %s665_s19 }
  0xf5   : > { %p13_p5 = scmp.ge.s32.totalorder %s16_s20, 4   ;;  %s803_s19 = smov %s805_s21 }
  0xf7   :  { %15 = sbr.rel (!%p13_p5) target bundleno = 2 (0x2), region = 81 }

// kernel: transformer_decoder.18
= control target key start
LH: loop header
LB: loop body
LE: loop exit
PB: predicated region body
PF: predicated region fallthrough
CT: control target
= control target key end

     0   :  { %s1100_s30 = smov 0   ;;  %s1102_s10 = smov 0   ;;  %s1287_s0 = inlined_call_operand.vmem [shape: f32[2,16,128], index: 0, kind: input, shape index: {}]   ;;  %s1288_s1 = inlined_call_operand.vmem [shape: f32[1,128], index: 1, kind: input, shape index: {}]   ;;  %s1289_s2 = inlined_call_operand.vmem [shape: f32[1,128], index: 2, kind: input, shape index: {}]   ;;  %s1290_s3 = inlined_call_operand.vmem [shape: bf16[128,256], index: 3, kind: input, shape index: {}]   ;;  %s1291_s4 = inlined_call_operand.vmem [shape: f32[1,256], index: 4, kind: input, shape index: {}]   ;;  %s1292_s5 = inlined_call_operand.vmem [shape: f32[1,256], index: 5, kind: input, shape index: {}]   ;;  %s1293_s6 = inlined_call_operand.vmem [shape: f32[1,256], index: 6, kind: input, shape index: {}]   ;;  %s1294_s7 = inlined_call_operand.vmem [shape: bf16[256,128], index: 7, kind: input, shape index: {}]   ;;  %s1295_s8 = inlined_call_operand.vmem [shape: f32[1,128], index: 8, kind: input, shape index: {}]   ;;  %s1296_s9 = inlined_call_operand.vmem [shape: f32[2,16,128], index: 9, kind: output, shape index: {}]  }
   0x1   :  { %s1104_s11 = smov 0   ;;  %s1106_s12 = smov 0  }
   0x2   :  { %s1108_s13 = smov 0  }
   0x3 LB: > { %s28_s14 = sadd.s32 1, %s1039_s11  ;;  %s31_s15 = sadd.s32 1, %s1043_s12  ;;  %s1047_s13 = sphi %s1108_s13, %s19_s13   ;;  %s1043_s12 = sphi %s1106_s12, %s1300_s12   ;;  %s1039_s11 = sphi %s1104_s11, %s1299_s11   ;;  %s1035_s10 = sphi %s1102_s10, %s1298_s10   ;;  %s1031_s30 = sphi %s1100_s30, %s1297_s30  }
   0x4   : > { %p29_p0 = scmp.ge.s32.totalorder %s28_s14, 2  ;;  %p860_p1 = scmp.ge.s32.totalorder %s1047_s13, 1 }
   0x5   : > { %p306_p2 = scmp.lt.s32.totalorder %s1047_s13, 5 }
   0x6   : > { %s1302_s14 = smov (%p29_p0, %s28_s14), 0  ;;  %s1304_s15 = smov (!%p29_p0, %s31_s15), %s1043_s12 }
   0x7   : > { %p307_p3 = pnand %p860_p1, %p306_p2  ;;  %p33_p4 = scmp.ge.s32.totalorder %s1304_s15, 2 }
   0x8   : > { %p348_p5 = scmp.lt.s32.totalorder (!%p307_p3), %s1035_s10, 1  ;;  %p350_p6 = scmp.lt.s32.totalorder (!%p307_p3), %s1031_s30, 1 }
   0x9   : > { %s1306_s15 = smov (%p33_p4, %s1304_s15), 0  ;;  %310 = sbr.rel (%p307_p3) target bundleno = 1042 (0x412), region = 56 }
   0xe   : > { %s1308_s10 = smov (!%p348_p5, %s1035_s10), 1  ;;  %s1310_s30 = smov (!%p350_p6, %s1031_s30), 1  ;;  %v965_v1 = vld [vmem:[%s1290_s3 + $0x74] ss:$8 sps:$4 sm:$0xff]   ;;  %v967_v2 = vld [vmem:[%s1290_s3 + $0x70] ss:$8 sps:$4 sm:$0xff]   ;;  %v413_v32 = vlaneseq }
   0xf   : > { %s861_s16 = sshll.u32 %s1308_s10, 1  ;;  %v968_v3 = vld [vmem:[%s1290_s3 + $0x64] ss:$8 sps:$4 sm:$0xff]   ;;  %503 = vmatprep.subr.bf16.mxu0 %v965_v1  ;;  %v970_v4 = vld [vmem:[%s1290_s3 + $0x60] ss:$8 sps:$4 sm:$0xff]   ;;  %v1049_v16 = vmov 0  }
  0x10   : > { %s1130_s17 = sadd.s32 %s861_s16, %s1310_s30  ;;  %504 = vmatpush1.bf16.msra.mxu0 %v967_v2  ;;  %v971_v9 = vld [vmem:[%s1290_s3 + $0x54] ss:$8 sps:$4 sm:$0xff]   ;;  %v973_v10 = vld [vmem:[%s1290_s3 + $0x50] ss:$8 sps:$4 sm:$0xff]   ;;  %v974_v11 = vld [vmem:[%s1290_s3 + $0x44] ss:$8 sps:$4 sm:$0xff]   ;;  %535 = vmatprep.mubr.bf16.mxu0 %v1049_v16 }
  0x11   : > { %s862_s18 = sshll.u32 %s1130_s17, 3  ;;  %505 = vmatprep.subr.bf16.mxu0 %v968_v3  ;;  %v976_v12 = vld [vmem:[%s1290_s3 + $0x40] ss:$8 sps:$4 sm:$0xff]   ;;  %v977_v13 = vld [vmem:[%s1290_s3 + $0x34] ss:$8 sps:$4 sm:$0xff]   ;;  %v414_v33 = vshrl.u32 %v413_v32, 7 }
  0x12   : > { %s355_s21 = scalar_lea.vmem %s1287_s0, %s862_s18  ;;  %v979_v14 = vld [vmem:[%s1290_s3 + $0x30] ss:$8 sps:$4 sm:$0xff]   ;;  %v980_v15 = vld [vmem:[%s1290_s3 + $0x24] ss:$8 sps:$4 sm:$0xff]   ;;  %v982_v17 = vld [vmem:[%s1290_s3 + $0x20] ss:$8 sps:$4 sm:$0xff]   ;;  %s363_s30 = scalar_lea.vmem %s1296_s9, %s862_s18 }
  0x13   : > { %v1138_v0 = vld [vmem:[%s355_s21] sm:$0xff]  ;;  %v983_v18 = vld [vmem:[%s1290_s3 + $0x14] ss:$8 sps:$4 sm:$0xff]   ;;  %v985_v19 = vld [vmem:[%s1290_s3 + $0x10] ss:$8 sps:$4 sm:$0xff]   ;;  %v1196_v34 = vsub.s32 0, %v414_v33 }
  0x14   : > { %368 = vadd.xlane.f32.xlu0 %v1138_v0  ;;  %506 = vmatpush1.bf16.msra.mxu0 %v970_v4  ;;  %v986_v20 = vld [vmem:[%s1290_s3 + $0x4] ss:$8 sps:$4 sm:$0xff]   ;;  %v988_v21 = vld [vmem:[%s1290_s3] ss:$8 sps:$4 sm:$0xff]   ;;  %v1201_v36 = vsub.s32 1, %v414_v33  ;;  %v989_v48 = vld [vmem:[%s1294_s7 + $0x78] sm:$0xff]  }
  0x15   : > { %507 = vmatprep.subr.bf16.mxu0 %v971_v9  ;;  %v865_v26 = vld [vmem:[%s1288_s1] ss:$0 sm:$0xff]  ;;  %v990_v49 = vld [vmem:[%s1294_s7 + $0x38] sm:$0xff]   ;;  %v991_v50 = vld [vmem:[%s1294_s7 + $0x70] sm:$0xff]   ;;  %902 = vmatprep.subr.bf16.mxu1 %v989_v48 }
  0x16   : > { %v866_v28 = vld [vmem:[%s1289_s2] ss:$0 sm:$0xff]  ;;  %903 = vmatpush3.bf16.msra.mxu1 %v990_v49  ;;  %v992_v58 = vld [vmem:[%s1294_s7 + $0x30] sm:$0xff]   ;;  %v993_v59 = vld [vmem:[%s1294_s7 + $0x68] sm:$0xff]  }
  0x17   : > { %v411_v35 = vld [vmem:[%s1291_s4] sm:$0x3]  ;;  %904 = vmatprep.subr.bf16.mxu1 %v991_v50  ;;  %v994_v60 = vld [vmem:[%s1294_s7 + $0x28] sm:$0xff]   ;;  %v997_v63 = vld [vmem:[%s1294_s7 + $0x58] sm:$0xff]  }
  0x18   : > { %508 = vmatpush1.bf16.msra.mxu0 %v973_v10  ;;  %v416_v37 = vrot.slane %v411_v35, %v1196_v34  ;;  %v420_v38 = vrot.slane %v411_v35, %v1201_v36  ;;  %v995_v61 = vld [vmem:[%s1294_s7 + $0x60] sm:$0xff]   ;;  %v998_v1 = vld [vmem:[%s1294_s7 + $0x18] sm:$0xff]   ;;  %v999_v2 = vld [vmem:[%s1294_s7 + $0x50] sm:$0xff]  }
  0x19   : > { %509 = vmatprep.subr.bf16.mxu0 %v974_v11  ;;  %v996_v62 = vld [vmem:[%s1294_s7 + $0x20] sm:$0xff]   ;;  %v1000_v3 = vld [vmem:[%s1294_s7 + $0x10] sm:$0xff]   ;;  %v1001_v4 = vld [vmem:[%s1294_s7 + $0x48] sm:$0xff]  }
  0x1a   : > { %905 = vmatpush3.bf16.msra.mxu1 %v992_v58  ;;  %v546_v11 = vld [vmem:[%s1292_s5] sm:$0x3] }
  0x1b   : > { %906 = vmatprep.subr.bf16.mxu1 %v993_v59 }
  0x1c   : > { %510 = vmatpush1.bf16.msra.mxu0 %v976_v12  ;;  %v547_v12 = vld [vmem:[%s1293_s6] sm:$0x3] }
  0x1d   : > { %511 = vmatprep.subr.bf16.mxu0 %v977_v13  ;;  %v569_v13 = vrot.slane %v546_v11, %v1196_v34 }
  0x1e   : > { %907 = vmatpush3.bf16.msra.mxu1 %v994_v60 }
  0x1f   : > { %908 = vmatprep.subr.bf16.mxu1 %v995_v61 }
  0x20   : > { %512 = vmatpush1.bf16.msra.mxu0 %v979_v14  ;;  %v573_v14 = vrot.slane %v546_v11, %v1201_v36 }
  0x21   : > { %513 = vmatprep.subr.bf16.mxu0 %v980_v15 }
  0x22   : > { %909 = vmatpush3.bf16.msra.mxu1 %v996_v62 }
  0x23   : > { %910 = vmatprep.subr.bf16.mxu1 %v997_v63 }
  0x24   : > { %514 = vmatpush1.bf16.msra.mxu0 %v982_v17  ;;  %v582_v17 = vrot.slane %v547_v12, %v1196_v34 }
  0x25   : > { %515 = vmatprep.subr.bf16.mxu0 %v983_v18  ;;  %v586_v18 = vrot.slane %v547_v12, %v1201_v36 }
  0x26   : > { %911 = vmatpush3.bf16.msra.mxu1 %v998_v1 }
  0x27   : > { %912 = vmatprep.subr.bf16.mxu1 %v999_v2 }
  0x28   : > { %516 = vmatpush1.bf16.msra.mxu0 %v985_v19 }
  0x29   : > { %517 = vmatprep.subr.bf16.mxu0 %v986_v20 }
  0x2a   : > { %913 = vmatpush3.bf16.msra.mxu1 %v1000_v3 }
  0x2b   : > { %914 = vmatprep.subr.bf16.mxu1 %v1001_v4 }
  0x2c   : > { %518 = vmatpush1.bf16.msra.mxu0 %v988_v21 }
  0x9d   : > { %v369_v5 = vpop.xlane.xlu0 %368 }
  0x9e   : > { %v371_v6 = vmul.f32 0.0078125, %v369_v5  ;;  %v1002_v5 = vld [vmem:[%s1294_s7 + $0x8] sm:$0xff]  }
  0x9f   : > { %915 = vmatpush3.bf16.msra.mxu1 %v1002_v5 }
  0xa0   : > { %v372_v7 = vsub.f32 %v1138_v0, %v371_v6  ;;  %v1003_v6 = vld [vmem:[%s1294_s7 + $0x40] sm:$0xff]  }
  0xa1   : > { %916 = vmatprep.subr.bf16.mxu1 %v1003_v6 }
  0xa2   : > { %v373_v8 = vmul.f32 %v372_v7, %v372_v7 }
  0xa4   : > { %374 = vadd.xlane.f32.xlu0 %v373_v8 }
 0x12d   : > { %v375_v22 = vpop.xlane.xlu0 %374 }
 0x12e   : > { %v376_v23 = vmul.f32 0.0078125, %v375_v22 }
 0x130   : > { %v377_v24 = vadd.f32 1e-05, %v376_v23 }
 0x132   : > { %1005 = vrsqrt.f32 %v377_v24 }
 0x13f   : > { %v1006_v25 = vpop.eup %1005 }
 0x140   : > { %v379_v27 = vmul.f32 %v1006_v25, %v372_v7  ;;  %v1004_v7 = vld [vmem:[%s1294_s7] sm:$0xff]  }
 0x141   : > { %917 = vmatpush3.bf16.msra.mxu1 %v1004_v7 }
 0x142   : > { %v386_v29 = vmul.f32 %v865_v26, %v379_v27  ;;  %v883_v27 = vld [vmem:[%s1295_s8] ss:$0 sm:$0xff] }
 0x144   : > { %v393_v30 = vadd.f32 %v866_v28, %v386_v29 }
 0x146   : > { %v410_v31 = vpack.c.bf16 %v393_v30, %v393_v30 }
 0x148   : > { %536 = vmatmul.mubr.bf16.vlgmr.msra.gmra.mxu0 %v410_v31 }
 0x208   : > { %v537_v39 = vpop.f32.mrf.mxu0 }
 0x209   : > { %v538_v40 = vadd.f32 %v537_v39, %v416_v37 }
 0x20a   : > { %v539_v41 = vpop.f32.mrf.mxu0 }
 0x20b   : > { %v540_v42 = vadd.f32 %v539_v41, %v420_v38  ;;  %v544_v44 = vmax.f32 %v538_v40, 0.0 }
 0x20c   : > { %v541_v43 = vpop.f32.mrf.mxu0 }
 0x20d   : > { %v545_v45 = vmax.f32 %v540_v42, 0.0 }
 0x20e   : > { %v542_v46 = vpop.f32.mrf.mxu0 }
 0x20f   : > { %v548_v47 = vadd.f32 %v545_v45, %v544_v44 }
 0x211   : > { %549 = vadd.xlane.f32.xlu1 %v548_v47 }
 0x29a   : > { %v550_v51 = vpop.xlane.xlu1 %549 }
 0x29b   : > { %v552_v52 = vmul.f32 0.00390625, %v550_v51 }
 0x29d   : > { %v553_v53 = vsub.f32 %v544_v44, %v552_v52  ;;  %v554_v54 = vsub.f32 %v545_v45, %v552_v52 }
 0x29f   : > { %v555_v55 = vmul.f32 %v553_v53, %v553_v53  ;;  %v556_v56 = vmul.f32 %v554_v54, %v554_v54 }
 0x2a1   : > { %v557_v57 = vadd.f32 %v556_v56, %v555_v55 }
 0x2a3   : > { %558 = vadd.xlane.f32.xlu1 %v557_v57 }
 0x32c   : > { %v559_v8 = vpop.xlane.xlu1 %558 }
 0x32d   : > { %v560_v9 = vmul.f32 0.00390625, %v559_v8 }
 0x32f   : > { %v561_v10 = vadd.f32 1e-05, %v560_v9 }
 0x331   : > { %1007 = vrsqrt.f32 %v561_v10 }
 0x33e   : > { %v1008_v15 = vpop.eup %1007 }
 0x33f   : > { %v564_v16 = vmul.f32 %v1008_v15, %v554_v54  ;;  %v563_v19 = vmul.f32 %v1008_v15, %v553_v53 }
 0x341   : > { %v577_v20 = vmul.f32 %v573_v14, %v564_v16  ;;  %v576_v21 = vmul.f32 %v569_v13, %v563_v19 }
 0x343   : > { %v590_v22 = vadd.f32 %v586_v18, %v577_v20  ;;  %v589_v23 = vadd.f32 %v582_v17, %v576_v21 }
 0x345   : > { %v624_v24 = vpack.c.bf16 %v590_v22, %v590_v22  ;;  %v623_v25 = vpack.c.bf16 %v589_v23, %v589_v23 }
 0x347   : > { %760 = vmatprep.mubr.bf16.mxu1 %v624_v24 }
 0x348   : > { %761 = vmatmul.mubr.bf16.vlgmr.msra.gmra.mxu1 %v623_v25 }
 0x408   : > { %v918_v26 = vpop.f32.mrf.mxu1 }
 0x40a   : > { %v919_v28 = vpop.f32.mrf.mxu1 }
 0x40b   : > { %v920_v29 = vadd.f32 %v919_v28, %v918_v26 }
 0x40c   : > { %v921_v30 = vpop.f32.mrf.mxu1 }
 0x40d   : > { %v763_v31 = vadd.f32 %v920_v29, %v883_v27 }
 0x40e   : > { %v922_v32 = vpop.f32.mrf.mxu1 }
 0x40f   : > { %v768_v33 = vadd.f32 %v763_v31, %v1138_v0 }
 0x411   : > { %769 = vst [vmem:[%s363_s30] sm:$0xff] %v768_v33 }
 0x412 PF: > { %s19_s13 = sadd.s32 1, %s1047_s13   ;;  %s1297_s30 = smov %s1039_s11 }
 0x413   : > { %p16_p7 = scmp.ge.s32.totalorder %s19_s13, 6   ;;  %s1298_s10 = smov %s1043_s12 }
 0x414   : > { %s1299_s11 = smov %s1302_s14  ;;  %s1300_s12 = smov %s1306_s15 }
 0x415   :  { %18 = sbr.rel (!%p16_p7) target bundleno = 3 (0x3), region = 86 }

// kernel: transformer_decoder.17
= control target key start
LH: loop header
LB: loop body
LE: loop exit
PB: predicated region body
PF: predicated region fallthrough
CT: control target
= control target key end

     0   :  { %s1628_s30 = smov 0   ;;  %s1630_s10 = smov 0   ;;  %s1815_s0 = inlined_call_operand.vmem [shape: f32[2,16,128], index: 0, kind: input, shape index: {}]   ;;  %s1816_s1 = inlined_call_operand.vmem [shape: f32[2,8,128], index: 1, kind: input, shape index: {}]   ;;  %s1817_s2 = inlined_call_operand.vmem [shape: f32[2,8,128], index: 2, kind: input, shape index: {}]   ;;  %s1818_s3 = inlined_call_operand.vmem [shape: f32[2,1,8], index: 3, kind: input, shape index: {}]   ;;  %s1819_s4 = inlined_call_operand.vmem [shape: f32[2,16,128], index: 4, kind: input, shape index: {}]   ;;  %s1820_s5 = inlined_call_operand.vmem [shape: bf16[128,128], index: 5, kind: input, shape index: {}]   ;;  %s1821_s6 = inlined_call_operand.vmem [shape: f32[1,128], index: 6, kind: input, shape index: {}]   ;;  %s1822_s7 = inlined_call_operand.vmem [shape: f32[1,128], index: 7, kind: input, shape index: {}]   ;;  %s1823_s8 = inlined_call_operand.vmem [shape: f32[1,128], index: 8, kind: input, shape index: {}]   ;;  %s1824_s9 = inlined_call_operand.vmem [shape: f32[2,16,128], index: 9, kind: output, shape index: {}]  }
   0x1   :  { %s1632_s11 = smov 0   ;;  %s1634_s12 = smov 0  }
   0x2   :  { %s1636_s13 = smov 0  }
   0x3 LB: > { %s28_s14 = sadd.s32 1, %s1563_s11  ;;  %s31_s15 = sadd.s32 1, %s1567_s12  ;;  %s1571_s13 = sphi %s1636_s13, %s19_s13   ;;  %s1567_s12 = sphi %s1634_s12, %s1828_s12   ;;  %s1563_s11 = sphi %s1632_s11, %s1827_s11   ;;  %s1559_s10 = sphi %s1630_s10, %s1826_s10   ;;  %s1555_s30 = sphi %s1628_s30, %s1825_s30  }
   0x4   : > { %p29_p0 = scmp.ge.s32.totalorder %s28_s14, 2  ;;  %p1319_p1 = scmp.ge.s32.totalorder %s1571_s13, 1 }
   0x5   : > { %p347_p2 = scmp.lt.s32.totalorder %s1571_s13, 5 }
   0x6   : > { %s1830_s14 = smov (%p29_p0, %s28_s14), 0  ;;  %s1832_s15 = smov (!%p29_p0, %s31_s15), %s1567_s12 }
   0x7   : > { %p348_p3 = pnand %p1319_p1, %p347_p2  ;;  %p33_p4 = scmp.ge.s32.totalorder %s1832_s15, 2 }
   0x8   : > { %p408_p5 = scmp.lt.s32.totalorder (!%p348_p3), %s1559_s10, 1  ;;  %p410_p6 = scmp.lt.s32.totalorder (!%p348_p3), %s1555_s30, 1 }
   0x9   : > { %s1834_s15 = smov (%p33_p4, %s1832_s15), 0  ;;  %351 = sbr.rel (%p348_p3) target bundleno = 1363 (0x553), region = 56 }
   0xa   : > { %s1575_s26 = smov (!%p348_p3), 64   ;;  %s1576_s27 = smov (!%p348_p3), 96  }
   0xb   : > { %s1577_s28 = smov (!%p348_p3), 32  }
   0xe   : > { %v1573_v0 = vmov 0.0   ;;  %vm1574_vm0 = vmmov 0   ;;  %s1836_s10 = smov (!%p408_p5, %s1559_s10), 1  ;;  %s1838_s30 = smov (!%p410_p6, %s1555_s30), 1  ;;  %vm478_vm1 = vcmask 261120   ;;  %vm663_vm2 = vcmask 64512  }
   0xf   : > { %1382 = vmatprep.subr.bf16.mxu0 %v1573_v0  ;;  %1384 = vmatprep.mubr.msk.bf16.mxu0 %vm1574_vm0, %v1573_v0  ;;  %s1322_s16 = sshll.u32 %s1836_s10, 3  ;;  %s1320_s17 = sshll.u32 %s1836_s10, 1  ;;  %vm715_vm3 = vcmask 1043456  }
  0x10   : > { %1388 = vmatprep.subr.bf16.mxu1 %v1573_v0  ;;  %1390 = vmatprep.mubr.msk.bf16.mxu1 %vm1574_vm0, %v1573_v0  ;;  %s419_s20 = scalar_lea.vmem %s1816_s1, %s1322_s16  ;;  %s413_s21 = sadd.s32 %s1320_s17, %s1838_s30 }
  0x11   : > { %v453_v1 = vld [vmem:[%s419_s20] sm:$0xff]  ;;  %s1673_s22 = sshll.u32 %s413_s21, 3  ;;  %s426_s17 = scalar_lea.vmem %s1818_s3, %s1836_s10 }
  0x12   : > { %v454_v2 = vpack.c.bf16 %v453_v1, %v453_v1  ;;  %s415_s25 = scalar_lea.vmem %s1815_s0, %s1673_s22  ;;  %v1328_v15 = vld [vmem:[%s426_s17] ss:$0 sm:$0xff]  ;;  %s423_s20 = scalar_lea.vmem %s1817_s2, %s1322_s16 }
  0x13   : > { %v444_v3 = vld [vmem:[%s415_s25] sm:$0xff]  ;;  %s442_s18 = scalar_lea.vmem %s1824_s9, %s1673_s22 }
  0x14   : > { %458 = vrot.lane.b32.xlu1 %v454_v2, %s1575_s26  ;;  %456 = vrot.lane.b32.xlu0 %v454_v2, %s1576_s27  ;;  %v483_v4 = vsel %vm478_vm1, %v454_v2, 0  ;;  %v445_v5 = vpack.c.bf16 %v444_v3, %v444_v3  ;;  %v462_v40 = vld [vmem:[%s423_s20] sm:$0xff] }
  0x15   : > { %1383 = vmatpush3.bf16.xpose.msra.mxu0 %v483_v4  ;;  %v463_v41 = vpack.c.bf16 %v462_v40, %v462_v40  ;;  %v1513_v40 = vld [vmem:[%s1820_s5 + $0x20] sm:$0xff]  }
  0x16   : > { %1394 = vmatprep.subr.bf16.mxu0 %v1573_v0 }
  0x17   : > { %v717_v47 = vsel %vm715_vm3, %v463_v41, 0 }
  0x18   : > { %447 = vrot.lane.b32.xlu0 %v445_v5, %s1576_s27  ;;  %460 = vrot.lane.b32.xlu1 %v454_v2, %s1577_s28 }
  0x1c   : > { %449 = vrot.lane.b32.xlu0 %v445_v5, %s1575_s26  ;;  %1385 = vmatmul.mubr.msk.bf16.vlgmr.msra.gmra.mxu0 %vm478_vm1, %v445_v5 }
  0x1d   : > { %451 = vrot.lane.b32.xlu1 %v445_v5, %s1577_s28  ;;  %1396 = vmatprep.mubr.msk.bf16.mxu0 %vm1574_vm0, %v1573_v0 }
  0x86   : > { %v459_v6 = vpop.permute.xlu1 %458  ;;  %v457_v7 = vpop.permute.xlu0 %456 }
  0x87   : > { %v575_v8 = vsel %vm478_vm1, %v459_v6, 0  ;;  %v529_v9 = vsel %vm478_vm1, %v457_v7, 0 }
  0x88   : > { %1389 = vmatpush3.bf16.xpose.msra.mxu1 %v529_v9  ;;  %1395 = vmatpush3.bf16.xpose.msra.mxu0 %v575_v8 }
  0x89   : > { %1400 = vmatprep.subr.bf16.mxu1 %v1573_v0  ;;  %1406 = vmatprep.subr.bf16.mxu0 %v1573_v0 }
  0x8a   : > { %v448_v10 = vpop.permute.xlu0 %447  ;;  %v461_v11 = vpop.permute.xlu1 %460 }
  0x8b   : > { %v621_v12 = vsel %vm478_vm1, %v461_v11, 0 }
  0x8e   : > { %v450_v13 = vpop.permute.xlu0 %449 }
  0x8f   : > { %1391 = vmatmul.mubr.msk.bf16.vlgmr.msra.gmra.mxu1 %vm478_vm1, %v448_v10  ;;  %1397 = vmatmul.mubr.msk.bf16.vlgmr.msra.gmra.mxu0 %vm478_vm1, %v450_v13  ;;  %v452_v14 = vpop.permute.xlu1 %451 }
  0x90   : > { %1401 = vmatpush3.bf16.xpose.msra.mxu1 %v621_v12  ;;  %1402 = vmatprep.mubr.msk.bf16.mxu1 %vm1574_vm0, %v1573_v0 }
  0x91   : > { %1408 = vmatprep.mubr.msk.bf16.mxu0 %vm1574_vm0, %v1573_v0  ;;  %1412 = vmatprep.subr.bf16.mxu1 %v1573_v0 }
  0x92   : > { %1407 = vmatpush3.bf16.msra.mxu0 %v717_v47 }
  0x93   : > { %1418 = vmatprep.subr.bf16.mxu0 %v1573_v0 }
  0x97   : > { %1403 = vmatmul.mubr.msk.bf16.vlgmr.msra.gmra.mxu1 %vm478_vm1, %v452_v14 }
  0x98   : > { %1414 = vmatprep.mubr.msk.bf16.mxu1 %vm1574_vm0, %v1573_v0 }
  0xdc   : > { %v519_v16 = vpop.f32.mrf.mxu0 }
  0xdd   : > { %v520_v17 = vadd.f32 %v1328_v15, %v519_v16 }
  0xde   : > { %v1386_v18 = vpop.f32.mrf.mxu0 }
  0xdf   : > { %v664_v19 = vsel %vm663_vm2, %v520_v17, -inf }
  0xe0   : > { %665 = vmax.xlane.f32.xlu0 %v664_v19  ;;  %v522_v20 = vpop.f32.mrf.mxu0  ;;  %v1509_v19 = vld [vmem:[%s1820_s5 + $0x18] sm:$0xff]  }
  0xe2   : > { %v1387_v21 = vpop.f32.mrf.mxu0 }
  0xe3   : > { %v1510_v21 = vld [vmem:[%s1820_s5 + $0x10] sm:$0xff]  }
 0x14f   : > { %v565_v22 = vpop.f32.mrf.mxu1  ;;  %v611_v23 = vpop.f32.mrf.mxu0 }
 0x150   : > { %v566_v24 = vadd.f32 %v1328_v15, %v565_v22  ;;  %v612_v25 = vadd.f32 %v1328_v15, %v611_v23  ;;  %v1507_v23 = vld [vmem:[%s1820_s5 + $0x8] sm:$0xff]  }
 0x151   : > { %v1392_v26 = vpop.f32.mrf.mxu1  ;;  %v1398_v27 = vpop.f32.mrf.mxu0 }
 0x152   : > { %v667_v28 = vsel %vm663_vm2, %v566_v24, -inf  ;;  %v670_v29 = vsel %vm663_vm2, %v612_v25, -inf  ;;  %v1512_v27 = vld [vmem:[%s1820_s5 + $0x38] sm:$0xff]  }
 0x153   : > { %668 = vmax.xlane.f32.xlu1 %v667_v28  ;;  %v568_v30 = vpop.f32.mrf.mxu1  ;;  %671 = vmax.xlane.f32.xlu0 %v670_v29  ;;  %v614_v31 = vpop.f32.mrf.mxu0 }
 0x154   : > { %v1514_v31 = vld [vmem:[%s1820_s5 + $0x30] sm:$0xff]  }
 0x155   : > { %v1393_v32 = vpop.f32.mrf.mxu1  ;;  %v1399_v33 = vpop.f32.mrf.mxu0 }
 0x157   : > { %v657_v34 = vpop.f32.mrf.mxu1 }
 0x158   : > { %v658_v35 = vadd.f32 %v1328_v15, %v657_v34  ;;  %v1511_v34 = vld [vmem:[%s1820_s5 + $0x28] sm:$0xff]  }
 0x159   : > { %v1404_v36 = vpop.f32.mrf.mxu1 }
 0x15a   : > { %v673_v37 = vsel %vm663_vm2, %v658_v35, -inf }
 0x15b   : > { %v660_v38 = vpop.f32.mrf.mxu1  ;;  %674 = vmax.xlane.f32.xlu0 %v673_v37 }
 0x15d   : > { %v1405_v39 = vpop.f32.mrf.mxu1 }
 0x164   : > { %465 = vrot.lane.b32.xlu1 %v463_v41, %s1576_s27  ;;  %s434_s27 = scalar_lea.vmem %s1819_s4, %s1673_s22 }
 0x169   : > { %v666_v42 = vpop.xlane.xlu0 %665 }
 0x16a   : > { %v676_v43 = vsub.f32 %v520_v17, %v666_v42 }
 0x16c   : > { %v680_v44 = vmul.f32 1.442695, %v676_v43 }
 0x16e   : > { %1515 = vpow2.f32 %v680_v44 }
 0x17b   : > { %v1516_v45 = vpop.eup %1515 }
 0x17c   : > { %v688_v46 = vsel %vm663_vm2, %v1516_v45, 0.0 }
 0x188   : > { %689 = vadd.xlane.f32.xlu1 %v688_v46 }
 0x1dc   : > { %v669_v48 = vpop.xlane.xlu1 %668  ;;  %v672_v49 = vpop.xlane.xlu0 %671 }
 0x1dd   : > { %v677_v50 = vsub.f32 %v566_v24, %v669_v48  ;;  %v678_v51 = vsub.f32 %v612_v25, %v672_v49  ;;  %v1508_v25 = vld [vmem:[%s1820_s5] sm:$0xff]  }
 0x1df   : > { %v682_v52 = vmul.f32 1.442695, %v677_v50  ;;  %v684_v53 = vmul.f32 1.442695, %v678_v51 }
 0x1e0   : > { %v466_v54 = vpop.permute.xlu1 %465 }
 0x1e1   : > { %1517 = vpow2.f32 %v682_v52  ;;  %v763_v55 = vsel %vm715_vm3, %v466_v54, 0 }
 0x1e2   : > { %1519 = vpow2.f32 %v684_v53  ;;  %1413 = vmatpush3.bf16.msra.mxu1 %v763_v55 }
 0x1e3   : > { %1424 = vmatprep.subr.bf16.mxu1 %v1573_v0 }
 0x1e4   : > { %v675_v56 = vpop.xlane.xlu0 %674 }
 0x1e5   : > { %v679_v57 = vsub.f32 %v658_v35, %v675_v56 }
 0x1e7   : > { %v686_v58 = vmul.f32 1.442695, %v679_v57 }
 0x1e9   : > { %1521 = vpow2.f32 %v686_v58 }
 0x1ee   : > { %v1518_v59 = vpop.eup %1517 }
 0x1ef   : > { %v1520_v60 = vpop.eup %1519  ;;  %v691_v61 = vsel %vm663_vm2, %v1518_v59, 0.0 }
 0x1f0   : > { %692 = vadd.xlane.f32.xlu0 %v691_v61  ;;  %v694_v62 = vsel %vm663_vm2, %v1520_v60, 0.0 }
 0x1f1   : > { %695 = vadd.xlane.f32.xlu1 %v694_v62 }
 0x1f6   : > { %v1522_v63 = vpop.eup %1521 }
 0x1f7   : > { %v697_v1 = vsel %vm663_vm2, %v1522_v63, 0.0 }
 0x1f8   : > { %698 = vadd.xlane.f32.xlu0 %v697_v1 }
 0x202   : > { %469 = vrot.lane.b32.xlu1 %v463_v41, %s1577_s28 }
 0x20e   : > { %467 = vrot.lane.b32.xlu0 %v463_v41, %s1575_s26 }
 0x211   : > { %v690_v2 = vpop.xlane.xlu1 %689 }
 0x212   : > { %1523 = vrcp.f32 %v690_v2 }
 0x21f   : > { %v1524_v3 = vpop.eup %1523 }
 0x220   : > { %v704_v4 = vmul.f32 %v1524_v3, %v1516_v45 }
 0x222   : > { %v708_v5 = vpack.c.bf16 %v704_v4, %v704_v4 }
 0x224   : > { %1409 = vmatmul.mubr.msk.bf16.vlgmr.msra.gmra.mxu0 %vm663_vm2, %v708_v5 }
 0x225   : > { %1420 = vmatprep.mubr.msk.bf16.mxu0 %vm1574_vm0, %v1573_v0 }
 0x279   : > { %v693_v6 = vpop.xlane.xlu0 %692 }
 0x27a   : > { %v696_v7 = vpop.xlane.xlu1 %695  ;;  %1525 = vrcp.f32 %v693_v6 }
 0x27b   : > { %1527 = vrcp.f32 %v696_v7 }
 0x27e   : > { %v470_v12 = vpop.permute.xlu1 %469 }
 0x27f   : > { %v855_v16 = vsel %vm715_vm3, %v470_v12, 0 }
 0x281   : > { %v699_v8 = vpop.xlane.xlu0 %698 }
 0x282   : > { %1529 = vrcp.f32 %v699_v8 }
 0x285   : > { %v468_v9 = vpop.permute.xlu0 %467 }
 0x286   : > { %v809_v10 = vsel %vm715_vm3, %v468_v9, 0 }
 0x287   : > { %v1526_v11 = vpop.eup %1525  ;;  %1419 = vmatpush3.bf16.msra.mxu0 %v809_v10 }
 0x288   : > { %v1528_v13 = vpop.eup %1527  ;;  %v705_v14 = vmul.f32 %v1526_v11, %v1518_v59  ;;  %1430 = vmatprep.subr.bf16.mxu0 %v1573_v0 }
 0x289   : > { %v706_v15 = vmul.f32 %v1528_v13, %v1520_v60 }
 0x28a   : > { %v709_v17 = vpack.c.bf16 %v705_v14, %v705_v14 }
 0x28b   : > { %v710_v18 = vpack.c.bf16 %v706_v15, %v706_v15  ;;  %v1350_v15 = vld [vmem:[%s1822_s7] ss:$0 sm:$0xff] }
 0x28c   : > { %1415 = vmatmul.mubr.msk.bf16.vlgmr.msra.gmra.mxu1 %vm663_vm2, %v709_v17  ;;  %v1351_v17 = vld [vmem:[%s1823_s8] ss:$0 sm:$0xff] }
 0x28d   : > { %1421 = vmatmul.mubr.msk.bf16.vlgmr.msra.gmra.mxu0 %vm663_vm2, %v710_v18  ;;  %1425 = vmatpush3.bf16.msra.mxu1 %v855_v16 }
 0x28e   : > { %1426 = vmatprep.mubr.msk.bf16.mxu1 %vm1574_vm0, %v1573_v0  ;;  %1438 = vmatprep.subr.bf16.mxu1 %v1573_v0 }
 0x28f   : > { %v1530_v20 = vpop.eup %1529  ;;  %1431 = vmatpush3.bf16.msra.mxu0 %v1509_v19  ;;  %1434 = vmatprep.mubr.msk.bf16.mxu0 %vm1574_vm0, %v1573_v0  ;;  %v1175_v19 = vld [vmem:[%s434_s27] sm:$0xff] }
 0x290   : > { %v707_v22 = vmul.f32 %v1530_v20, %v1522_v63  ;;  %1432 = vmatprep.subr.bf16.mxu0 %v1573_v0  ;;  %v1349_v63 = vld [vmem:[%s1821_s6] ss:$0 sm:$0xff] }
 0x292   : > { %v711_v24 = vpack.c.bf16 %v707_v22, %v707_v22 }
 0x293   : > { %1433 = vmatpush3.bf16.msra.mxu0 %v1510_v21 }
 0x294   : > { %1427 = vmatmul.mubr.msk.bf16.vlgmr.msra.gmra.mxu1 %vm663_vm2, %v711_v24  ;;  %1446 = vmatprep.subr.bf16.mxu0 %v1573_v0 }
 0x295   : > { %1439 = vmatpush3.bf16.msra.mxu1 %v1507_v23  ;;  %1442 = vmatprep.mubr.msk.bf16.mxu1 %vm1574_vm0, %v1573_v0 }
 0x296   : > { %1440 = vmatprep.subr.bf16.mxu1 %v1573_v0 }
 0x299   : > { %1441 = vmatpush3.bf16.msra.mxu1 %v1508_v25 }
 0x29a   : > { %1454 = vmatprep.subr.bf16.mxu1 %v1573_v0 }
 0x2e4   : > { %v753_v26 = vpop.f32.mrf.mxu0 }
 0x2e5   : > { %v913_v28 = vpack.c.bf16 %v753_v26, %v753_v26 }
 0x2e6   : > { %v1410_v29 = vpop.f32.mrf.mxu0 }
 0x2e7   : > { %1443 = vmatmul.mubr.msk.bf16.vlgmr.msra.gmra.mxu1 %vm478_vm1, %v913_v28 }
 0x2e8   : > { %v756_v30 = vpop.f32.mrf.mxu0  ;;  %1455 = vmatpush3.bf16.msra.mxu1 %v1512_v27  ;;  %1458 = vmatprep.mubr.msk.bf16.mxu1 %vm1574_vm0, %v1573_v0 }
 0x2e9   : > { %1456 = vmatprep.subr.bf16.mxu1 %v1573_v0 }
 0x2ea   : > { %v1411_v32 = vpop.f32.mrf.mxu0 }
 0x2ec   : > { %1457 = vmatpush3.bf16.msra.mxu1 %v1514_v31 }
 0x34c   : > { %v799_v33 = vpop.f32.mrf.mxu1 }
 0x34d   : > { %v914_v35 = vpack.c.bf16 %v799_v33, %v799_v33  ;;  %v845_v36 = vpop.f32.mrf.mxu0 }
 0x34e   : > { %v1416_v37 = vpop.f32.mrf.mxu1  ;;  %v1025_v45 = vpack.c.bf16 %v845_v36, %v845_v36 }
 0x34f   : > { %v1422_v38 = vpop.f32.mrf.mxu0  ;;  %1435 = vmatmul.mubr.msk.bf16.vlgmr.msra.gmra.mxu0 %vm478_vm1, %v914_v35 }
 0x350   : > { %1447 = vmatpush3.bf16.msra.mxu0 %v1511_v34  ;;  %v802_v39 = vpop.f32.mrf.mxu1  ;;  %1450 = vmatprep.mubr.msk.bf16.mxu0 %vm1574_vm0, %v1573_v0 }
 0x351   : > { %v848_v41 = vpop.f32.mrf.mxu0  ;;  %1448 = vmatprep.subr.bf16.mxu0 %v1573_v0 }
 0x352   : > { %v1417_v42 = vpop.f32.mrf.mxu1 }
 0x353   : > { %v1423_v43 = vpop.f32.mrf.mxu0 }
 0x354   : > { %1449 = vmatpush3.bf16.msra.mxu0 %v1513_v40  ;;  %v891_v44 = vpop.f32.mrf.mxu1 }
 0x355   : > { %v1082_v46 = vpack.c.bf16 %v891_v44, %v891_v44 }
 0x356   : > { %v1428_v47 = vpop.f32.mrf.mxu1 }
 0x357   : > { %1451 = vmatmul.mubr.msk.bf16.vlgmr.msra.gmra.mxu0 %vm478_vm1, %v1025_v45  ;;  %1459 = vmatmul.mubr.msk.bf16.vlgmr.msra.gmra.mxu1 %vm478_vm1, %v1082_v46 }
 0x358   : > { %v894_v48 = vpop.f32.mrf.mxu1 }
 0x35a   : > { %v1429_v49 = vpop.f32.mrf.mxu1 }
 0x3a7   : > { %v1019_v50 = vpop.f32.mrf.mxu1 }
 0x3a9   : > { %v1444_v51 = vpop.f32.mrf.mxu1 }
 0x3ab   : > { %v1022_v52 = vpop.f32.mrf.mxu1 }
 0x3ad   : > { %v1445_v53 = vpop.f32.mrf.mxu1 }
 0x40f   : > { %v964_v54 = vpop.f32.mrf.mxu0 }
 0x410   : > { %v1020_v57 = vadd.f32 %v1019_v50, %v964_v54 }
 0x411   : > { %v1436_v55 = vpop.f32.mrf.mxu0 }
 0x413   : > { %v967_v0 = vpop.f32.mrf.mxu0 }
 0x415   : > { %v1437_v56 = vpop.f32.mrf.mxu0 }
 0x417   : > { %v1075_v58 = vpop.f32.mrf.mxu0  ;;  %v1132_v59 = vpop.f32.mrf.mxu1 }
 0x418   : > { %v1081_v60 = vadd.f32 %v1075_v58, %v1020_v57 }
 0x419   : > { %v1452_v61 = vpop.f32.mrf.mxu0  ;;  %v1460_v62 = vpop.f32.mrf.mxu1 }
 0x41a   : > { %v1138_v1 = vadd.f32 %v1132_v59, %v1081_v60 }
 0x41b   : > { %v1078_v2 = vpop.f32.mrf.mxu0  ;;  %v1135_v3 = vpop.f32.mrf.mxu1 }
 0x41c   : > { %v1146_v4 = vadd.f32 %v1349_v63, %v1138_v1 }
 0x41d   : > { %v1453_v5 = vpop.f32.mrf.mxu0  ;;  %v1461_v6 = vpop.f32.mrf.mxu1 }
 0x41e   : > { %1149 = vadd.xlane.f32.xlu1 %v1146_v4 }
 0x4a7   : > { %v1150_v7 = vpop.xlane.xlu1 %1149 }
 0x4a8   : > { %v1152_v8 = vmul.f32 0.0078125, %v1150_v7 }
 0x4aa   : > { %v1153_v9 = vsub.f32 %v1146_v4, %v1152_v8 }
 0x4ac   : > { %v1154_v10 = vmul.f32 %v1153_v9, %v1153_v9 }
 0x4ae   : > { %1155 = vadd.xlane.f32.xlu0 %v1154_v10 }
 0x537   : > { %v1156_v11 = vpop.xlane.xlu0 %1155 }
 0x538   : > { %v1157_v12 = vmul.f32 0.0078125, %v1156_v11 }
 0x53a   : > { %v1158_v13 = vadd.f32 1e-05, %v1157_v12 }
 0x53c   : > { %1531 = vrsqrt.f32 %v1158_v13 }
 0x549   : > { %v1532_v14 = vpop.eup %1531 }
 0x54a   : > { %v1160_v16 = vmul.f32 %v1532_v14, %v1153_v9 }
 0x54c   : > { %v1167_v18 = vmul.f32 %v1350_v15, %v1160_v16 }
 0x54e   : > { %v1174_v20 = vadd.f32 %v1351_v17, %v1167_v18 }
 0x550   : > { %v1176_v21 = vadd.f32 %v1175_v19, %v1174_v20 }
 0x552   : > { %1177 = vst [vmem:[%s442_s18] sm:$0xff] %v1176_v21 }
 0x553 PF: > { %s19_s13 = sadd.s32 1, %s1571_s13   ;;  %s1825_s30 = smov %s1563_s11 }
 0x554   : > { %p16_p7 = scmp.ge.s32.totalorder %s19_s13, 6   ;;  %s1826_s10 = smov %s1567_s12 }
 0x555   : > { %s1827_s11 = smov %s1830_s14  ;;  %s1828_s12 = smov %s1834_s15 }
 0x556   :  { %18 = sbr.rel (!%p16_p7) target bundleno = 3 (0x3), region = 98 }

// kernel: transformer_decoder.25
= control target key start
LH: loop header
LB: loop body
LE: loop exit
PB: predicated region body
PF: predicated region fallthrough
CT: control target
= control target key end

     0   :  { %8 = vsyncpa [#allocation3], 0  ;;  %s651_s0 = inlined_call_operand.vmem [shape: f32[2,16,128], index: 0, kind: input, shape index: {}]   ;;  %s652_s1 = inlined_call_operand.vmem [shape: f32[1,128], index: 1, kind: input, shape index: {}]   ;;  %s653_s2 = inlined_call_operand.vmem [shape: f32[1,128], index: 2, kind: input, shape index: {}]   ;;  %s654_s3 = inlined_call_operand.hbm [shape: f32[2,16,128], index: 3, kind: output, shape index: {}]  }
   0x1   :  { %10 = vsyncpa [#allocation3 + $0x1], 0  ;;  %s521_s12 = smov 0   ;;  %s523_s13 = smov 0  }
   0x2   :  { %s525_s14 = smov 0   ;;  %s527_s15 = smov 0  }
   0x3   :  { %s529_s16 = smov 0   ;;  %s531_s17 = smov 0  }
   0x4   :  { %s533_s18 = smov 0   ;;  %s535_s19 = smov 0  }
   0x5 LB: > { %s318_s20 = sadd.s32 4294967295, %s498_s19   ;;  %s319_s21 = sadd.s32 4294967294, %s498_s19   ;;  %s498_s19 = sphi %s535_s19, %s16_s19   ;;  %s494_s18 = sphi %s533_s18, %s663_s18   ;;  %s490_s17 = sphi %s531_s17, %s662_s17   ;;  %s486_s16 = sphi %s529_s16, %s661_s16   ;;  %s482_s15 = sphi %s527_s15, %s660_s15   ;;  %s478_s14 = sphi %s525_s14, %s659_s14   ;;  %s474_s13 = sphi %s523_s13, %s658_s13   ;;  %s470_s12 = sphi %s521_s12, %s657_s12  }
   0x6   : > { %s25_s22 = sadd.s32 1, %s490_s17  ;;  %s28_s23 = sadd.s32 1, %s494_s18 }
   0x7   : > { %p26_p0 = scmp.ge.s32.totalorder %s25_s22, 2  ;;  %p117_p1 = scmp.ne.s32.totalorder %s478_s14, %s474_s13 }
   0x8   : > { %p118_p2 = scmp.eq.s32.totalorder %s318_s20, 3  ;;  %p123_p5 = scmp.ne.s32.totalorder %s474_s13, %s470_s12 }
   0x9   : > { %s665_s22 = smov (%p26_p0, %s25_s22), 0  ;;  %s667_s23 = smov (!%p26_p0, %s28_s23), %s494_s18 }
   0xa   : > { %s103_s24 = ssub.s32 %s490_s17, %s665_s22  ;;  %p572_p3 = por %p118_p2, %p117_p1 }
   0xb   : > { %p30_p4 = scmp.ge.s32.totalorder %s667_s23, 2  ;;  %p124_p6 = scmp.eq.s32.totalorder %s319_s21, 3 }
   0xc   : > { %p322_p7 = scmp.ge.s32.totalorder %s498_s19, 1  ;;  %p159_p9 = scmp.lt.s32.totalorder %s498_s19, 5 }
   0xd   : > { %s669_s23 = smov (%p30_p4, %s667_s23), 0  ;;  %p581_p8 = por %p124_p6, %p123_p5 }
   0xe   : > { %s102_s27 = ssub.s32 %s494_s18, %s669_s23  ;;  %s107_s28 = sadd.s32 1, %s478_s14 }
   0xf   : > { %s104_s29 = sor.u32 %s103_s24, %s102_s27  ;;  %p160_p10 = pnand %p322_p7, %p159_p9 }
  0x10   : > { %p105_p11 = scmp.eq.s32.totalorder %s104_s29, 0  ;;  %p186_p12 = scmp.lt.s32.totalorder (!%p160_p10), %s486_s16, 1 }
  0x11   : > { %163 = sbr.rel (%p160_p10) target bundleno = 348 (0x15c), region = 32  ;;  %p188_p13 = scmp.lt.s32.totalorder (!%p160_p10), %s482_s15, 1 }
  0x12   : > { %s590_s30 = scalar_select %p105_p11, %s478_s14, %s107_s28  }
  0x13   : > { %s183_s20 = sand.u32 (!%p160_p10), 1, %s474_s13   ;;  %s329_s24 = sshll.u32 (!%p160_p10), %s486_s16, 1 }
  0x14   : > { %s323_s21 = sshll.u32 (!%p160_p10), %s183_s20, 3  ;;  %s236_s27 = sadd.s32 (!%p160_p10), %s482_s15, %s329_s24 }
  0x15   : > { %s500_s24 = smov (!%p160_p10), [#allocation2]  }
  0x16   : > { %s187_s4 = scalar_select %p186_p12, %s486_s16, 1  ;;  %v326_v9 = vld [vmem:[%s652_s1] ss:$0 sm:$0xff] }
  0x17   : > { %s189_s5 = scalar_select %p188_p13, %s482_s15, 1  ;;  %v327_v11 = vld [vmem:[%s653_s2] ss:$0 sm:$0xff] }
  0x18   : > { %s324_s6 = sshll.u32 %s187_s4, 1  ;;  %s225_s16 = scalar_lea.sflag [#allocation3], %s183_s20 }
  0x19   : > { %s191_s7 = sadd.s32 %s324_s6, %s189_s5  ;;  %s330_s6 = sshll.u32 %s236_s27, 7 }
  0x1a   : > { %s325_s8 = sshll.u32 %s191_s7, 3  ;;  %s185_s7 = scalar_lea.vmem [#allocation2], %s323_s21 }
  0x1b   : > { %s193_s11 = scalar_lea.vmem %s651_s0, %s325_s8  ;;  %s240_s8 = sshll.u32 %s185_s7, 4  ;;  %s241_s8 = int_to_ptr.vmem [resolvable:$true] %s240_s8 }
  0x1c   : > { %v194_v0 = vld [vmem:[%s193_s11] sm:$0xff]  ;;  %s238_s15 = scalar_lea.hbm %s654_s3, %s330_s6  ;;  %s406_s11 = scalar_lea.vmem %s241_s8, 128 }
  0x1d   : > { %197 = vadd.xlane.f32.xlu0 %v194_v0  ;;  %p407_p0 = scmp.ne.s32.totalorder %s241_s8, %s406_s11  ;;  %s410_s28 = sshll.u32 %s500_s24, 4  ;;  %s411_s28 = int_to_ptr.vmem [resolvable:$false] %s410_s28 }
  0x1e   : > { %s412_s27 = scalar_lea.vmem %s411_s28, 256  ;;  %p413_p4 = scmp.lt.s32.totalorder %s241_s8, %s411_s28 }
  0x1f   : > { %p408_p1 = pnand %p407_p0, %p572_p3  ;;  %p414_p5 = scmp.lt.s32.totalorder %s412_s27, %s406_s11 }
  0x21   : > { %p409_p2 = pneg %p408_p1  ;;  %p415_p6 = por %p414_p5, %p413_p4 }
  0x23   : > { %p416_p7 = pnand %p415_p6, %p409_p2 }
  0xa6   : > { %v198_v1 = vpop.xlane.xlu0 %197 }
  0xa7   : > { %v200_v2 = vmul.f32 0.0078125, %v198_v1 }
  0xa9   : > { %v201_v3 = vsub.f32 %v194_v0, %v200_v2 }
  0xab   : > { %v202_v4 = vmul.f32 %v201_v3, %v201_v3 }
  0xad   : > { %203 = vadd.xlane.f32.xlu0 %v202_v4 }
 0x136   : > { %v204_v5 = vpop.xlane.xlu0 %203 }
 0x137   : > { %v205_v6 = vmul.f32 0.0078125, %v204_v5 }
 0x139   : > { %v206_v7 = vadd.f32 1e-05, %v205_v6 }
 0x13b   : > { %404 = vrsqrt.f32 %v206_v7 }
 0x148   : > { %v405_v8 = vpop.eup %404 }
 0x149   : > { %v208_v10 = vmul.f32 %v405_v8, %v201_v3 }
 0x14b   : > { %v215_v12 = vmul.f32 %v326_v9, %v208_v10 }
 0x14d   : > { %v222_v13 = vadd.f32 %v327_v11, %v215_v12 }
 0x14f   : > { %223 = vst [vmem:[%s185_s7] sm:$0xff] %v222_v13 }
 0x150   : > { %419 = shalt.err (!%p416_p7)
}
 0x151   : > { %s420_s21 = scalar_lea.hbm %s238_s15, 128  ;;  %s424_s4 = scalar_lea.hbm %s654_s3, 512 }
 0x152   : > { %p421_p9 = scmp.ne.s32.totalorder %s238_s15, %s420_s21  ;;  %p425_p12 = scmp.lt.s32.totalorder %s238_s15, %s654_s3 }
 0x153   : > { %p426_p13 = scmp.lt.s32.totalorder %s424_s4, %s420_s21 }
 0x154   : > { %p422_p10 = pnand %p421_p9, %p572_p3 }
 0x155   : > { %p427_p0 = por %p426_p13, %p425_p12 }
 0x156   : > { %p423_p11 = pneg %p422_p10 }
 0x158   : > { %p428_p1 = pnand %p427_p0, %p423_p11 }
 0x15a   : > { %431 = shalt.err (!%p428_p1)
}
 0x15b   : > { %333 = dma.vmem_to_hbm [thread:$0]  (%p572_p3), %s241_s8, 128, %s238_s15, %s225_s16  }
 0x15c PF: > { %p339_p2 = scmp.ge.s32.totalorder %s498_s19, 2  ;;  %s252_s7 = sand.u32 1, %s470_s12  }
 0x15d   : > { %s253_s9 = scalar_lea.sflag [#allocation3], %s252_s7 }
 0x15e   : > { %p336_p4 = pnand %p339_p2, %p581_p8 }
 0x160   : > { %p337_p5 = pneg %p336_p4 }
 0x162   : > { %465 = dma.done.wait (%p337_p5), %s253_s9, 128  }
 0x163   : > { %467 = vsyncadd (%p337_p5), %s253_s9, 4294967168  ;;  %s16_s19 = sadd.s32 1, %s498_s19   ;;  %s657_s12 = smov %s474_s13 }
 0x164   : > { %p13_p6 = scmp.ge.s32.totalorder %s16_s19, 6   ;;  %s658_s13 = smov %s478_s14 }
 0x165   : > { %s659_s14 = smov %s590_s30  ;;  %s660_s15 = smov %s490_s17 }
 0x166   : > { %s661_s16 = smov %s494_s18  ;;  %s662_s17 = smov %s665_s22 }
 0x167   : > { %s663_s18 = smov %s669_s23  ;;  %15 = sbr.rel (!%p13_p6) target bundleno = 5 (0x5), region = 67 }
 0x16c   :  { %258 = vsyncpa [#allocation3], 1 }
 0x16d   :  { %260 = vsyncpa [#allocation3 + $0x1], 1 }

</bundles_post_ra>
